<compile_context>
chip_gen: v7x
topology: tpu7x:2x2x1
jax: 0.10.0
libtpu: 0.0.40
codegen_flags: <defaults>
</compile_context>

<pallas_src>
import jax
import jax.numpy as jnp
from jax.experimental import pallas as pl
from jax.experimental.pallas import tpu as pltpu

HID1, HID2, HID3 = 1024, 512, 512
HEAD_PAD = 128          # lane-dense padded width of the last layer
MAX_A = 0.56


def actor_kernel(x_ref,
                 w1_ref, b1_ref,
                 w2_ref, b2_ref,
                 w3_ref, b3_ref,
                 w4_ref, b4_ref,
                 o_ref):
    # fc1 + relu  (bf16 MXU operands, f32 accumulation, f32 bias/activations)
    h = jnp.dot(x_ref[...], w1_ref[...], preferred_element_type=jnp.float32)
    h = jnp.maximum(h + b1_ref[...], 0.0)
    # fc2 + relu
    h = jnp.dot(h.astype(jnp.bfloat16), w2_ref[...],
                preferred_element_type=jnp.float32)
    h = jnp.maximum(h + b2_ref[...], 0.0)
    # fc3 + relu
    h = jnp.dot(h.astype(jnp.bfloat16), w3_ref[...],
                preferred_element_type=jnp.float32)
    h = jnp.maximum(h + b3_ref[...], 0.0)
    # fc4 + tanh, scaled by max_a   (lane-padded head, N = 128)
    h = jnp.dot(h.astype(jnp.bfloat16), w4_ref[...],
                preferred_element_type=jnp.float32)
    h = jnp.tanh(h + b4_ref[...])
    o_ref[...] = (h * MAX_A).astype(o_ref.dtype)


def _resident_spec(shape, single_buffer):
    """Whole array, constant block index -> stays VMEM-resident across grid."""
    index_map = lambda i: (0,) * len(shape)
    if single_buffer:
        # Constant index_map: 1 buffer is enough; double-buffering only doubles
        # the resident-weight VMEM footprint (~1.7 MiB -> ~3.4 MiB).
        return pl.BlockSpec(shape, index_map, pipeline_mode=pl.Buffered(1))
    return pl.BlockSpec(shape, index_map)


def _round_up(x, m):
    return ((x + m - 1) // m) * m


def _choose_block_b(B):
    if B <= 16:
        # Tiny batch: one grid step (weight-DMA-bound regime anyway).
        return _round_up(max(B, 8), 8)
    if B <= 1024:
        # Ensure >= 2 grid steps so "parallel" gives both v7x TCs work,
        # while keeping an MXU-friendly M of <= 256.
        return min(256, _round_up(pl.cdiv(B, 2), 8))
    # Large batch: 512 amortizes per-step overhead, stays v5e-VMEM-safe.
    return 512


def actor_forward(obs, params, dim_a, *, block_b=None):
    """obs: (B, dim_o) f32/bf16. params: bf16 weights / f32 biases (head padded)."""
    B, dim_o = obs.shape
    w1, b1 = params["w1"], params["b1"]
    w2, b2 = params["w2"], params["b2"]
    w3, b3 = params["w3"], params["b3"]
    w4, b4 = params["w4"], params["b4"]
    n_out = w4.shape[1]  # lane-padded head width (128)

    if block_b is None:
        block_b = _choose_block_b(B)
    grid_b = pl.cdiv(B, block_b)
    b_pad = grid_b * block_b
    if b_pad != B:
        obs = jnp.pad(obs, ((0, b_pad - B), (0, 0)))
    # bf16 obs: halves the obs HBM read and the double-buffered obs VMEM tile.
    obs = obs.astype(jnp.bfloat16)

    # One grid step -> "parallel" would leave the second TC idle and (if it
    # sharded) duplicate the weight DMA; keep it on one core.
    semantics = ("parallel",) if grid_b >= 2 else ("arbitrary",)

    weight_bytes = sum(int(a.size) * a.dtype.itemsize
                       for a in (w1, b1, w2, b2, w3, b3, w4, b4))
    cost = pl.CostEstimate(
        flops=2 * b_pad * (dim_o * HID1 + HID1 * HID2 + HID2 * HID3 + HID3 * n_out),
        transcendentals=b_pad * n_out,
        bytes_accessed=weight_bytes + int(obs.size) * 2 + b_pad * n_out * 2,
    )

    def build_call(single_buffer):
        return pl.pallas_call(
            actor_kernel,
            out_shape=jax.ShapeDtypeStruct((b_pad, n_out), jnp.bfloat16),
            grid=(grid_b,),
            in_specs=[
                pl.BlockSpec((block_b, dim_o), lambda i: (i, 0)),   # obs tile
                _resident_spec(w1.shape, single_buffer),
                _resident_spec(b1.shape, single_buffer),
                _resident_spec(w2.shape, single_buffer),
                _resident_spec(b2.shape, single_buffer),
                _resident_spec(w3.shape, single_buffer),
                _resident_spec(b3.shape, single_buffer),
                _resident_spec(w4.shape, single_buffer),
                _resident_spec(b4.shape, single_buffer),
            ],
            out_specs=pl.BlockSpec((block_b, n_out), lambda i: (i, 0)),
            compiler_params=pltpu.CompilerParams(
                dimension_semantics=semantics,
            ),
            cost_estimate=cost,
        )

    args = (obs, w1, b1, w2, b2, w3, b3, w4, b4)
    try:
        out = build_call(True)(*args)
    except Exception:
        # Fallback if this jax build rejects pl.Buffered(1) on resident inputs.
        out = build_call(False)(*args)

    return out[:B, :dim_a]


def init_actor_params(key, dim_o, dim_a):
    """PyTorch-style uniform(-1/sqrt(fan_in), +1/sqrt(fan_in)) init.

    Weights are (in_features, out_features) in bf16 (MXU-native); biases are
    (1, out_features) in f32. The last layer is zero-padded to HEAD_PAD
    columns so the final matmul / store are lane-dense (padding must stay
    exactly zero for the padded head columns to be zero).
    """
    dims = [(dim_o, HID1), (HID1, HID2), (HID2, HID3), (HID3, dim_a)]
    params = {}
    keys = jax.random.split(key, 2 * len(dims))
    for i, (fan_in, fan_out) in enumerate(dims):
        bound = float(fan_in) ** -0.5
        w = jax.random.uniform(keys[2 * i], (fan_in, fan_out),
                               minval=-bound, maxval=bound, dtype=jnp.float32)
        b = jax.random.uniform(keys[2 * i + 1], (1, fan_out),
                               minval=-bound, maxval=bound, dtype=jnp.float32)
        if i == len(dims) - 1 and fan_out < HEAD_PAD:
            w = jnp.pad(w, ((0, 0), (0, HEAD_PAD - fan_out)))
            b = jnp.pad(b, ((0, 0), (0, HEAD_PAD - fan_out)))
        params[f"w{i + 1}"] = w.astype(jnp.bfloat16)
        params[f"b{i + 1}"] = b  # keep biases f32
    return params


if __name__ == "__main__":
    key = jax.random.PRNGKey(0)
    k_obs, k_par = jax.random.split(key)

    batch, dim_o, dim_a = 8, 32, 8
    obs = jax.random.normal(k_obs, (batch, dim_o), dtype=jnp.float32)
    params = init_actor_params(k_par, dim_o, dim_a)

    out = actor_forward(obs, params, dim_a)
    out = jax.block_until_ready(out)

    # Pure-JAX reference mimicking the same bf16-weight / f32-accum path.
    def ref(x, p, da):
        def lin(h, w, b):
            return jnp.dot(h.astype(jnp.bfloat16), w,
                           preferred_element_type=jnp.float32) + b
        h = jnp.maximum(lin(x, p["w1"], p["b1"]), 0.0)
        h = jnp.maximum(lin(h, p["w2"], p["b2"]), 0.0)
        h = jnp.maximum(lin(h, p["w3"], p["b3"]), 0.0)
        return (jnp.tanh(lin(h, p["w4"], p["b4"])) * MAX_A)[:, :da]

    expected = ref(obs, params, dim_a)
    out_f32 = out.astype(jnp.float32)
    assert out.shape == (batch, dim_a)
    assert bool(jnp.all(jnp.abs(out_f32) <= MAX_A + 1e-2))
    assert bool(jnp.allclose(out_f32, expected, atol=2e-2, rtol=2e-2))

    print("KERNEL_OK")
</pallas_src>

<mosaic_0001>
module attributes {stable_mosaic.version = 11 : i64} {
  func.func @actor_kernel(%arg0: i32, %arg1: memref<8x32xbf16, #tpu.memory_space<vmem>>, %arg2: memref<32x1024xbf16, #tpu.memory_space<vmem>>, %arg3: memref<1x1024xf32, #tpu.memory_space<vmem>>, %arg4: memref<1024x512xbf16, #tpu.memory_space<vmem>>, %arg5: memref<1x512xf32, #tpu.memory_space<vmem>>, %arg6: memref<512x512xbf16, #tpu.memory_space<vmem>>, %arg7: memref<1x512xf32, #tpu.memory_space<vmem>>, %arg8: memref<512x128xbf16, #tpu.memory_space<vmem>>, %arg9: memref<1x128xf32, #tpu.memory_space<vmem>>, %arg10: memref<8x128xbf16, #tpu.memory_space<vmem>>) attributes {dimension_semantics = [#tpu.dimension_semantics<arbitrary>], iteration_bounds = array<i64: 1>, scalar_prefetch = 0 : i64, scratch_operands = 0 : i64, tpu.core_type = #tpu.core_type<tc>, window_params = [{transform_indices = @transform_0, window_bounds = array<i64: 8, 32>}, {pipeline_mode = #tpu.pipeline_mode<synchronous>, transform_indices = @transform_1, window_bounds = array<i64: 32, 1024>}, {pipeline_mode = #tpu.pipeline_mode<synchronous>, transform_indices = @transform_2, window_bounds = array<i64: 1, 1024>}, {pipeline_mode = #tpu.pipeline_mode<synchronous>, transform_indices = @transform_3, window_bounds = array<i64: 1024, 512>}, {pipeline_mode = #tpu.pipeline_mode<synchronous>, transform_indices = @transform_4, window_bounds = array<i64: 1, 512>}, {pipeline_mode = #tpu.pipeline_mode<synchronous>, transform_indices = @transform_5, window_bounds = array<i64: 512, 512>}, {pipeline_mode = #tpu.pipeline_mode<synchronous>, transform_indices = @transform_6, window_bounds = array<i64: 1, 512>}, {pipeline_mode = #tpu.pipeline_mode<synchronous>, transform_indices = @transform_7, window_bounds = array<i64: 512, 128>}, {pipeline_mode = #tpu.pipeline_mode<synchronous>, transform_indices = @transform_8, window_bounds = array<i64: 1, 128>}, {transform_indices = @transform_9, window_bounds = array<i64: 8, 128>}]} {
    %c0 = arith.constant 0 : index
    %c0_0 = arith.constant 0 : index
    %0 = vector.load %arg1[%c0, %c0_0] : memref<8x32xbf16, #tpu.memory_space<vmem>>, vector<8x32xbf16>
    %c0_1 = arith.constant 0 : index
    %c0_2 = arith.constant 0 : index
    %1 = vector.load %arg2[%c0_1, %c0_2] : memref<32x1024xbf16, #tpu.memory_space<vmem>>, vector<32x1024xbf16>
    %cst = arith.constant dense<0.000000e+00> : vector<8x1024xf32>
    %2 = tpu.matmul %0, %1, %cst {dimension_numbers = #tpu.dot_dimension_numbers<[1], [0], [0], [1], [0, 0, 1, 1], [], []>} : vector<8x32xbf16>, vector<32x1024xbf16>, vector<8x1024xf32> -> vector<8x1024xf32>
    %c0_3 = arith.constant 0 : index
    %c0_4 = arith.constant 0 : index
    %3 = vector.load %arg3[%c0_3, %c0_4] : memref<1x1024xf32, #tpu.memory_space<vmem>>, vector<1x1024xf32>
    %4 = vector.broadcast %3 : vector<1x1024xf32> to vector<8x1024xf32>
    %5 = arith.addf %2, %4 : vector<8x1024xf32>
    %cst_5 = arith.constant 0.000000e+00 : f32
    %6 = vector.broadcast %cst_5 : f32 to vector<8x1024xf32>
    %7 = arith.maximumf %5, %6 : vector<8x1024xf32>
    %8 = arith.truncf %7 : vector<8x1024xf32> to vector<8x1024xbf16>
    %c0_6 = arith.constant 0 : index
    %c0_7 = arith.constant 0 : index
    %9 = vector.load %arg4[%c0_6, %c0_7] : memref<1024x512xbf16, #tpu.memory_space<vmem>>, vector<1024x512xbf16>
    %cst_8 = arith.constant dense<0.000000e+00> : vector<8x512xf32>
    %10 = tpu.matmul %8, %9, %cst_8 {dimension_numbers = #tpu.dot_dimension_numbers<[1], [0], [0], [1], [0, 0, 1, 1], [], []>} : vector<8x1024xbf16>, vector<1024x512xbf16>, vector<8x512xf32> -> vector<8x512xf32>
    %c0_9 = arith.constant 0 : index
    %c0_10 = arith.constant 0 : index
    %11 = vector.load %arg5[%c0_9, %c0_10] : memref<1x512xf32, #tpu.memory_space<vmem>>, vector<1x512xf32>
    %12 = vector.broadcast %11 : vector<1x512xf32> to vector<8x512xf32>
    %13 = arith.addf %10, %12 : vector<8x512xf32>
    %cst_11 = arith.constant 0.000000e+00 : f32
    %14 = vector.broadcast %cst_11 : f32 to vector<8x512xf32>
    %15 = arith.maximumf %13, %14 : vector<8x512xf32>
    %16 = arith.truncf %15 : vector<8x512xf32> to vector<8x512xbf16>
    %c0_12 = arith.constant 0 : index
    %c0_13 = arith.constant 0 : index
    %17 = vector.load %arg6[%c0_12, %c0_13] : memref<512x512xbf16, #tpu.memory_space<vmem>>, vector<512x512xbf16>
    %cst_14 = arith.constant dense<0.000000e+00> : vector<8x512xf32>
    %18 = tpu.matmul %16, %17, %cst_14 {dimension_numbers = #tpu.dot_dimension_numbers<[1], [0], [0], [1], [0, 0, 1, 1], [], []>} : vector<8x512xbf16>, vector<512x512xbf16>, vector<8x512xf32> -> vector<8x512xf32>
    %c0_15 = arith.constant 0 : index
    %c0_16 = arith.constant 0 : index
    %19 = vector.load %arg7[%c0_15, %c0_16] : memref<1x512xf32, #tpu.memory_space<vmem>>, vector<1x512xf32>
    %20 = vector.broadcast %19 : vector<1x512xf32> to vector<8x512xf32>
    %21 = arith.addf %18, %20 : vector<8x512xf32>
    %cst_17 = arith.constant 0.000000e+00 : f32
    %22 = vector.broadcast %cst_17 : f32 to vector<8x512xf32>
    %23 = arith.maximumf %21, %22 : vector<8x512xf32>
    %24 = arith.truncf %23 : vector<8x512xf32> to vector<8x512xbf16>
    %c0_18 = arith.constant 0 : index
    %c0_19 = arith.constant 0 : index
    %25 = vector.load %arg8[%c0_18, %c0_19] : memref<512x128xbf16, #tpu.memory_space<vmem>>, vector<512x128xbf16>
    %cst_20 = arith.constant dense<0.000000e+00> : vector<8x128xf32>
    %26 = tpu.matmul %24, %25, %cst_20 {dimension_numbers = #tpu.dot_dimension_numbers<[1], [0], [0], [1], [0, 0, 1, 1], [], []>} : vector<8x512xbf16>, vector<512x128xbf16>, vector<8x128xf32> -> vector<8x128xf32>
    %c0_21 = arith.constant 0 : index
    %c0_22 = arith.constant 0 : index
    %27 = vector.load %arg9[%c0_21, %c0_22] : memref<1x128xf32, #tpu.memory_space<vmem>>, vector<1x128xf32>
    %28 = vector.broadcast %27 : vector<1x128xf32> to vector<8x128xf32>
    %29 = arith.addf %26, %28 : vector<8x128xf32>
    %30 = math.tanh %29 : vector<8x128xf32>
    %cst_23 = arith.constant 5.600000e-01 : f32
    %31 = vector.broadcast %cst_23 : f32 to vector<8x128xf32>
    %32 = arith.mulf %30, %31 : vector<8x128xf32>
    %33 = arith.truncf %32 : vector<8x128xf32> to vector<8x128xbf16>
    %c0_24 = arith.constant 0 : index
    %c0_25 = arith.constant 0 : index
    %34 = vector.load %arg10[%c0_24, %c0_25] : memref<8x128xbf16, #tpu.memory_space<vmem>>, vector<8x128xbf16>
    tpu.vector_store %arg10[%c0_24, %c0_25], %33 {strides = array<i32>} : memref<8x128xbf16, #tpu.memory_space<vmem>>, vector<8x128xbf16>,
    return
  }
  func.func @transform_0(%arg0: i32) -> (i32, i32) {
    %c0_i32 = arith.constant 0 : i32
    %c0_i32_0 = arith.constant 0 : i32
    return %arg0, %c0_i32 : i32, i32
  }
  func.func @transform_1(%arg0: i32) -> (i32, i32) {
    %c0_i32 = arith.constant 0 : i32
    %c0_i32_0 = arith.constant 0 : i32
    %c0_i32_1 = arith.constant 0 : i32
    return %c0_i32, %c0_i32_0 : i32, i32
  }
  func.func @transform_2(%arg0: i32) -> (i32, i32) {
    %c0_i32 = arith.constant 0 : i32
    %c0_i32_0 = arith.constant 0 : i32
    %c0_i32_1 = arith.constant 0 : i32
    return %c0_i32, %c0_i32_0 : i32, i32
  }
  func.func @transform_3(%arg0: i32) -> (i32, i32) {
    %c0_i32 = arith.constant 0 : i32
    %c0_i32_0 = arith.constant 0 : i32
    %c0_i32_1 = arith.constant 0 : i32
    return %c0_i32, %c0_i32_0 : i32, i32
  }
  func.func @transform_4(%arg0: i32) -> (i32, i32) {
    %c0_i32 = arith.constant 0 : i32
    %c0_i32_0 = arith.constant 0 : i32
    %c0_i32_1 = arith.constant 0 : i32
    return %c0_i32, %c0_i32_0 : i32, i32
  }
  func.func @transform_5(%arg0: i32) -> (i32, i32) {
    %c0_i32 = arith.constant 0 : i32
    %c0_i32_0 = arith.constant 0 : i32
    %c0_i32_1 = arith.constant 0 : i32
    return %c0_i32, %c0_i32_0 : i32, i32
  }
  func.func @transform_6(%arg0: i32) -> (i32, i32) {
    %c0_i32 = arith.constant 0 : i32
    %c0_i32_0 = arith.constant 0 : i32
    %c0_i32_1 = arith.constant 0 : i32
    return %c0_i32, %c0_i32_0 : i32, i32
  }
  func.func @transform_7(%arg0: i32) -> (i32, i32) {
    %c0_i32 = arith.constant 0 : i32
    %c0_i32_0 = arith.constant 0 : i32
    %c0_i32_1 = arith.constant 0 : i32
    return %c0_i32, %c0_i32_0 : i32, i32
  }
  func.func @transform_8(%arg0: i32) -> (i32, i32) {
    %c0_i32 = arith.constant 0 : i32
    %c0_i32_0 = arith.constant 0 : i32
    %c0_i32_1 = arith.constant 0 : i32
    return %c0_i32, %c0_i32_0 : i32, i32
  }
  func.func @transform_9(%arg0: i32) -> (i32, i32) {
    %c0_i32 = arith.constant 0 : i32
    %c0_i32_0 = arith.constant 0 : i32
    return %arg0, %c0_i32 : i32, i32
  }
}

module attributes {stable_mosaic.version = 11 : i64} {
  func.func @actor_kernel(%arg0: i32, %arg1: memref<8x32xbf16, #tpu.memory_space<vmem>>, %arg2: memref<32x1024xbf16, #tpu.memory_space<vmem>>, %arg3: memref<1x1024xf32, #tpu.memory_space<vmem>>, %arg4: memref<1024x512xbf16, #tpu.memory_space<vmem>>, %arg5: memref<1x512xf32, #tpu.memory_space<vmem>>, %arg6: memref<512x512xbf16, #tpu.memory_space<vmem>>, %arg7: memref<1x512xf32, #tpu.memory_space<vmem>>, %arg8: memref<512x128xbf16, #tpu.memory_space<vmem>>, %arg9: memref<1x128xf32, #tpu.memory_space<vmem>>, %arg10: memref<8x128xbf16, #tpu.memory_space<vmem>>) attributes {dimension_semantics = [#tpu.dimension_semantics<arbitrary>], iteration_bounds = array<i64: 1>, scalar_prefetch = 0 : i64, scratch_operands = 0 : i64, tpu.core_type = #tpu.core_type<tc>, window_params = [{transform_indices = @transform_0, window_bounds = array<i64: 8, 32>}, {pipeline_mode = #tpu.pipeline_mode<synchronous>, transform_indices = @transform_1, window_bounds = array<i64: 32, 1024>}, {pipeline_mode = #tpu.pipeline_mode<synchronous>, transform_indices = @transform_2, window_bounds = array<i64: 1, 1024>}, {pipeline_mode = #tpu.pipeline_mode<synchronous>, transform_indices = @transform_3, window_bounds = array<i64: 1024, 512>}, {pipeline_mode = #tpu.pipeline_mode<synchronous>, transform_indices = @transform_4, window_bounds = array<i64: 1, 512>}, {pipeline_mode = #tpu.pipeline_mode<synchronous>, transform_indices = @transform_5, window_bounds = array<i64: 512, 512>}, {pipeline_mode = #tpu.pipeline_mode<synchronous>, transform_indices = @transform_6, window_bounds = array<i64: 1, 512>}, {pipeline_mode = #tpu.pipeline_mode<synchronous>, transform_indices = @transform_7, window_bounds = array<i64: 512, 128>}, {pipeline_mode = #tpu.pipeline_mode<synchronous>, transform_indices = @transform_8, window_bounds = array<i64: 1, 128>}, {transform_indices = @transform_9, window_bounds = array<i64: 8, 128>}]} {
    %c0 = arith.constant 0 : index
    %c0_0 = arith.constant 0 : index
    %0 = vector.load %arg1[%c0, %c0_0] : memref<8x32xbf16, #tpu.memory_space<vmem>>, vector<8x32xbf16>
    %c0_1 = arith.constant 0 : index
    %c0_2 = arith.constant 0 : index
    %1 = vector.load %arg2[%c0_1, %c0_2] : memref<32x1024xbf16, #tpu.memory_space<vmem>>, vector<32x1024xbf16>
    %cst = arith.constant dense<0.000000e+00> : vector<8x1024xf32>
    %2 = tpu.matmul %0, %1, %cst {dimension_numbers = #tpu.dot_dimension_numbers<[1], [0], [0], [1], [0, 0, 1, 1], [], []>} : vector<8x32xbf16>, vector<32x1024xbf16>, vector<8x1024xf32> -> vector<8x1024xf32>
    %c0_3 = arith.constant 0 : index
    %c0_4 = arith.constant 0 : index
    %3 = vector.load %arg3[%c0_3, %c0_4] : memref<1x1024xf32, #tpu.memory_space<vmem>>, vector<1x1024xf32>
    %4 = vector.broadcast %3 : vector<1x1024xf32> to vector<8x1024xf32>
    %5 = arith.addf %2, %4 : vector<8x1024xf32>
    %cst_5 = arith.constant 0.000000e+00 : f32
    %6 = vector.broadcast %cst_5 : f32 to vector<8x1024xf32>
    %7 = arith.maximumf %5, %6 : vector<8x1024xf32>
    %8 = arith.truncf %7 : vector<8x1024xf32> to vector<8x1024xbf16>
    %c0_6 = arith.constant 0 : index
    %c0_7 = arith.constant 0 : index
    %9 = vector.load %arg4[%c0_6, %c0_7] : memref<1024x512xbf16, #tpu.memory_space<vmem>>, vector<1024x512xbf16>
    %cst_8 = arith.constant dense<0.000000e+00> : vector<8x512xf32>
    %10 = tpu.matmul %8, %9, %cst_8 {dimension_numbers = #tpu.dot_dimension_numbers<[1], [0], [0], [1], [0, 0, 1, 1], [], []>} : vector<8x1024xbf16>, vector<1024x512xbf16>, vector<8x512xf32> -> vector<8x512xf32>
    %c0_9 = arith.constant 0 : index
    %c0_10 = arith.constant 0 : index
    %11 = vector.load %arg5[%c0_9, %c0_10] : memref<1x512xf32, #tpu.memory_space<vmem>>, vector<1x512xf32>
    %12 = vector.broadcast %11 : vector<1x512xf32> to vector<8x512xf32>
    %13 = arith.addf %10, %12 : vector<8x512xf32>
    %cst_11 = arith.constant 0.000000e+00 : f32
    %14 = vector.broadcast %cst_11 : f32 to vector<8x512xf32>
    %15 = arith.maximumf %13, %14 : vector<8x512xf32>
    %16 = arith.truncf %15 : vector<8x512xf32> to vector<8x512xbf16>
    %c0_12 = arith.constant 0 : index
    %c0_13 = arith.constant 0 : index
    %17 = vector.load %arg6[%c0_12, %c0_13] : memref<512x512xbf16, #tpu.memory_space<vmem>>, vector<512x512xbf16>
    %cst_14 = arith.constant dense<0.000000e+00> : vector<8x512xf32>
    %18 = tpu.matmul %16, %17, %cst_14 {dimension_numbers = #tpu.dot_dimension_numbers<[1], [0], [0], [1], [0, 0, 1, 1], [], []>} : vector<8x512xbf16>, vector<512x512xbf16>, vector<8x512xf32> -> vector<8x512xf32>
    %c0_15 = arith.constant 0 : index
    %c0_16 = arith.constant 0 : index
    %19 = vector.load %arg7[%c0_15, %c0_16] : memref<1x512xf32, #tpu.memory_space<vmem>>, vector<1x512xf32>
    %20 = vector.broadcast %19 : vector<1x512xf32> to vector<8x512xf32>
    %21 = arith.addf %18, %20 : vector<8x512xf32>
    %cst_17 = arith.constant 0.000000e+00 : f32
    %22 = vector.broadcast %cst_17 : f32 to vector<8x512xf32>
    %23 = arith.maximumf %21, %22 : vector<8x512xf32>
    %24 = arith.truncf %23 : vector<8x512xf32> to vector<8x512xbf16>
    %c0_18 = arith.constant 0 : index
    %c0_19 = arith.constant 0 : index
    %25 = vector.load %arg8[%c0_18, %c0_19] : memref<512x128xbf16, #tpu.memory_space<vmem>>, vector<512x128xbf16>
    %cst_20 = arith.constant dense<0.000000e+00> : vector<8x128xf32>
    %26 = tpu.matmul %24, %25, %cst_20 {dimension_numbers = #tpu.dot_dimension_numbers<[1], [0], [0], [1], [0, 0, 1, 1], [], []>} : vector<8x512xbf16>, vector<512x128xbf16>, vector<8x128xf32> -> vector<8x128xf32>
    %c0_21 = arith.constant 0 : index
    %c0_22 = arith.constant 0 : index
    %27 = vector.load %arg9[%c0_21, %c0_22] : memref<1x128xf32, #tpu.memory_space<vmem>>, vector<1x128xf32>
    %28 = vector.broadcast %27 : vector<1x128xf32> to vector<8x128xf32>
    %29 = arith.addf %26, %28 : vector<8x128xf32>
    %30 = math.tanh %29 : vector<8x128xf32>
    %cst_23 = arith.constant 5.600000e-01 : f32
    %31 = vector.broadcast %cst_23 : f32 to vector<8x128xf32>
    %32 = arith.mulf %30, %31 : vector<8x128xf32>
    %33 = arith.truncf %32 : vector<8x128xf32> to vector<8x128xbf16>
    %c0_24 = arith.constant 0 : index
    %c0_25 = arith.constant 0 : index
    %34 = vector.load %arg10[%c0_24, %c0_25] : memref<8x128xbf16, #tpu.memory_space<vmem>>, vector<8x128xbf16>
    tpu.vector_store %arg10[%c0_24, %c0_25], %33 {strides = array<i32>} : memref<8x128xbf16, #tpu.memory_space<vmem>>, vector<8x128xbf16>,
    return
  }
  func.func @transform_0(%arg0: i32) -> (i32, i32) {
    %c0_i32 = arith.constant 0 : i32
    %c0_i32_0 = arith.constant 0 : i32
    return %arg0, %c0_i32 : i32, i32
  }
  func.func @transform_1(%arg0: i32) -> (i32, i32) {
    %c0_i32 = arith.constant 0 : i32
    %c0_i32_0 = arith.constant 0 : i32
    %c0_i32_1 = arith.constant 0 : i32
    return %c0_i32, %c0_i32_0 : i32, i32
  }
  func.func @transform_2(%arg0: i32) -> (i32, i32) {
    %c0_i32 = arith.constant 0 : i32
    %c0_i32_0 = arith.constant 0 : i32
    %c0_i32_1 = arith.constant 0 : i32
    return %c0_i32, %c0_i32_0 : i32, i32
  }
  func.func @transform_3(%arg0: i32) -> (i32, i32) {
    %c0_i32 = arith.constant 0 : i32
    %c0_i32_0 = arith.constant 0 : i32
    %c0_i32_1 = arith.constant 0 : i32
    return %c0_i32, %c0_i32_0 : i32, i32
  }
  func.func @transform_4(%arg0: i32) -> (i32, i32) {
    %c0_i32 = arith.constant 0 : i32
    %c0_i32_0 = arith.constant 0 : i32
    %c0_i32_1 = arith.constant 0 : i32
    return %c0_i32, %c0_i32_0 : i32, i32
  }
  func.func @transform_5(%arg0: i32) -> (i32, i32) {
    %c0_i32 = arith.constant 0 : i32
    %c0_i32_0 = arith.constant 0 : i32
    %c0_i32_1 = arith.constant 0 : i32
    return %c0_i32, %c0_i32_0 : i32, i32
  }
  func.func @transform_6(%arg0: i32) -> (i32, i32) {
    %c0_i32 = arith.constant 0 : i32
    %c0_i32_0 = arith.constant 0 : i32
    %c0_i32_1 = arith.constant 0 : i32
    return %c0_i32, %c0_i32_0 : i32, i32
  }
  func.func @transform_7(%arg0: i32) -> (i32, i32) {
    %c0_i32 = arith.constant 0 : i32
    %c0_i32_0 = arith.constant 0 : i32
    %c0_i32_1 = arith.constant 0 : i32
    return %c0_i32, %c0_i32_0 : i32, i32
  }
  func.func @transform_8(%arg0: i32) -> (i32, i32) {
    %c0_i32 = arith.constant 0 : i32
    %c0_i32_0 = arith.constant 0 : i32
    %c0_i32_1 = arith.constant 0 : i32
    return %c0_i32, %c0_i32_0 : i32, i32
  }
  func.func @transform_9(%arg0: i32) -> (i32, i32) {
    %c0_i32 = arith.constant 0 : i32
    %c0_i32_0 = arith.constant 0 : i32
    return %arg0, %c0_i32 : i32, i32
  }
}

</mosaic_0001>

<bundles_post_ra>
// kernel: tpu_custom_call.1
= control target key start
LH: loop header
LB: loop body
LE: loop exit
PB: predicated region body
PF: predicated region fallthrough
CT: control target
= control target key end

     0   :  { %14 = vsyncpa [#allocation3], 0  ;;  %s5203_s0 = inlined_call_operand.hbm [shape: bf16[8,32], index: 0, kind: input, shape index: {}]   ;;  %s5204_s1 = inlined_call_operand.hbm [shape: bf16[32,1024], index: 1, kind: input, shape index: {}]   ;;  %s5205_s2 = inlined_call_operand.hbm [shape: f32[1,1024], index: 2, kind: input, shape index: {}]   ;;  %s5206_s3 = inlined_call_operand.hbm [shape: bf16[1024,512], index: 3, kind: input, shape index: {}]   ;;  %s5207_s4 = inlined_call_operand.vmem [shape: f32[1,512], index: 4, kind: input, shape index: {}]   ;;  %s5208_s5 = inlined_call_operand.hbm [shape: bf16[512,512], index: 5, kind: input, shape index: {}]   ;;  %s5209_s6 = inlined_call_operand.vmem [shape: f32[1,512], index: 6, kind: input, shape index: {}]   ;;  %s5210_s7 = inlined_call_operand.hbm [shape: bf16[512,128], index: 7, kind: input, shape index: {}]   ;;  %s5211_s8 = inlined_call_operand.vmem [shape: f32[1,128], index: 8, kind: input, shape index: {}]   ;;  %s5212_s9 = inlined_call_operand.hbm [shape: bf16[8,128], index: 9, kind: output, shape index: {}]  }
   0x1   :  { %15 = vsyncpa [#allocation6], 0 }
   0x2   :  { %16 = vsyncpa [#allocation9], 0 }
   0x3   :  { %17 = vsyncpa [#allocation12], 0 }
   0x4   :  { %18 = vsyncpa [#allocation4], 0  ;;  %s4965_s30 = smov [#allocation5]   ;;  %s4801_s13 = scalar_lea.hbm %s5204_s1, 2048 }
   0x5   :  { %s34_s10 = sshll.u32 %s4965_s30, 4  ;;  %p4802_p0 = scmp.ne.s32.totalorder %s5204_s1, %s4801_s13  ;;  %s35_s10 = int_to_ptr.vmem [resolvable:$true] %s34_s10 }
   0x6   :  { %p4805_p1 = scmp.lt.u32.totalorder %s4801_s13, %s5204_s1 }
   0x8   :  { %p4807_p2 = pnand %p4805_p1, %p4802_p0 }
   0xa   :  { %4810 = shalt.err (!%p4807_p2)
}
   0xb   :  { %s4811_s18 = scalar_lea.vmem %s35_s10, 2048  ;;  %p4816_p4 = scmp.lt.s32.totalorder %s35_s10, %s35_s10 }
   0xc   :  { %p4812_p3 = scmp.ne.s32.totalorder %s35_s10, %s4811_s18  ;;  %p4817_p5 = scmp.lt.s32.totalorder %s4811_s18, %s4811_s18 }
   0xe   :  { %p4818_p6 = por %p4817_p5, %p4816_p4 }
  0x10   :  { %p4819_p7 = pnand %p4818_p6, %p4812_p3 }
  0x12   :  { %4822 = shalt.err (!%p4819_p7)
}
  0x13   :  { %s4966_s19 = smov 512   ;;  %s4967_s20 = smov 32  }
  0x14   :  { %40 = dma.hbm_to_vmem [thread:$0]  %s5204_s1, 2048, %s35_s10, [#allocation6], %s4966_s19, %s4966_s19, %s4967_s20  }
  0x15   :  { %s4968_s23 = smov [#allocation8]   ;;  %s4823_s27 = scalar_lea.hbm %s5206_s3, 32768 }
  0x16   :  { %s56_s24 = sshll.u32 %s4968_s23, 4  ;;  %p4824_p8 = scmp.ne.s32.totalorder %s5206_s3, %s4823_s27  ;;  %s57_s24 = int_to_ptr.vmem [resolvable:$true] %s56_s24 }
  0x17   :  { %p4827_p9 = scmp.lt.u32.totalorder %s4823_s27, %s5206_s3 }
  0x19   :  { %p4829_p10 = pnand %p4827_p9, %p4824_p8 }
  0x1b   :  { %4832 = shalt.err (!%p4829_p10)
}
  0x1c   :  { %s4833_s12 = scalar_lea.vmem %s57_s24, 32768  ;;  %p4838_p12 = scmp.lt.s32.totalorder %s57_s24, %s57_s24 }
  0x1d   :  { %p4834_p11 = scmp.ne.s32.totalorder %s57_s24, %s4833_s12  ;;  %p4839_p13 = scmp.lt.s32.totalorder %s4833_s12, %s4833_s12 }
  0x1f   :  { %p4840_p0 = por %p4839_p13, %p4838_p12 }
  0x21   :  { %p4841_p1 = pnand %p4840_p0, %p4834_p11 }
  0x23   :  { %4844 = shalt.err (!%p4841_p1)
}
  0x24   :  { %s4969_s1 = smov 256   ;;  %s4970_s10 = smov 16  }
  0x25   :  { %62 = dma.hbm_to_vmem [thread:$0]  %s5206_s3, 32768, %s57_s24, [#allocation9], %s4969_s1, %s4969_s1, %s4970_s10  }
  0x26   :  { %s4971_s15 = smov [#allocation2]   ;;  %s4972_s17 = smov [#allocation7]  }
  0x27   :  { %s25_s16 = sshll.u32 %s4971_s15, 4  ;;  %s47_s18 = sshll.u32 %s4972_s17, 4  ;;  %s26_s16 = int_to_ptr.vmem [resolvable:$true] %s25_s16  ;;  %s48_s18 = int_to_ptr.vmem [resolvable:$true] %s47_s18 }
  0x28   :  { %s4845_s21 = scalar_lea.hbm %s5203_s0, 64 }
  0x29   :  { %p4846_p2 = scmp.ne.s32.totalorder %s5203_s0, %s4845_s21  ;;  %p4849_p3 = scmp.lt.u32.totalorder %s4845_s21, %s5203_s0 }
  0x2b   :  { %p4851_p4 = pnand %p4849_p3, %p4846_p2 }
  0x2d   :  { %4854 = shalt.err (!%p4851_p4)
}
  0x2e   :  { %s4855_s3 = scalar_lea.vmem %s26_s16, 64  ;;  %p4860_p6 = scmp.lt.s32.totalorder %s26_s16, %s26_s16 }
  0x2f   :  { %p4856_p5 = scmp.ne.s32.totalorder %s26_s16, %s4855_s3  ;;  %p4861_p7 = scmp.lt.s32.totalorder %s4855_s3, %s4855_s3 }
  0x31   :  { %p4862_p8 = por %p4861_p7, %p4860_p6 }
  0x33   :  { %p4863_p9 = pnand %p4862_p8, %p4856_p5 }
  0x35   :  { %4866 = shalt.err (!%p4863_p9)
}
  0x36   :  { %28 = dma.hbm_to_vmem [thread:$0]  %s5203_s0, 64, %s26_s16, [#allocation3]  }
  0x37   :  { %s4867_s30 = scalar_lea.hbm %s5205_s2, 128 }
  0x38   :  { %p4868_p10 = scmp.ne.s32.totalorder %s5205_s2, %s4867_s30  ;;  %p4871_p11 = scmp.lt.u32.totalorder %s4867_s30, %s5205_s2 }
  0x3a   :  { %p4873_p12 = pnand %p4871_p11, %p4868_p10 }
  0x3c   :  { %4876 = shalt.err (!%p4873_p12)
}
  0x3d   :  { %s4877_s15 = scalar_lea.vmem %s48_s18, 128  ;;  %p4882_p0 = scmp.lt.s32.totalorder %s48_s18, %s48_s18 }
  0x3e   :  { %p4878_p13 = scmp.ne.s32.totalorder %s48_s18, %s4877_s15  ;;  %p4883_p1 = scmp.lt.s32.totalorder %s4877_s15, %s4877_s15 }
  0x40   :  { %p4884_p2 = por %p4883_p1, %p4882_p0 }
  0x42   :  { %p4885_p3 = pnand %p4884_p2, %p4878_p13 }
  0x44   :  { %4888 = shalt.err (!%p4885_p3)
}
  0x45   :  { %50 = dma.hbm_to_vmem [thread:$0]  %s5205_s2, 128, %s48_s18, [#allocation6]  }
  0x46   :  { %s4973_s17 = smov [#allocation10]   ;;  %s4974_s20 = smov [#allocation11]  }
  0x47   :  { %s70_s19 = sshll.u32 %s4973_s17, 4  ;;  %s84_s21 = sshll.u32 %s4974_s20, 4  ;;  %s71_s19 = int_to_ptr.vmem [resolvable:$true] %s70_s19  ;;  %s5080_s21 = int_to_ptr.vmem [resolvable:$true] %s84_s21 }
  0x48   :  { %s4889_s25 = scalar_lea.hbm %s5208_s5, 16384 }
  0x49   :  { %p4890_p4 = scmp.ne.s32.totalorder %s5208_s5, %s4889_s25  ;;  %p4893_p5 = scmp.lt.u32.totalorder %s4889_s25, %s5208_s5 }
  0x4b   :  { %p4895_p6 = pnand %p4893_p5, %p4890_p4 }
  0x4d   :  { %4898 = shalt.err (!%p4895_p6)
}
  0x4e   :  { %s4899_s2 = scalar_lea.vmem %s71_s19, 16384  ;;  %p4904_p8 = scmp.lt.s32.totalorder %s71_s19, %s71_s19 }
  0x4f   :  { %p4900_p7 = scmp.ne.s32.totalorder %s71_s19, %s4899_s2  ;;  %p4905_p9 = scmp.lt.s32.totalorder %s4899_s2, %s4899_s2 }
  0x51   :  { %p4906_p10 = por %p4905_p9, %p4904_p8 }
  0x53   :  { %p4907_p11 = pnand %p4906_p10, %p4900_p7 }
  0x55   :  { %4910 = shalt.err (!%p4907_p11)
}
  0x56   :  { %76 = dma.hbm_to_vmem [thread:$0]  %s5208_s5, 16384, %s71_s19, [#allocation9], %s4969_s1, %s4969_s1, %s4970_s10  }
  0x57   :  { %s4911_s11 = scalar_lea.hbm %s5210_s7, 4096 }
  0x58   :  { %p4912_p12 = scmp.ne.s32.totalorder %s5210_s7, %s4911_s11  ;;  %p4915_p13 = scmp.lt.u32.totalorder %s4911_s11, %s5210_s7 }
  0x5a   :  { %p4917_p0 = pnand %p4915_p13, %p4912_p12 }
  0x5c   :  { %4920 = shalt.err (!%p4917_p0)
}
  0x5d   :  { %s4921_s0 = scalar_lea.vmem %s5080_s21, 4096  ;;  %p4926_p2 = scmp.lt.s32.totalorder %s5080_s21, %s5080_s21 }
  0x5e   :  { %p4922_p1 = scmp.ne.s32.totalorder %s5080_s21, %s4921_s0  ;;  %p4927_p3 = scmp.lt.s32.totalorder %s4921_s0, %s4921_s0 }
  0x60   :  { %p4928_p4 = por %p4927_p3, %p4926_p2 }
  0x62   :  { %p4929_p5 = pnand %p4928_p4, %p4922_p1 }
  0x64   :  { %4932 = shalt.err (!%p4929_p5)
}
  0x65   :  { %s4975_s5 = smov 64   ;;  %s4976_s1 = smov 4  }
  0x66   :  { %90 = dma.hbm_to_vmem [thread:$0]  %s5210_s7, 4096, %s5080_s21, [#allocation12], %s4975_s5, %s4975_s5, %s4976_s1  }
  0x67   :  { %4955 = dma.done.wait [#allocation3], 64  }
  0x68   :  { %4956 = vsyncadd [#allocation3], 4294967232 }
  0x69   :  { %4957 = dma.done.wait [#allocation6], 2176  }
  0x6a   :  { %4958 = vsyncadd [#allocation6], 4294965120 }
  0x6b   :  { %4959 = dma.done.wait [#allocation9], 49152  }
  0x6c   :  { %4960 = vsyncadd [#allocation9], 4294918144 }
  0x6d   :  { %4961 = dma.done.wait [#allocation12], 4096  }
  0x6e   :  { %4962 = vsyncadd [#allocation12], 4294963200  ;;  %v4977_v0 = vmov 0   ;;  %v113_v1 = vld [vmem:[#allocation5] sm:$0xff]  ;;  %v114_v7 = vld [vmem:[#allocation5 + $0x8] sm:$0xff]  ;;  %vm251_vm0 = vcmask 261120  }
  0x6f   :  { %287 = vmatprep.mubr.bf16.mxu0 %v4977_v0  ;;  %328 = vmatprep.mubr.bf16.mxu1 %v4977_v0  ;;  %v117_v2 = vld [vmem:[#allocation5 + $0x20] sm:$0xff]  ;;  %v118_v9 = vld [vmem:[#allocation5 + $0x28] sm:$0xff]  ;;  %v115_v15 = vld [vmem:[#allocation5 + $0x10] sm:$0xff]  ;;  %s4978_s21 = smov [#allocation13]  }
  0x70   :  { %v121_v3 = vld [vmem:[#allocation5 + $0x40] sm:$0xff]  ;;  %v3657_v4 = vcombine.high %v113_v1, %v117_v2  ;;  %v3656_v5 = vcombine.low %v113_v1, %v117_v2  ;;  %v122_v10 = vld [vmem:[#allocation5 + $0x48] sm:$0xff]  ;;  %v3659_v12 = vcombine.high %v114_v7, %v118_v9  ;;  %v3658_v13 = vcombine.low %v114_v7, %v118_v9  ;;  %v119_v16 = vld [vmem:[#allocation5 + $0x30] sm:$0xff]  ;;  %s3644_s22 = sshll.u32 %s4978_s21, 4  ;;  %s3645_s22 = int_to_ptr.vmem [resolvable:$true] %s3644_s22 }
  0x71   :  { %v125_v6 = vld [vmem:[#allocation5 + $0x60] sm:$0xff]  ;;  %v126_v11 = vld [vmem:[#allocation5 + $0x68] sm:$0xff]  ;;  %v116_v18 = vld [vmem:[#allocation5 + $0x18] sm:$0xff]  ;;  %v3661_v20 = vcombine.high %v115_v15, %v119_v16  ;;  %v3660_v27 = vcombine.low %v115_v15, %v119_v16  ;;  %s4933_s23 = scalar_lea.vmem %s3645_s22, 64  ;;  %p4938_p7 = scmp.lt.s32.totalorder %s3645_s22, %s3645_s22 }
  0x72   :  { %v3665_v8 = vcombine.high %v121_v3, %v125_v6  ;;  %255 = vmatprep.subr.bf16.mxu0 %v3657_v4  ;;  %v3667_v14 = vcombine.high %v122_v10, %v126_v11  ;;  %v3664_v17 = vcombine.low %v121_v3, %v125_v6  ;;  %v120_v19 = vld [vmem:[#allocation5 + $0x38] sm:$0xff]  ;;  %296 = vmatprep.subr.bf16.mxu1 %v3659_v12  ;;  %v123_v23 = vld [vmem:[#allocation5 + $0x50] sm:$0xff]  ;;  %p4934_p6 = scmp.ne.s32.totalorder %s3645_s22, %s4933_s23  ;;  %p4939_p8 = scmp.lt.s32.totalorder %s4933_s23, %s4933_s23 }
  0x73   :  { %256 = vmatpush1.bf16.msra.mxu0 %v3656_v5  ;;  %v112_v21 = vld [vmem:[#allocation2] sm:$0xf]  ;;  %297 = vmatpush1.bf16.msra.mxu1 %v3658_v13  ;;  %v3666_v22 = vcombine.low %v122_v10, %v126_v11  ;;  %v127_v24 = vld [vmem:[#allocation5 + $0x70] sm:$0xff]  ;;  %v3663_v25 = vcombine.high %v116_v18, %v120_v19  ;;  %v3662_v30 = vcombine.low %v116_v18, %v120_v19  ;;  %v4191_v36 = vld [vmem:[#allocation8] ss:$16 sps:$4 sm:$0xff]  }
  0x74   :  { %257 = vmatprep.subr.bf16.mxu0 %v3665_v8  ;;  %298 = vmatprep.subr.bf16.mxu1 %v3667_v14  ;;  %v124_v26 = vld [vmem:[#allocation5 + $0x58] sm:$0xff]  ;;  %v3669_v29 = vcombine.high %v123_v23, %v127_v24  ;;  %v3668_v32 = vcombine.low %v123_v23, %v127_v24  ;;  %v4196_v35 = vld [vmem:[#allocation8 + $0xc] ss:$16 sps:$4 sm:$0xff]   ;;  %v4194_v38 = vld [vmem:[#allocation8 + $0x8] ss:$16 sps:$4 sm:$0xff]   ;;  %p4940_p9 = por %p4939_p8, %p4938_p7 }
  0x75   :  { %v128_v28 = vld [vmem:[#allocation5 + $0x78] sm:$0xff]  ;;  %v4202_v39 = vld [vmem:[#allocation8 + $0x2c] ss:$16 sps:$4 sm:$0xff]   ;;  %v4200_v42 = vld [vmem:[#allocation8 + $0x28] ss:$16 sps:$4 sm:$0xff]  }
  0x76   :  { %v3671_v31 = vcombine.high %v124_v26, %v128_v28  ;;  %v4193_v33 = vld [vmem:[#allocation8 + $0x4] ss:$16 sps:$4 sm:$0xff]   ;;  %v3670_v34 = vcombine.low %v124_v26, %v128_v28  ;;  %v4197_v40 = vld [vmem:[#allocation8 + $0x20] ss:$16 sps:$4 sm:$0xff]   ;;  %v4208_v43 = vld [vmem:[#allocation8 + $0x4c] ss:$16 sps:$4 sm:$0xff]   ;;  %p4941_p10 = pnand %p4940_p9, %p4934_p6 }
  0x77   :  { %258 = vmatpush1.bf16.msra.mxu0 %v3664_v17  ;;  %299 = vmatpush1.bf16.msra.mxu1 %v3666_v22  ;;  %v4199_v37 = vld [vmem:[#allocation8 + $0x24] ss:$16 sps:$4 sm:$0xff]   ;;  %v4203_v44 = vld [vmem:[#allocation8 + $0x40] ss:$16 sps:$4 sm:$0xff]   ;;  %v4206_v46 = vld [vmem:[#allocation8 + $0x48] ss:$16 sps:$4 sm:$0xff]  }
  0x78   :  { %337 = vmatprep.subr.bf16.mxu0 %v3661_v20  ;;  %378 = vmatprep.subr.bf16.mxu1 %v3663_v25  ;;  %v4205_v41 = vld [vmem:[#allocation8 + $0x44] ss:$16 sps:$4 sm:$0xff]   ;;  %v4214_v47 = vld [vmem:[#allocation8 + $0x6c] ss:$16 sps:$4 sm:$0xff]   ;;  %v4209_v48 = vld [vmem:[#allocation8 + $0x60] ss:$16 sps:$4 sm:$0xff]  }
  0x79   :  { %v4211_v45 = vld [vmem:[#allocation8 + $0x64] ss:$16 sps:$4 sm:$0xff]   ;;  %v4212_v50 = vld [vmem:[#allocation8 + $0x68] ss:$16 sps:$4 sm:$0xff]   ;;  %v4220_v51 = vld [vmem:[#allocation8 + $0x8c] ss:$16 sps:$4 sm:$0xff]  }
  0x7a   :  { %3672 = vmatmul.mubr.msk.bf16.vlgmr.msra.gmra.mrb[0].mxu0 %vm251_vm0, %v112_v21  ;;  %3673 = vmatmul.mubr.msk.bf16.vlgmr.msra.gmra.mrb[0].mxu1 %vm251_vm0, %v112_v21  ;;  %v4217_v49 = vld [vmem:[#allocation8 + $0x84] ss:$16 sps:$4 sm:$0xff]   ;;  %v4215_v52 = vld [vmem:[#allocation8 + $0x80] ss:$16 sps:$4 sm:$0xff]   ;;  %v4218_v54 = vld [vmem:[#allocation8 + $0x88] ss:$16 sps:$4 sm:$0xff]  }
  0x7b   :  { %338 = vmatpush1.bf16.msra.mxu0 %v3660_v27  ;;  %369 = vmatprep.mubr.bf16.mxu0 %v4977_v0  ;;  %v4223_v53 = vld [vmem:[#allocation8 + $0xa4] ss:$16 sps:$4 sm:$0xff]   ;;  %v4226_v55 = vld [vmem:[#allocation8 + $0xac] ss:$16 sps:$4 sm:$0xff]   ;;  %v4221_v56 = vld [vmem:[#allocation8 + $0xa0] ss:$16 sps:$4 sm:$0xff]  }
  0x7c   :  { %339 = vmatprep.subr.bf16.mxu0 %v3669_v29  ;;  %379 = vmatpush1.bf16.msra.mxu1 %v3662_v30  ;;  %v4229_v57 = vld [vmem:[#allocation8 + $0xc4] ss:$16 sps:$4 sm:$0xff]   ;;  %v4224_v58 = vld [vmem:[#allocation8 + $0xa8] ss:$16 sps:$4 sm:$0xff]   ;;  %v4232_v59 = vld [vmem:[#allocation8 + $0xcc] ss:$16 sps:$4 sm:$0xff]  }
  0x7d   :  { %410 = vmatprep.mubr.bf16.mxu1 %v4977_v0  ;;  %380 = vmatprep.subr.bf16.mxu1 %v3671_v31  ;;  %v4227_v60 = vld [vmem:[#allocation8 + $0xc0] ss:$16 sps:$4 sm:$0xff]   ;;  %v4230_v61 = vld [vmem:[#allocation8 + $0xc8] ss:$16 sps:$4 sm:$0xff]   ;;  %v4235_v62 = vld [vmem:[#allocation8 + $0xe4] ss:$16 sps:$4 sm:$0xff]  }
  0x7e   :  { %v4233_v63 = vld [vmem:[#allocation8 + $0xe0] ss:$16 sps:$4 sm:$0xff]   ;;  %v4238_v0 = vld [vmem:[#allocation8 + $0xec] ss:$16 sps:$4 sm:$0xff]   ;;  %v4241_v1 = vld [vmem:[#allocation8 + $0x104] ss:$16 sps:$4 sm:$0xff]  }
  0x7f   :  { %340 = vmatpush1.bf16.msra.mxu0 %v3668_v32  ;;  %v4236_v2 = vld [vmem:[#allocation8 + $0xe8] ss:$16 sps:$4 sm:$0xff]   ;;  %v4244_v3 = vld [vmem:[#allocation8 + $0x10c] ss:$16 sps:$4 sm:$0xff]   ;;  %v4239_v4 = vld [vmem:[#allocation8 + $0x100] ss:$16 sps:$4 sm:$0xff]  }
  0x80   :  { %1993 = vmatprep.subr.bf16.mxu0 %v4193_v33  ;;  %381 = vmatpush1.bf16.msra.mxu1 %v3670_v34  ;;  %v4247_v5 = vld [vmem:[#allocation8 + $0x124] ss:$16 sps:$4 sm:$0xff]   ;;  %v4242_v6 = vld [vmem:[#allocation8 + $0x108] ss:$16 sps:$4 sm:$0xff]   ;;  %v4250_v7 = vld [vmem:[#allocation8 + $0x12c] ss:$16 sps:$4 sm:$0xff]  }
  0x81   :  { %2157 = vmatprep.subr.bf16.mxu1 %v4196_v35  ;;  %v4245_v8 = vld [vmem:[#allocation8 + $0x120] ss:$16 sps:$4 sm:$0xff]   ;;  %v4253_v9 = vld [vmem:[#allocation8 + $0x144] ss:$16 sps:$4 sm:$0xff]   ;;  %v4248_v10 = vld [vmem:[#allocation8 + $0x128] ss:$16 sps:$4 sm:$0xff]  }
  0x82   :  { %3674 = vmatmul.mubr.msk.bf16.vlgmr.msra.gmra.mrb[4].mxu0 %vm251_vm0, %v112_v21  ;;  %v4256_v11 = vld [vmem:[#allocation8 + $0x14c] ss:$16 sps:$4 sm:$0xff]   ;;  %v4251_v12 = vld [vmem:[#allocation8 + $0x140] ss:$16 sps:$4 sm:$0xff]   ;;  %v4259_v13 = vld [vmem:[#allocation8 + $0x164] ss:$16 sps:$4 sm:$0xff]  }
  0x83   :  { %1994 = vmatpush1.bf16.msra.mxu0 %v4191_v36  ;;  %3675 = vmatmul.mubr.msk.bf16.vlgmr.msra.gmra.mrb[4].mxu1 %vm251_vm0, %v112_v21  ;;  %v4254_v14 = vld [vmem:[#allocation8 + $0x148] ss:$16 sps:$4 sm:$0xff]   ;;  %v4262_v15 = vld [vmem:[#allocation8 + $0x16c] ss:$16 sps:$4 sm:$0xff]   ;;  %v4257_v16 = vld [vmem:[#allocation8 + $0x160] ss:$16 sps:$4 sm:$0xff]   ;;  %v131_v36 = vlaneseq }
  0x84   :  { %1995 = vmatprep.subr.bf16.mxu0 %v4199_v37  ;;  %2158 = vmatpush1.bf16.msra.mxu1 %v4194_v38  ;;  %v4265_v17 = vld [vmem:[#allocation8 + $0x184] ss:$16 sps:$4 sm:$0xff]   ;;  %v4260_v18 = vld [vmem:[#allocation8 + $0x168] ss:$16 sps:$4 sm:$0xff]   ;;  %v4268_v19 = vld [vmem:[#allocation8 + $0x18c] ss:$16 sps:$4 sm:$0xff]  }
  0x85   :  { %2159 = vmatprep.subr.bf16.mxu1 %v4202_v39  ;;  %v4263_v20 = vld [vmem:[#allocation8 + $0x180] ss:$16 sps:$4 sm:$0xff]   ;;  %v4271_v21 = vld [vmem:[#allocation8 + $0x1a4] ss:$16 sps:$4 sm:$0xff]   ;;  %v4266_v22 = vld [vmem:[#allocation8 + $0x188] ss:$16 sps:$4 sm:$0xff]  }
  0x86   :  { %v4274_v23 = vld [vmem:[#allocation8 + $0x1ac] ss:$16 sps:$4 sm:$0xff]   ;;  %v4269_v24 = vld [vmem:[#allocation8 + $0x1a0] ss:$16 sps:$4 sm:$0xff]   ;;  %v4272_v25 = vld [vmem:[#allocation8 + $0x1a8] ss:$16 sps:$4 sm:$0xff]  }
  0x87   :  { %1996 = vmatpush1.bf16.msra.mxu0 %v4197_v40  ;;  %v4277_v26 = vld [vmem:[#allocation8 + $0x1c4] ss:$16 sps:$4 sm:$0xff]   ;;  %v4280_v27 = vld [vmem:[#allocation8 + $0x1cc] ss:$16 sps:$4 sm:$0xff]   ;;  %v4275_v28 = vld [vmem:[#allocation8 + $0x1c0] ss:$16 sps:$4 sm:$0xff]  }
  0x88   :  { %1997 = vmatprep.subr.bf16.mxu0 %v4205_v41  ;;  %2160 = vmatpush1.bf16.msra.mxu1 %v4200_v42  ;;  %v4278_v29 = vld [vmem:[#allocation8 + $0x1c8] ss:$16 sps:$4 sm:$0xff]   ;;  %v4283_v30 = vld [vmem:[#allocation8 + $0x1e4] ss:$16 sps:$4 sm:$0xff]   ;;  %v4286_v31 = vld [vmem:[#allocation8 + $0x1ec] ss:$16 sps:$4 sm:$0xff]  }
  0x89   :  { %2161 = vmatprep.subr.bf16.mxu1 %v4208_v43  ;;  %v4281_v32 = vld [vmem:[#allocation8 + $0x1e0] ss:$16 sps:$4 sm:$0xff]   ;;  %v4284_v33 = vld [vmem:[#allocation8 + $0x1e8] ss:$16 sps:$4 sm:$0xff]   ;;  %v4289_v34 = vld [vmem:[#allocation8 + $0x204] ss:$16 sps:$4 sm:$0xff]  }
  0x8a   :  { %v4292_v35 = vld [vmem:[#allocation8 + $0x20c] ss:$16 sps:$4 sm:$0xff]   ;;  %v5118_v37 = vshrl.u32 %v131_v36, 7  ;;  %v4343_v36 = vld [vmem:[#allocation8 + $0x324] ss:$16 sps:$4 sm:$0xff]  }
  0x8b   :  { %1998 = vmatpush1.bf16.msra.mxu0 %v4203_v44  ;;  %v5123_v39 = vld [vmem:[#allocation7] sm:$0xff] }
  0x8c   :  { %1999 = vmatprep.subr.bf16.mxu0 %v4211_v45  ;;  %2162 = vmatpush1.bf16.msra.mxu1 %v4206_v46  ;;  %v5121_v38 = vsub.s32 0, %v5118_v37  ;;  %v5126_v40 = vsub.s32 1, %v5118_v37  ;;  %v5129_v41 = vsub.s32 3, %v5118_v37 }
  0x8d   :  { %2163 = vmatprep.subr.bf16.mxu1 %v4214_v47 }
  0x8e   :  { %v134_v42 = vrot.slane %v5123_v39, %v5121_v38  ;;  %v138_v43 = vrot.slane %v5123_v39, %v5126_v40  ;;  %v146_v45 = vrot.slane %v5123_v39, %v5129_v41 }
  0x8f   :  { %2000 = vmatpush1.bf16.msra.mxu0 %v4209_v48 }
  0x90   :  { %2001 = vmatprep.subr.bf16.mxu0 %v4217_v49  ;;  %2164 = vmatpush1.bf16.msra.mxu1 %v4212_v50 }
  0x91   :  { %2165 = vmatprep.subr.bf16.mxu1 %v4220_v51 }
  0x93   :  { %2002 = vmatpush1.bf16.msra.mxu0 %v4215_v52 }
  0x94   :  { %2003 = vmatprep.subr.bf16.mxu0 %v4223_v53  ;;  %2166 = vmatpush1.bf16.msra.mxu1 %v4218_v54 }
  0x95   :  { %2167 = vmatprep.subr.bf16.mxu1 %v4226_v55 }
  0x97   :  { %2004 = vmatpush1.bf16.msra.mxu0 %v4221_v56 }
  0x98   :  { %2005 = vmatprep.subr.bf16.mxu0 %v4229_v57  ;;  %2168 = vmatpush1.bf16.msra.mxu1 %v4224_v58 }
  0x99   :  { %2169 = vmatprep.subr.bf16.mxu1 %v4232_v59  ;;  %v4287_v59 = vld [vmem:[#allocation8 + $0x200] ss:$16 sps:$4 sm:$0xff]  }
  0x9b   :  { %2006 = vmatpush1.bf16.msra.mxu0 %v4227_v60  ;;  %v4290_v60 = vld [vmem:[#allocation8 + $0x208] ss:$16 sps:$4 sm:$0xff]  }
  0x9c   :  { %2007 = vmatprep.subr.bf16.mxu0 %v4235_v62  ;;  %2170 = vmatpush1.bf16.msra.mxu1 %v4230_v61 }
  0x9d   :  { %2171 = vmatprep.subr.bf16.mxu1 %v4238_v0  ;;  %v4298_v0 = vld [vmem:[#allocation8 + $0x22c] ss:$16 sps:$4 sm:$0xff]  }
  0x9f   :  { %2008 = vmatpush1.bf16.msra.mxu0 %v4233_v63  ;;  %v4295_v63 = vld [vmem:[#allocation8 + $0x224] ss:$16 sps:$4 sm:$0xff]  }
  0xa0   :  { %2009 = vmatprep.subr.bf16.mxu0 %v4241_v1  ;;  %2172 = vmatpush1.bf16.msra.mxu1 %v4236_v2 }
  0xa1   :  { %2173 = vmatprep.subr.bf16.mxu1 %v4244_v3 }
  0xa3   :  { %2010 = vmatpush1.bf16.msra.mxu0 %v4239_v4  ;;  %v4293_v4 = vld [vmem:[#allocation8 + $0x220] ss:$16 sps:$4 sm:$0xff]  }
  0xa4   :  { %2011 = vmatprep.subr.bf16.mxu0 %v4247_v5  ;;  %2174 = vmatpush1.bf16.msra.mxu1 %v4242_v6  ;;  %v4296_v5 = vld [vmem:[#allocation8 + $0x228] ss:$16 sps:$4 sm:$0xff]  }
  0xa5   :  { %2175 = vmatprep.subr.bf16.mxu1 %v4250_v7  ;;  %v4301_v7 = vld [vmem:[#allocation8 + $0x244] ss:$16 sps:$4 sm:$0xff]  }
  0xa7   :  { %2012 = vmatpush1.bf16.msra.mxu0 %v4245_v8  ;;  %v4304_v8 = vld [vmem:[#allocation8 + $0x24c] ss:$16 sps:$4 sm:$0xff]  }
  0xa8   :  { %2013 = vmatprep.subr.bf16.mxu0 %v4253_v9  ;;  %2176 = vmatpush1.bf16.msra.mxu1 %v4248_v10  ;;  %v4299_v10 = vld [vmem:[#allocation8 + $0x240] ss:$16 sps:$4 sm:$0xff]  }
  0xa9   :  { %2177 = vmatprep.subr.bf16.mxu1 %v4256_v11  ;;  %v4302_v11 = vld [vmem:[#allocation8 + $0x248] ss:$16 sps:$4 sm:$0xff]  }
  0xab   :  { %2014 = vmatpush1.bf16.msra.mxu0 %v4251_v12  ;;  %v4307_v12 = vld [vmem:[#allocation8 + $0x264] ss:$16 sps:$4 sm:$0xff]  }
  0xac   :  { %2015 = vmatprep.subr.bf16.mxu0 %v4259_v13  ;;  %2178 = vmatpush1.bf16.msra.mxu1 %v4254_v14  ;;  %v4310_v13 = vld [vmem:[#allocation8 + $0x26c] ss:$16 sps:$4 sm:$0xff]   ;;  %v4305_v14 = vld [vmem:[#allocation8 + $0x260] ss:$16 sps:$4 sm:$0xff]  }
  0xad   :  { %2179 = vmatprep.subr.bf16.mxu1 %v4262_v15  ;;  %v4308_v15 = vld [vmem:[#allocation8 + $0x268] ss:$16 sps:$4 sm:$0xff]  }
  0xaf   :  { %2016 = vmatpush1.bf16.msra.mxu0 %v4257_v16  ;;  %v4313_v16 = vld [vmem:[#allocation8 + $0x284] ss:$16 sps:$4 sm:$0xff]  }
  0xb0   :  { %2017 = vmatprep.subr.bf16.mxu0 %v4265_v17  ;;  %2180 = vmatpush1.bf16.msra.mxu1 %v4260_v18  ;;  %v4316_v17 = vld [vmem:[#allocation8 + $0x28c] ss:$16 sps:$4 sm:$0xff]   ;;  %v4311_v18 = vld [vmem:[#allocation8 + $0x280] ss:$16 sps:$4 sm:$0xff]  }
  0xb1   :  { %2181 = vmatprep.subr.bf16.mxu1 %v4268_v19  ;;  %v4314_v19 = vld [vmem:[#allocation8 + $0x288] ss:$16 sps:$4 sm:$0xff]  }
  0xb3   :  { %2018 = vmatpush1.bf16.msra.mxu0 %v4263_v20  ;;  %v4319_v20 = vld [vmem:[#allocation8 + $0x2a4] ss:$16 sps:$4 sm:$0xff]  }
  0xb4   :  { %2019 = vmatprep.subr.bf16.mxu0 %v4271_v21  ;;  %2182 = vmatpush1.bf16.msra.mxu1 %v4266_v22  ;;  %v4322_v21 = vld [vmem:[#allocation8 + $0x2ac] ss:$16 sps:$4 sm:$0xff]   ;;  %v4317_v22 = vld [vmem:[#allocation8 + $0x2a0] ss:$16 sps:$4 sm:$0xff]  }
  0xb5   :  { %2183 = vmatprep.subr.bf16.mxu1 %v4274_v23  ;;  %v4320_v23 = vld [vmem:[#allocation8 + $0x2a8] ss:$16 sps:$4 sm:$0xff]  }
  0xb7   :  { %2020 = vmatpush1.bf16.msra.mxu0 %v4269_v24  ;;  %v4325_v24 = vld [vmem:[#allocation8 + $0x2c4] ss:$16 sps:$4 sm:$0xff]  }
  0xb8   :  { %2184 = vmatpush1.bf16.msra.mxu1 %v4272_v25  ;;  %2021 = vmatprep.subr.bf16.mxu0 %v4277_v26  ;;  %v4328_v25 = vld [vmem:[#allocation8 + $0x2cc] ss:$16 sps:$4 sm:$0xff]   ;;  %v4323_v26 = vld [vmem:[#allocation8 + $0x2c0] ss:$16 sps:$4 sm:$0xff]  }
  0xb9   :  { %2185 = vmatprep.subr.bf16.mxu1 %v4280_v27  ;;  %v4326_v27 = vld [vmem:[#allocation8 + $0x2c8] ss:$16 sps:$4 sm:$0xff]  }
  0xbb   :  { %2022 = vmatpush1.bf16.msra.mxu0 %v4275_v28  ;;  %v4331_v28 = vld [vmem:[#allocation8 + $0x2e4] ss:$16 sps:$4 sm:$0xff]  }
  0xbc   :  { %2186 = vmatpush1.bf16.msra.mxu1 %v4278_v29  ;;  %2023 = vmatprep.subr.bf16.mxu0 %v4283_v30  ;;  %v4334_v29 = vld [vmem:[#allocation8 + $0x2ec] ss:$16 sps:$4 sm:$0xff]   ;;  %v4329_v30 = vld [vmem:[#allocation8 + $0x2e0] ss:$16 sps:$4 sm:$0xff]  }
  0xbd   :  { %2187 = vmatprep.subr.bf16.mxu1 %v4286_v31  ;;  %v4332_v31 = vld [vmem:[#allocation8 + $0x2e8] ss:$16 sps:$4 sm:$0xff]  }
  0xbf   :  { %2024 = vmatpush1.bf16.msra.mxu0 %v4281_v32  ;;  %v4337_v32 = vld [vmem:[#allocation8 + $0x304] ss:$16 sps:$4 sm:$0xff]  }
  0xc0   :  { %2188 = vmatpush1.bf16.msra.mxu1 %v4284_v33  ;;  %2034 = vmatprep.subr.bf16.mxu0 %v4289_v34  ;;  %v4340_v33 = vld [vmem:[#allocation8 + $0x30c] ss:$16 sps:$4 sm:$0xff]   ;;  %v4335_v34 = vld [vmem:[#allocation8 + $0x300] ss:$16 sps:$4 sm:$0xff]  }
  0xc1   :  { %2198 = vmatprep.subr.bf16.mxu1 %v4292_v35  ;;  %v4338_v35 = vld [vmem:[#allocation8 + $0x308] ss:$16 sps:$4 sm:$0xff]  }
 0x14d   :  { %v289_v44 = vpop.f32.mrb[0].mxu0  ;;  %v5137_v50 = vpop.f32.mrb[0].mxu1 }
 0x14e   :  { %v290_v46 = vadd.f32 %v289_v44, %v134_v42  ;;  %v291_v47 = vpop.f32.mrb[1].mxu0  ;;  %v332_v53 = vpop.f32.mrb[1].mxu1  ;;  %v4346_v42 = vld [vmem:[#allocation8 + $0x32c] ss:$16 sps:$4 sm:$0xff]   ;;  %v4344_v44 = vld [vmem:[#allocation8 + $0x328] ss:$16 sps:$4 sm:$0xff]  }
 0x14f   :  { %v292_v48 = vadd.f32 %v291_v47, %v138_v43  ;;  %v293_v49 = vpop.f32.mrb[2].mxu0  ;;  %v333_v55 = vadd.f32 %v332_v53, %v146_v45  ;;  %v334_v56 = vpop.f32.mrb[2].mxu1  ;;  %v4341_v43 = vld [vmem:[#allocation8 + $0x320] ss:$16 sps:$4 sm:$0xff]   ;;  %v4349_v45 = vld [vmem:[#allocation8 + $0x344] ss:$16 sps:$4 sm:$0xff]  }
 0x150   :  { %v419_v51 = vmax.f32 %v290_v46, 0.0  ;;  %v294_v52 = vpop.f32.mrb[3].mxu0  ;;  %v335_v57 = vpop.f32.mrb[3].mxu1  ;;  %v4352_v46 = vld [vmem:[#allocation8 + $0x34c] ss:$16 sps:$4 sm:$0xff]   ;;  %v5144_v56 = vsub.s32 2, %v5118_v37 }
 0x151   :  { %v420_v54 = vmax.f32 %v292_v48, 0.0  ;;  %v422_v61 = vmax.f32 %v333_v55, 0.0  ;;  %v4347_v47 = vld [vmem:[#allocation8 + $0x340] ss:$16 sps:$4 sm:$0xff]   ;;  %v4350_v48 = vld [vmem:[#allocation8 + $0x348] ss:$16 sps:$4 sm:$0xff]  }
 0x152   :  { %v427_v62 = vpack.c.bf16 %v419_v51, %v419_v51  ;;  %v4355_v49 = vld [vmem:[#allocation8 + $0x364] ss:$16 sps:$4 sm:$0xff]   ;;  %v4358_v51 = vld [vmem:[#allocation8 + $0x36c] ss:$16 sps:$4 sm:$0xff]   ;;  %v4353_v52 = vld [vmem:[#allocation8 + $0x360] ss:$16 sps:$4 sm:$0xff]  }
 0x153   :  { %v428_v58 = vpack.c.bf16 %v420_v54, %v420_v54  ;;  %v430_v1 = vpack.c.bf16 %v422_v61, %v422_v61  ;;  %v4356_v53 = vld [vmem:[#allocation8 + $0x368] ss:$16 sps:$4 sm:$0xff]   ;;  %v4361_v54 = vld [vmem:[#allocation8 + $0x384] ss:$16 sps:$4 sm:$0xff]   ;;  %v4364_v55 = vld [vmem:[#allocation8 + $0x38c] ss:$16 sps:$4 sm:$0xff]  }
 0x154   :  { %v4359_v57 = vld [vmem:[#allocation8 + $0x380] ss:$16 sps:$4 sm:$0xff]   ;;  %v153_v61 = vsub.s32 5, %v5118_v37 }
 0x155   :  { %2025 = vmatprep.mubr.bf16.mxu0 %v428_v58  ;;  %2189 = vmatprep.mubr.bf16.mxu1 %v428_v58  ;;  %v5139_v2 = vpop.f32.mrb[4].mxu0  ;;  %v4362_v58 = vld [vmem:[#allocation8 + $0x388] ss:$16 sps:$4 sm:$0xff]  }
 0x156   :  { %2026 = vmatmul.mubr.bf16.vlgmr.msra.gmra.mrb[8].mxu0 %v427_v62  ;;  %2190 = vmatmul.mubr.bf16.vlgmr.msra.gmra.mrb[8].mxu1 %v427_v62  ;;  %v5141_v3 = vpop.f32.mrb[5].mxu0  ;;  %v142_v62 = vrot.slane %v5123_v39, %v5144_v56 }
 0x157   :  { %2035 = vmatpush1.bf16.msra.mxu0 %v4287_v59  ;;  %2199 = vmatpush1.bf16.msra.mxu1 %v4290_v60  ;;  %v375_v6 = vpop.f32.mrb[6].mxu0  ;;  %v4367_v59 = vld [vmem:[#allocation8 + $0x3a4] ss:$16 sps:$4 sm:$0xff]   ;;  %v4370_v60 = vld [vmem:[#allocation8 + $0x3ac] ss:$16 sps:$4 sm:$0xff]  }
 0x158   :  { %2036 = vmatprep.subr.bf16.mxu0 %v4295_v63  ;;  %2200 = vmatprep.subr.bf16.mxu1 %v4298_v0  ;;  %v376_v9 = vpop.f32.mrb[7].mxu0  ;;  %v4365_v63 = vld [vmem:[#allocation8 + $0x3a0] ss:$16 sps:$4 sm:$0xff]   ;;  %v4368_v0 = vld [vmem:[#allocation8 + $0x3a8] ss:$16 sps:$4 sm:$0xff]  }
 0x159   :  { %2066 = vmatprep.mubr.bf16.mxu0 %v430_v1  ;;  %2230 = vmatprep.mubr.bf16.mxu1 %v430_v1  ;;  %v5149_v1 = vpop.f32.mrb[4].mxu1  ;;  %v331_v9 = vadd.f32 %v5137_v50, %v142_v62  ;;  %v4388_v50 = vld [vmem:[#allocation8 + $0x40c] ss:$16 sps:$4 sm:$0xff]   ;;  %v4434_v62 = vld [vmem:[#allocation8 + $0x508] ss:$16 sps:$4 sm:$0xff]  }
 0x15a   :  { %v5151_v6 = vpop.f32.mrb[5].mxu1 }
 0x15b   :  { %2037 = vmatpush1.bf16.msra.mxu0 %v4293_v4  ;;  %2201 = vmatpush1.bf16.msra.mxu1 %v4296_v5  ;;  %v4373_v4 = vld [vmem:[#allocation8 + $0x3c4] ss:$16 sps:$4 sm:$0xff]   ;;  %v4376_v5 = vld [vmem:[#allocation8 + $0x3cc] ss:$16 sps:$4 sm:$0xff]  }
 0x15c   :  { %2038 = vmatprep.subr.bf16.mxu0 %v4301_v7  ;;  %2202 = vmatprep.subr.bf16.mxu1 %v4304_v8  ;;  %v154_v7 = vrot.slane %v5123_v39, %v153_v61  ;;  %v416_v8 = vpop.f32.mrb[6].mxu1  ;;  %v4431_v61 = vld [vmem:[#allocation8 + $0x500] ss:$16 sps:$4 sm:$0xff]  }
 0x15d   :  { %v4448_v8 = vld [vmem:[#allocation8 + $0x54c] ss:$16 sps:$4 sm:$0xff]  }
 0x15f   :  { %2039 = vmatpush1.bf16.msra.mxu0 %v4299_v10  ;;  %2203 = vmatpush1.bf16.msra.mxu1 %v4302_v11  ;;  %v417_v10 = vpop.f32.mrb[7].mxu1  ;;  %v4371_v11 = vld [vmem:[#allocation8 + $0x3c0] ss:$16 sps:$4 sm:$0xff]  }
 0x160   :  { %2040 = vmatprep.subr.bf16.mxu0 %v4307_v12  ;;  %2204 = vmatprep.subr.bf16.mxu1 %v4310_v13  ;;  %v4374_v12 = vld [vmem:[#allocation8 + $0x3c8] ss:$16 sps:$4 sm:$0xff]   ;;  %v4379_v13 = vld [vmem:[#allocation8 + $0x3e4] ss:$16 sps:$4 sm:$0xff]  }
 0x161   :  { %v4446_v10 = vld [vmem:[#allocation8 + $0x548] ss:$16 sps:$4 sm:$0xff]  }
 0x163   :  { %2041 = vmatpush1.bf16.msra.mxu0 %v4305_v14  ;;  %2205 = vmatpush1.bf16.msra.mxu1 %v4308_v15  ;;  %v4382_v14 = vld [vmem:[#allocation8 + $0x3ec] ss:$16 sps:$4 sm:$0xff]   ;;  %v374_v15 = vadd.f32 %v5141_v3, %v154_v7  ;;  %v4445_v7 = vld [vmem:[#allocation8 + $0x544] ss:$16 sps:$4 sm:$0xff]  }
 0x164   :  { %2042 = vmatprep.subr.bf16.mxu0 %v4313_v16  ;;  %2206 = vmatprep.subr.bf16.mxu1 %v4316_v17  ;;  %v421_v16 = vmax.f32 %v331_v9, 0.0  ;;  %v4377_v17 = vld [vmem:[#allocation8 + $0x3e0] ss:$16 sps:$4 sm:$0xff]  }
 0x165   :  { %v4443_v9 = vld [vmem:[#allocation8 + $0x540] ss:$16 sps:$4 sm:$0xff]  }
 0x167   :  { %2043 = vmatpush1.bf16.msra.mxu0 %v4311_v18  ;;  %2207 = vmatpush1.bf16.msra.mxu1 %v4314_v19  ;;  %v4380_v18 = vld [vmem:[#allocation8 + $0x3e8] ss:$16 sps:$4 sm:$0xff]   ;;  %v4385_v19 = vld [vmem:[#allocation8 + $0x404] ss:$16 sps:$4 sm:$0xff]  }
 0x168   :  { %2044 = vmatprep.subr.bf16.mxu0 %v4319_v20  ;;  %2208 = vmatprep.subr.bf16.mxu1 %v4322_v21  ;;  %v424_v20 = vmax.f32 %v374_v15, 0.0  ;;  %v429_v21 = vpack.c.bf16 %v421_v16, %v421_v16  ;;  %v4457_v15 = vld [vmem:[#allocation8 + $0x584] ss:$16 sps:$4 sm:$0xff]   ;;  %v4460_v16 = vld [vmem:[#allocation8 + $0x58c] ss:$16 sps:$4 sm:$0xff]  }
 0x16a   :  { %v432_v3 = vpack.c.bf16 %v424_v20, %v424_v20  ;;  %v4466_v20 = vld [vmem:[#allocation8 + $0x5ac] ss:$16 sps:$4 sm:$0xff]  }
 0x16b   :  { %2045 = vmatpush1.bf16.msra.mxu0 %v4317_v22  ;;  %2209 = vmatpush1.bf16.msra.mxu1 %v4320_v23  ;;  %v4383_v22 = vld [vmem:[#allocation8 + $0x400] ss:$16 sps:$4 sm:$0xff]   ;;  %v4386_v23 = vld [vmem:[#allocation8 + $0x408] ss:$16 sps:$4 sm:$0xff]  }
 0x16c   :  { %2046 = vmatprep.subr.bf16.mxu0 %v4325_v24  ;;  %2210 = vmatprep.subr.bf16.mxu1 %v4328_v25  ;;  %v4391_v24 = vld [vmem:[#allocation8 + $0x424] ss:$16 sps:$4 sm:$0xff]   ;;  %v4394_v25 = vld [vmem:[#allocation8 + $0x42c] ss:$16 sps:$4 sm:$0xff]  }
 0x16f   :  { %2047 = vmatpush1.bf16.msra.mxu0 %v4323_v26  ;;  %2211 = vmatpush1.bf16.msra.mxu1 %v4326_v27  ;;  %v4389_v26 = vld [vmem:[#allocation8 + $0x420] ss:$16 sps:$4 sm:$0xff]   ;;  %v4392_v27 = vld [vmem:[#allocation8 + $0x428] ss:$16 sps:$4 sm:$0xff]  }
 0x170   :  { %2048 = vmatprep.subr.bf16.mxu0 %v4331_v28  ;;  %2212 = vmatprep.subr.bf16.mxu1 %v4334_v29  ;;  %v4397_v28 = vld [vmem:[#allocation8 + $0x444] ss:$16 sps:$4 sm:$0xff]   ;;  %v4400_v29 = vld [vmem:[#allocation8 + $0x44c] ss:$16 sps:$4 sm:$0xff]  }
 0x173   :  { %2049 = vmatpush1.bf16.msra.mxu0 %v4329_v30  ;;  %2213 = vmatpush1.bf16.msra.mxu1 %v4332_v31  ;;  %v4395_v30 = vld [vmem:[#allocation8 + $0x440] ss:$16 sps:$4 sm:$0xff]   ;;  %v4398_v31 = vld [vmem:[#allocation8 + $0x448] ss:$16 sps:$4 sm:$0xff]  }
 0x174   :  { %2050 = vmatprep.subr.bf16.mxu0 %v4337_v32  ;;  %2214 = vmatprep.subr.bf16.mxu1 %v4340_v33  ;;  %v4403_v32 = vld [vmem:[#allocation8 + $0x464] ss:$16 sps:$4 sm:$0xff]   ;;  %v4406_v33 = vld [vmem:[#allocation8 + $0x46c] ss:$16 sps:$4 sm:$0xff]  }
 0x177   :  { %2051 = vmatpush1.bf16.msra.mxu0 %v4335_v34  ;;  %2215 = vmatpush1.bf16.msra.mxu1 %v4338_v35  ;;  %v4401_v34 = vld [vmem:[#allocation8 + $0x460] ss:$16 sps:$4 sm:$0xff]   ;;  %v4404_v35 = vld [vmem:[#allocation8 + $0x468] ss:$16 sps:$4 sm:$0xff]  }
 0x178   :  { %2052 = vmatprep.subr.bf16.mxu0 %v4343_v36  ;;  %2216 = vmatprep.subr.bf16.mxu1 %v4346_v42  ;;  %v4409_v36 = vld [vmem:[#allocation8 + $0x484] ss:$16 sps:$4 sm:$0xff]   ;;  %v4412_v42 = vld [vmem:[#allocation8 + $0x48c] ss:$16 sps:$4 sm:$0xff]  }
 0x17b   :  { %2053 = vmatpush1.bf16.msra.mxu0 %v4341_v43  ;;  %2217 = vmatpush1.bf16.msra.mxu1 %v4344_v44  ;;  %v4407_v43 = vld [vmem:[#allocation8 + $0x480] ss:$16 sps:$4 sm:$0xff]   ;;  %v4410_v44 = vld [vmem:[#allocation8 + $0x488] ss:$16 sps:$4 sm:$0xff]  }
 0x17c   :  { %2054 = vmatprep.subr.bf16.mxu0 %v4349_v45  ;;  %2218 = vmatprep.subr.bf16.mxu1 %v4352_v46  ;;  %v4415_v45 = vld [vmem:[#allocation8 + $0x4a4] ss:$16 sps:$4 sm:$0xff]   ;;  %v4418_v46 = vld [vmem:[#allocation8 + $0x4ac] ss:$16 sps:$4 sm:$0xff]  }
 0x17f   :  { %2055 = vmatpush1.bf16.msra.mxu0 %v4347_v47  ;;  %2219 = vmatpush1.bf16.msra.mxu1 %v4350_v48  ;;  %v4413_v47 = vld [vmem:[#allocation8 + $0x4a0] ss:$16 sps:$4 sm:$0xff]   ;;  %v4416_v48 = vld [vmem:[#allocation8 + $0x4a8] ss:$16 sps:$4 sm:$0xff]  }
 0x180   :  { %2056 = vmatprep.subr.bf16.mxu0 %v4355_v49  ;;  %2220 = vmatprep.subr.bf16.mxu1 %v4358_v51  ;;  %v4421_v49 = vld [vmem:[#allocation8 + $0x4c4] ss:$16 sps:$4 sm:$0xff]   ;;  %v4424_v51 = vld [vmem:[#allocation8 + $0x4cc] ss:$16 sps:$4 sm:$0xff]  }
 0x183   :  { %2057 = vmatpush1.bf16.msra.mxu0 %v4353_v52  ;;  %2221 = vmatpush1.bf16.msra.mxu1 %v4356_v53  ;;  %v4419_v52 = vld [vmem:[#allocation8 + $0x4c0] ss:$16 sps:$4 sm:$0xff]   ;;  %v4422_v53 = vld [vmem:[#allocation8 + $0x4c8] ss:$16 sps:$4 sm:$0xff]  }
 0x184   :  { %2058 = vmatprep.subr.bf16.mxu0 %v4361_v54  ;;  %2222 = vmatprep.subr.bf16.mxu1 %v4364_v55  ;;  %v4427_v54 = vld [vmem:[#allocation8 + $0x4e4] ss:$16 sps:$4 sm:$0xff]   ;;  %v4430_v55 = vld [vmem:[#allocation8 + $0x4ec] ss:$16 sps:$4 sm:$0xff]  }
 0x187   :  { %2059 = vmatpush1.bf16.msra.mxu0 %v4359_v57  ;;  %2223 = vmatpush1.bf16.msra.mxu1 %v4362_v58  ;;  %v4425_v57 = vld [vmem:[#allocation8 + $0x4e0] ss:$16 sps:$4 sm:$0xff]   ;;  %v4428_v58 = vld [vmem:[#allocation8 + $0x4e8] ss:$16 sps:$4 sm:$0xff]  }
 0x188   :  { %2060 = vmatprep.subr.bf16.mxu0 %v4367_v59  ;;  %2224 = vmatprep.subr.bf16.mxu1 %v4370_v60  ;;  %v4433_v59 = vld [vmem:[#allocation8 + $0x504] ss:$16 sps:$4 sm:$0xff]   ;;  %v4436_v60 = vld [vmem:[#allocation8 + $0x50c] ss:$16 sps:$4 sm:$0xff]  }
 0x18b   :  { %2061 = vmatpush1.bf16.msra.mxu0 %v4365_v63  ;;  %2225 = vmatpush1.bf16.msra.mxu1 %v4368_v0  ;;  %v4439_v63 = vld [vmem:[#allocation8 + $0x524] ss:$16 sps:$4 sm:$0xff]   ;;  %v4442_v0 = vld [vmem:[#allocation8 + $0x52c] ss:$16 sps:$4 sm:$0xff]  }
 0x18c   :  { %2062 = vmatprep.subr.bf16.mxu0 %v4373_v4  ;;  %2226 = vmatprep.subr.bf16.mxu1 %v4376_v5  ;;  %v4437_v4 = vld [vmem:[#allocation8 + $0x520] ss:$16 sps:$4 sm:$0xff]   ;;  %v4440_v5 = vld [vmem:[#allocation8 + $0x528] ss:$16 sps:$4 sm:$0xff]  }
 0x18f   :  { %2063 = vmatpush1.bf16.msra.mxu0 %v4371_v11  ;;  %2227 = vmatpush1.bf16.msra.mxu1 %v4374_v12  ;;  %v4451_v11 = vld [vmem:[#allocation8 + $0x564] ss:$16 sps:$4 sm:$0xff]   ;;  %v4454_v12 = vld [vmem:[#allocation8 + $0x56c] ss:$16 sps:$4 sm:$0xff]  }
 0x190   :  { %2064 = vmatprep.subr.bf16.mxu0 %v4379_v13  ;;  %2228 = vmatprep.subr.bf16.mxu1 %v4382_v14  ;;  %v4449_v13 = vld [vmem:[#allocation8 + $0x560] ss:$16 sps:$4 sm:$0xff]   ;;  %v4452_v14 = vld [vmem:[#allocation8 + $0x568] ss:$16 sps:$4 sm:$0xff]  }
 0x193   :  { %2065 = vmatpush1.bf16.msra.mxu0 %v4377_v17  ;;  %2229 = vmatpush1.bf16.msra.mxu1 %v4380_v18  ;;  %v149_v17 = vsub.s32 4, %v5118_v37  ;;  %v4455_v18 = vld [vmem:[#allocation8 + $0x580] ss:$16 sps:$4 sm:$0xff]  }
 0x194   :  { %2075 = vmatprep.subr.bf16.mxu0 %v4385_v19  ;;  %2239 = vmatprep.subr.bf16.mxu1 %v4388_v50  ;;  %v4458_v19 = vld [vmem:[#allocation8 + $0x588] ss:$16 sps:$4 sm:$0xff]   ;;  %v4463_v50 = vld [vmem:[#allocation8 + $0x5a4] ss:$16 sps:$4 sm:$0xff]  }
 0x196   :  { %2067 = vmatmul.mubr.bf16.vlgmr.msra.gmra.mrb[8].mxu0 %v429_v21  ;;  %2231 = vmatmul.mubr.bf16.vlgmr.msra.gmra.mrb[8].mxu1 %v429_v21  ;;  %v161_v21 = vsub.s32 7, %v5118_v37 }
 0x197   :  { %2076 = vmatpush1.bf16.msra.mxu0 %v4383_v22  ;;  %2240 = vmatpush1.bf16.msra.mxu1 %v4386_v23  ;;  %v150_v22 = vrot.slane %v5123_v39, %v149_v17  ;;  %v4461_v23 = vld [vmem:[#allocation8 + $0x5a0] ss:$16 sps:$4 sm:$0xff]   ;;  %v4532_v17 = vld [vmem:[#allocation8 + $0x70c] ss:$16 sps:$4 sm:$0xff]  }
 0x198   :  { %2077 = vmatprep.subr.bf16.mxu0 %v4391_v24  ;;  %2241 = vmatprep.subr.bf16.mxu1 %v4394_v25  ;;  %v4464_v24 = vld [vmem:[#allocation8 + $0x5a8] ss:$16 sps:$4 sm:$0xff]   ;;  %v4469_v25 = vld [vmem:[#allocation8 + $0x5c4] ss:$16 sps:$4 sm:$0xff]  }
 0x199   :  { %2107 = vmatprep.mubr.bf16.mxu0 %v432_v3  ;;  %2271 = vmatprep.mubr.bf16.mxu1 %v432_v3  ;;  %v4472_v3 = vld [vmem:[#allocation8 + $0x5cc] ss:$16 sps:$4 sm:$0xff]  }
 0x19b   :  { %2078 = vmatpush1.bf16.msra.mxu0 %v4389_v26  ;;  %2242 = vmatpush1.bf16.msra.mxu1 %v4392_v27  ;;  %v162_v26 = vrot.slane %v5123_v39, %v161_v21  ;;  %v372_v27 = vadd.f32 %v5139_v2, %v150_v22  ;;  %v4533_v21 = vld [vmem:[#allocation8 + $0x720] ss:$16 sps:$4 sm:$0xff]   ;;  %v4536_v22 = vld [vmem:[#allocation8 + $0x728] ss:$16 sps:$4 sm:$0xff]  }
 0x19c   :  { %2079 = vmatprep.subr.bf16.mxu0 %v4397_v28  ;;  %2243 = vmatprep.subr.bf16.mxu1 %v4400_v29  ;;  %v4467_v28 = vld [vmem:[#allocation8 + $0x5c0] ss:$16 sps:$4 sm:$0xff]   ;;  %v4470_v29 = vld [vmem:[#allocation8 + $0x5c8] ss:$16 sps:$4 sm:$0xff]  }
 0x19f   :  { %2080 = vmatpush1.bf16.msra.mxu0 %v4395_v30  ;;  %2244 = vmatpush1.bf16.msra.mxu1 %v4398_v31  ;;  %v4475_v30 = vld [vmem:[#allocation8 + $0x5e4] ss:$16 sps:$4 sm:$0xff]   ;;  %v4478_v31 = vld [vmem:[#allocation8 + $0x5ec] ss:$16 sps:$4 sm:$0xff]  }
 0x1a0   :  { %2081 = vmatprep.subr.bf16.mxu0 %v4403_v32  ;;  %2245 = vmatprep.subr.bf16.mxu1 %v4406_v33  ;;  %v415_v32 = vadd.f32 %v5151_v6, %v162_v26  ;;  %v423_v33 = vmax.f32 %v372_v27, 0.0  ;;  %v4547_v26 = vld [vmem:[#allocation8 + $0x764] ss:$16 sps:$4 sm:$0xff]   ;;  %v4550_v27 = vld [vmem:[#allocation8 + $0x76c] ss:$16 sps:$4 sm:$0xff]  }
 0x1a2   :  { %v426_v2 = vmax.f32 %v415_v32, 0.0  ;;  %v4551_v32 = vld [vmem:[#allocation8 + $0x780] ss:$16 sps:$4 sm:$0xff]  }
 0x1a3   :  { %2082 = vmatpush1.bf16.msra.mxu0 %v4401_v34  ;;  %2246 = vmatpush1.bf16.msra.mxu1 %v4404_v35  ;;  %v4473_v34 = vld [vmem:[#allocation8 + $0x5e0] ss:$16 sps:$4 sm:$0xff]   ;;  %v4476_v35 = vld [vmem:[#allocation8 + $0x5e8] ss:$16 sps:$4 sm:$0xff]  }
 0x1a4   :  { %2083 = vmatprep.subr.bf16.mxu0 %v4409_v36  ;;  %2247 = vmatprep.subr.bf16.mxu1 %v4412_v42  ;;  %v4481_v36 = vld [vmem:[#allocation8 + $0x604] ss:$16 sps:$4 sm:$0xff]   ;;  %v4484_v42 = vld [vmem:[#allocation8 + $0x60c] ss:$16 sps:$4 sm:$0xff]   ;;  %v434_v6 = vpack.c.bf16 %v426_v2, %v426_v2  ;;  %v4560_v2 = vld [vmem:[#allocation8 + $0x7a8] ss:$16 sps:$4 sm:$0xff]  }
 0x1a7   :  { %2084 = vmatpush1.bf16.msra.mxu0 %v4407_v43  ;;  %2248 = vmatpush1.bf16.msra.mxu1 %v4410_v44  ;;  %v431_v43 = vpack.c.bf16 %v423_v33, %v423_v33  ;;  %v4479_v44 = vld [vmem:[#allocation8 + $0x600] ss:$16 sps:$4 sm:$0xff]   ;;  %v4554_v33 = vld [vmem:[#allocation8 + $0x788] ss:$16 sps:$4 sm:$0xff]  }
 0x1a8   :  { %2085 = vmatprep.subr.bf16.mxu0 %v4415_v45  ;;  %2249 = vmatprep.subr.bf16.mxu1 %v4418_v46  ;;  %v4482_v45 = vld [vmem:[#allocation8 + $0x608] ss:$16 sps:$4 sm:$0xff]   ;;  %v4487_v46 = vld [vmem:[#allocation8 + $0x624] ss:$16 sps:$4 sm:$0xff]  }
 0x1ab   :  { %2086 = vmatpush1.bf16.msra.mxu0 %v4413_v47  ;;  %2250 = vmatpush1.bf16.msra.mxu1 %v4416_v48  ;;  %v4490_v47 = vld [vmem:[#allocation8 + $0x62c] ss:$16 sps:$4 sm:$0xff]   ;;  %v4485_v48 = vld [vmem:[#allocation8 + $0x620] ss:$16 sps:$4 sm:$0xff]  }
 0x1ac   :  { %2087 = vmatprep.subr.bf16.mxu0 %v4421_v49  ;;  %2251 = vmatprep.subr.bf16.mxu1 %v4424_v51  ;;  %v4488_v49 = vld [vmem:[#allocation8 + $0x628] ss:$16 sps:$4 sm:$0xff]   ;;  %v4493_v51 = vld [vmem:[#allocation8 + $0x644] ss:$16 sps:$4 sm:$0xff]  }
 0x1af   :  { %2088 = vmatpush1.bf16.msra.mxu0 %v4419_v52  ;;  %2252 = vmatpush1.bf16.msra.mxu1 %v4422_v53  ;;  %v4496_v52 = vld [vmem:[#allocation8 + $0x64c] ss:$16 sps:$4 sm:$0xff]   ;;  %v4491_v53 = vld [vmem:[#allocation8 + $0x640] ss:$16 sps:$4 sm:$0xff]  }
 0x1b0   :  { %2089 = vmatprep.subr.bf16.mxu0 %v4427_v54  ;;  %2253 = vmatprep.subr.bf16.mxu1 %v4430_v55  ;;  %v4494_v54 = vld [vmem:[#allocation8 + $0x648] ss:$16 sps:$4 sm:$0xff]   ;;  %v4499_v55 = vld [vmem:[#allocation8 + $0x664] ss:$16 sps:$4 sm:$0xff]  }
 0x1b3   :  { %2090 = vmatpush1.bf16.msra.mxu0 %v4425_v57  ;;  %2254 = vmatpush1.bf16.msra.mxu1 %v4428_v58  ;;  %v4502_v57 = vld [vmem:[#allocation8 + $0x66c] ss:$16 sps:$4 sm:$0xff]   ;;  %v4497_v58 = vld [vmem:[#allocation8 + $0x660] ss:$16 sps:$4 sm:$0xff]  }
 0x1b4   :  { %2091 = vmatprep.subr.bf16.mxu0 %v4433_v59  ;;  %2255 = vmatprep.subr.bf16.mxu1 %v4436_v60  ;;  %v4500_v59 = vld [vmem:[#allocation8 + $0x668] ss:$16 sps:$4 sm:$0xff]   ;;  %v4505_v60 = vld [vmem:[#allocation8 + $0x684] ss:$16 sps:$4 sm:$0xff]  }
 0x1b7   :  { %2092 = vmatpush1.bf16.msra.mxu0 %v4431_v61  ;;  %2256 = vmatpush1.bf16.msra.mxu1 %v4434_v62  ;;  %v4508_v61 = vld [vmem:[#allocation8 + $0x68c] ss:$16 sps:$4 sm:$0xff]   ;;  %v4503_v62 = vld [vmem:[#allocation8 + $0x680] ss:$16 sps:$4 sm:$0xff]  }
 0x1b8   :  { %2093 = vmatprep.subr.bf16.mxu0 %v4439_v63  ;;  %2257 = vmatprep.subr.bf16.mxu1 %v4442_v0  ;;  %v4506_v63 = vld [vmem:[#allocation8 + $0x688] ss:$16 sps:$4 sm:$0xff]   ;;  %v4511_v0 = vld [vmem:[#allocation8 + $0x6a4] ss:$16 sps:$4 sm:$0xff]  }
 0x1bb   :  { %2094 = vmatpush1.bf16.msra.mxu0 %v4437_v4  ;;  %2258 = vmatpush1.bf16.msra.mxu1 %v4440_v5  ;;  %v4514_v4 = vld [vmem:[#allocation8 + $0x6ac] ss:$16 sps:$4 sm:$0xff]   ;;  %v4509_v5 = vld [vmem:[#allocation8 + $0x6a0] ss:$16 sps:$4 sm:$0xff]  }
 0x1bc   :  { %2095 = vmatprep.subr.bf16.mxu0 %v4445_v7  ;;  %2259 = vmatprep.subr.bf16.mxu1 %v4448_v8  ;;  %v4512_v7 = vld [vmem:[#allocation8 + $0x6a8] ss:$16 sps:$4 sm:$0xff]   ;;  %v4517_v8 = vld [vmem:[#allocation8 + $0x6c4] ss:$16 sps:$4 sm:$0xff]  }
 0x1bf   :  { %2096 = vmatpush1.bf16.msra.mxu0 %v4443_v9  ;;  %2260 = vmatpush1.bf16.msra.mxu1 %v4446_v10  ;;  %v4520_v9 = vld [vmem:[#allocation8 + $0x6cc] ss:$16 sps:$4 sm:$0xff]   ;;  %v4515_v10 = vld [vmem:[#allocation8 + $0x6c0] ss:$16 sps:$4 sm:$0xff]  }
 0x1c0   :  { %2097 = vmatprep.subr.bf16.mxu0 %v4451_v11  ;;  %2261 = vmatprep.subr.bf16.mxu1 %v4454_v12  ;;  %v4518_v11 = vld [vmem:[#allocation8 + $0x6c8] ss:$16 sps:$4 sm:$0xff]   ;;  %v4523_v12 = vld [vmem:[#allocation8 + $0x6e4] ss:$16 sps:$4 sm:$0xff]  }
 0x1c3   :  { %2098 = vmatpush1.bf16.msra.mxu0 %v4449_v13  ;;  %2262 = vmatpush1.bf16.msra.mxu1 %v4452_v14  ;;  %v4526_v13 = vld [vmem:[#allocation8 + $0x6ec] ss:$16 sps:$4 sm:$0xff]   ;;  %v4521_v14 = vld [vmem:[#allocation8 + $0x6e0] ss:$16 sps:$4 sm:$0xff]  }
 0x1c4   :  { %2099 = vmatprep.subr.bf16.mxu0 %v4457_v15  ;;  %2263 = vmatprep.subr.bf16.mxu1 %v4460_v16  ;;  %v4524_v15 = vld [vmem:[#allocation8 + $0x6e8] ss:$16 sps:$4 sm:$0xff]   ;;  %v4529_v16 = vld [vmem:[#allocation8 + $0x704] ss:$16 sps:$4 sm:$0xff]  }
 0x1c7   :  { %2100 = vmatpush1.bf16.msra.mxu0 %v4455_v18  ;;  %2264 = vmatpush1.bf16.msra.mxu1 %v4458_v19  ;;  %v4527_v18 = vld [vmem:[#allocation8 + $0x700] ss:$16 sps:$4 sm:$0xff]   ;;  %v4530_v19 = vld [vmem:[#allocation8 + $0x708] ss:$16 sps:$4 sm:$0xff]  }
 0x1c8   :  { %2101 = vmatprep.subr.bf16.mxu0 %v4463_v50  ;;  %2265 = vmatprep.subr.bf16.mxu1 %v4466_v20  ;;  %v4535_v50 = vld [vmem:[#allocation8 + $0x724] ss:$16 sps:$4 sm:$0xff]   ;;  %v4538_v20 = vld [vmem:[#allocation8 + $0x72c] ss:$16 sps:$4 sm:$0xff]  }
 0x1cb   :  { %2102 = vmatpush1.bf16.msra.mxu0 %v4461_v23  ;;  %2266 = vmatpush1.bf16.msra.mxu1 %v4464_v24  ;;  %v4541_v23 = vld [vmem:[#allocation8 + $0x744] ss:$16 sps:$4 sm:$0xff]   ;;  %v4544_v24 = vld [vmem:[#allocation8 + $0x74c] ss:$16 sps:$4 sm:$0xff]  }
 0x1cc   :  { %2103 = vmatprep.subr.bf16.mxu0 %v4469_v25  ;;  %2267 = vmatprep.subr.bf16.mxu1 %v4472_v3  ;;  %v4539_v25 = vld [vmem:[#allocation8 + $0x740] ss:$16 sps:$4 sm:$0xff]   ;;  %v4542_v3 = vld [vmem:[#allocation8 + $0x748] ss:$16 sps:$4 sm:$0xff]  }
 0x1cf   :  { %2104 = vmatpush1.bf16.msra.mxu0 %v4467_v28  ;;  %2268 = vmatpush1.bf16.msra.mxu1 %v4470_v29  ;;  %v4545_v28 = vld [vmem:[#allocation8 + $0x760] ss:$16 sps:$4 sm:$0xff]   ;;  %v4548_v29 = vld [vmem:[#allocation8 + $0x768] ss:$16 sps:$4 sm:$0xff]  }
 0x1d0   :  { %2105 = vmatprep.subr.bf16.mxu0 %v4475_v30  ;;  %2269 = vmatprep.subr.bf16.mxu1 %v4478_v31  ;;  %v4553_v30 = vld [vmem:[#allocation8 + $0x784] ss:$16 sps:$4 sm:$0xff]   ;;  %v4556_v31 = vld [vmem:[#allocation8 + $0x78c] ss:$16 sps:$4 sm:$0xff]  }
 0x1d3   :  { %2106 = vmatpush1.bf16.msra.mxu0 %v4473_v34  ;;  %2270 = vmatpush1.bf16.msra.mxu1 %v4476_v35  ;;  %v157_v34 = vsub.s32 6, %v5118_v37  ;;  %v4559_v35 = vld [vmem:[#allocation8 + $0x7a4] ss:$16 sps:$4 sm:$0xff]  }
 0x1d4   :  { %2116 = vmatprep.subr.bf16.mxu0 %v4481_v36  ;;  %2280 = vmatprep.subr.bf16.mxu1 %v4484_v42  ;;  %v4562_v36 = vld [vmem:[#allocation8 + $0x7ac] ss:$16 sps:$4 sm:$0xff]   ;;  %v4557_v42 = vld [vmem:[#allocation8 + $0x7a0] ss:$16 sps:$4 sm:$0xff]   ;;  %v4571_v37 = vld [vmem:[#allocation8 + $0x7e4] ss:$16 sps:$4 sm:$0xff]  }
 0x1d6   :  { %2108 = vmatmul.mubr.bf16.vlgmr.msra.gmra.mrb[8].mxu0 %v431_v43  ;;  %2272 = vmatmul.mubr.bf16.vlgmr.msra.gmra.mrb[8].mxu1 %v431_v43  ;;  %v158_v43 = vrot.slane %v5123_v39, %v157_v34  ;;  %v4577_v39 = vld [vmem:[#allocation10 + $0x4] ss:$16 sps:$4 sm:$0xff]   ;;  %v4638_v34 = vld [vmem:[#allocation10 + $0x148] ss:$16 sps:$4 sm:$0xff]  }
 0x1d7   :  { %2117 = vmatpush1.bf16.msra.mxu0 %v4479_v44  ;;  %2281 = vmatpush1.bf16.msra.mxu1 %v4482_v45  ;;  %v4565_v44 = vld [vmem:[#allocation8 + $0x7c4] ss:$16 sps:$4 sm:$0xff]   ;;  %v4568_v45 = vld [vmem:[#allocation8 + $0x7cc] ss:$16 sps:$4 sm:$0xff]  }
 0x1d8   :  { %2118 = vmatprep.subr.bf16.mxu0 %v4487_v46  ;;  %2282 = vmatprep.subr.bf16.mxu1 %v4490_v47  ;;  %v4563_v46 = vld [vmem:[#allocation8 + $0x7c0] ss:$16 sps:$4 sm:$0xff]   ;;  %v4566_v47 = vld [vmem:[#allocation8 + $0x7c8] ss:$16 sps:$4 sm:$0xff]  }
 0x1d9   :  { %2148 = vmatprep.mubr.bf16.mxu0 %v434_v6  ;;  %2312 = vmatprep.mubr.bf16.mxu1 %v434_v6  ;;  %v413_v6 = vadd.f32 %v5149_v1, %v158_v43  ;;  %v4583_v1 = vld [vmem:[#allocation10 + $0x24] ss:$16 sps:$4 sm:$0xff]  }
 0x1da   :  { %v4649_v43 = vld [vmem:[#allocation10 + $0x184] ss:$16 sps:$4 sm:$0xff]  }
 0x1db   :  { %2119 = vmatpush1.bf16.msra.mxu0 %v4485_v48  ;;  %2283 = vmatpush1.bf16.msra.mxu1 %v4488_v49  ;;  %v4574_v48 = vld [vmem:[#allocation8 + $0x7ec] ss:$16 sps:$4 sm:$0xff]   ;;  %v4569_v49 = vld [vmem:[#allocation8 + $0x7e0] ss:$16 sps:$4 sm:$0xff]  }
 0x1dc   :  { %2120 = vmatprep.subr.bf16.mxu0 %v4493_v51  ;;  %2284 = vmatprep.subr.bf16.mxu1 %v4496_v52  ;;  %v4572_v51 = vld [vmem:[#allocation8 + $0x7e8] ss:$16 sps:$4 sm:$0xff]   ;;  %v425_v52 = vmax.f32 %v413_v6, 0.0  ;;  %v4658_v6 = vld [vmem:[#allocation10 + $0x1ac] ss:$16 sps:$4 sm:$0xff]  }
 0x1df   :  { %2121 = vmatpush1.bf16.msra.mxu0 %v4491_v53  ;;  %2285 = vmatpush1.bf16.msra.mxu1 %v4494_v54  ;;  %v4580_v53 = vld [vmem:[#allocation10 + $0xc] ss:$16 sps:$4 sm:$0xff]   ;;  %v4575_v54 = vld [vmem:[#allocation10] ss:$16 sps:$4 sm:$0xff]  }
 0x1e0   :  { %2122 = vmatprep.subr.bf16.mxu0 %v4499_v55  ;;  %2286 = vmatprep.subr.bf16.mxu1 %v4502_v57  ;;  %v4578_v55 = vld [vmem:[#allocation10 + $0x8] ss:$16 sps:$4 sm:$0xff]   ;;  %v433_v57 = vpack.c.bf16 %v425_v52, %v425_v52  ;;  %v4659_v52 = vld [vmem:[#allocation10 + $0x1c0] ss:$16 sps:$4 sm:$0xff]  }
 0x1e3   :  { %2123 = vmatpush1.bf16.msra.mxu0 %v4497_v58  ;;  %2287 = vmatpush1.bf16.msra.mxu1 %v4500_v59  ;;  %v4586_v58 = vld [vmem:[#allocation10 + $0x2c] ss:$16 sps:$4 sm:$0xff]   ;;  %v4581_v59 = vld [vmem:[#allocation10 + $0x20] ss:$16 sps:$4 sm:$0xff]  }
 0x1e4   :  { %2124 = vmatprep.subr.bf16.mxu0 %v4505_v60  ;;  %2288 = vmatprep.subr.bf16.mxu1 %v4508_v61  ;;  %v4584_v60 = vld [vmem:[#allocation10 + $0x28] ss:$16 sps:$4 sm:$0xff]   ;;  %v4589_v61 = vld [vmem:[#allocation10 + $0x44] ss:$16 sps:$4 sm:$0xff]  }
 0x1e7   :  { %2125 = vmatpush1.bf16.msra.mxu0 %v4503_v62  ;;  %2289 = vmatpush1.bf16.msra.mxu1 %v4506_v63  ;;  %v4592_v62 = vld [vmem:[#allocation10 + $0x4c] ss:$16 sps:$4 sm:$0xff]   ;;  %v4587_v63 = vld [vmem:[#allocation10 + $0x40] ss:$16 sps:$4 sm:$0xff]  }
 0x1e8   :  { %2126 = vmatprep.subr.bf16.mxu0 %v4511_v0  ;;  %2290 = vmatprep.subr.bf16.mxu1 %v4514_v4  ;;  %v4590_v0 = vld [vmem:[#allocation10 + $0x48] ss:$16 sps:$4 sm:$0xff]   ;;  %v4595_v4 = vld [vmem:[#allocation10 + $0x64] ss:$16 sps:$4 sm:$0xff]  }
 0x1eb   :  { %2127 = vmatpush1.bf16.msra.mxu0 %v4509_v5  ;;  %2291 = vmatpush1.bf16.msra.mxu1 %v4512_v7  ;;  %v4598_v5 = vld [vmem:[#allocation10 + $0x6c] ss:$16 sps:$4 sm:$0xff]   ;;  %v4593_v7 = vld [vmem:[#allocation10 + $0x60] ss:$16 sps:$4 sm:$0xff]  }
 0x1ec   :  { %2128 = vmatprep.subr.bf16.mxu0 %v4517_v8  ;;  %2292 = vmatprep.subr.bf16.mxu1 %v4520_v9  ;;  %v4596_v8 = vld [vmem:[#allocation10 + $0x68] ss:$16 sps:$4 sm:$0xff]   ;;  %v4601_v9 = vld [vmem:[#allocation10 + $0x84] ss:$16 sps:$4 sm:$0xff]  }
 0x1ef   :  { %2129 = vmatpush1.bf16.msra.mxu0 %v4515_v10  ;;  %2293 = vmatpush1.bf16.msra.mxu1 %v4518_v11  ;;  %v4604_v10 = vld [vmem:[#allocation10 + $0x8c] ss:$16 sps:$4 sm:$0xff]   ;;  %v4599_v11 = vld [vmem:[#allocation10 + $0x80] ss:$16 sps:$4 sm:$0xff]  }
 0x1f0   :  { %2130 = vmatprep.subr.bf16.mxu0 %v4523_v12  ;;  %2294 = vmatprep.subr.bf16.mxu1 %v4526_v13  ;;  %v4602_v12 = vld [vmem:[#allocation10 + $0x88] ss:$16 sps:$4 sm:$0xff]   ;;  %v4607_v13 = vld [vmem:[#allocation10 + $0xa4] ss:$16 sps:$4 sm:$0xff]  }
 0x1f3   :  { %2131 = vmatpush1.bf16.msra.mxu0 %v4521_v14  ;;  %2295 = vmatpush1.bf16.msra.mxu1 %v4524_v15  ;;  %v4610_v14 = vld [vmem:[#allocation10 + $0xac] ss:$16 sps:$4 sm:$0xff]   ;;  %v4605_v15 = vld [vmem:[#allocation10 + $0xa0] ss:$16 sps:$4 sm:$0xff]  }
 0x1f4   :  { %2132 = vmatprep.subr.bf16.mxu0 %v4529_v16  ;;  %2296 = vmatprep.subr.bf16.mxu1 %v4532_v17  ;;  %v4608_v16 = vld [vmem:[#allocation10 + $0xa8] ss:$16 sps:$4 sm:$0xff]   ;;  %v4613_v17 = vld [vmem:[#allocation10 + $0xc4] ss:$16 sps:$4 sm:$0xff]  }
 0x1f7   :  { %2133 = vmatpush1.bf16.msra.mxu0 %v4527_v18  ;;  %2297 = vmatpush1.bf16.msra.mxu1 %v4530_v19  ;;  %v4616_v18 = vld [vmem:[#allocation10 + $0xcc] ss:$16 sps:$4 sm:$0xff]   ;;  %v4611_v19 = vld [vmem:[#allocation10 + $0xc0] ss:$16 sps:$4 sm:$0xff]  }
 0x1f8   :  { %2134 = vmatprep.subr.bf16.mxu0 %v4535_v50  ;;  %2298 = vmatprep.subr.bf16.mxu1 %v4538_v20  ;;  %v4614_v50 = vld [vmem:[#allocation10 + $0xc8] ss:$16 sps:$4 sm:$0xff]   ;;  %v4619_v20 = vld [vmem:[#allocation10 + $0xe4] ss:$16 sps:$4 sm:$0xff]  }
 0x1fb   :  { %2135 = vmatpush1.bf16.msra.mxu0 %v4533_v21  ;;  %2299 = vmatpush1.bf16.msra.mxu1 %v4536_v22  ;;  %v4622_v21 = vld [vmem:[#allocation10 + $0xec] ss:$16 sps:$4 sm:$0xff]   ;;  %v4617_v22 = vld [vmem:[#allocation10 + $0xe0] ss:$16 sps:$4 sm:$0xff]  }
 0x1fc   :  { %2136 = vmatprep.subr.bf16.mxu0 %v4541_v23  ;;  %2300 = vmatprep.subr.bf16.mxu1 %v4544_v24  ;;  %v4620_v23 = vld [vmem:[#allocation10 + $0xe8] ss:$16 sps:$4 sm:$0xff]   ;;  %v4625_v24 = vld [vmem:[#allocation10 + $0x104] ss:$16 sps:$4 sm:$0xff]  }
 0x1ff   :  { %2137 = vmatpush1.bf16.msra.mxu0 %v4539_v25  ;;  %2301 = vmatpush1.bf16.msra.mxu1 %v4542_v3  ;;  %v4628_v25 = vld [vmem:[#allocation10 + $0x10c] ss:$16 sps:$4 sm:$0xff]   ;;  %v4623_v3 = vld [vmem:[#allocation10 + $0x100] ss:$16 sps:$4 sm:$0xff]  }
 0x200   :  { %2138 = vmatprep.subr.bf16.mxu0 %v4547_v26  ;;  %2302 = vmatprep.subr.bf16.mxu1 %v4550_v27  ;;  %v4626_v26 = vld [vmem:[#allocation10 + $0x108] ss:$16 sps:$4 sm:$0xff]   ;;  %v4631_v27 = vld [vmem:[#allocation10 + $0x124] ss:$16 sps:$4 sm:$0xff]  }
 0x203   :  { %2139 = vmatpush1.bf16.msra.mxu0 %v4545_v28  ;;  %2303 = vmatpush1.bf16.msra.mxu1 %v4548_v29  ;;  %v4634_v28 = vld [vmem:[#allocation10 + $0x12c] ss:$16 sps:$4 sm:$0xff]   ;;  %v4629_v29 = vld [vmem:[#allocation10 + $0x120] ss:$16 sps:$4 sm:$0xff]  }
 0x204   :  { %2140 = vmatprep.subr.bf16.mxu0 %v4553_v30  ;;  %2304 = vmatprep.subr.bf16.mxu1 %v4556_v31  ;;  %v4632_v30 = vld [vmem:[#allocation10 + $0x128] ss:$16 sps:$4 sm:$0xff]   ;;  %v4637_v31 = vld [vmem:[#allocation10 + $0x144] ss:$16 sps:$4 sm:$0xff]  }
 0x207   :  { %2141 = vmatpush1.bf16.msra.mxu0 %v4551_v32  ;;  %2305 = vmatpush1.bf16.msra.mxu1 %v4554_v33  ;;  %v4640_v32 = vld [vmem:[#allocation10 + $0x14c] ss:$16 sps:$4 sm:$0xff]   ;;  %v4635_v33 = vld [vmem:[#allocation10 + $0x140] ss:$16 sps:$4 sm:$0xff]  }
 0x208   :  { %2142 = vmatprep.subr.bf16.mxu0 %v4559_v35  ;;  %2306 = vmatprep.subr.bf16.mxu1 %v4562_v36  ;;  %v4643_v35 = vld [vmem:[#allocation10 + $0x164] ss:$16 sps:$4 sm:$0xff]   ;;  %v4646_v36 = vld [vmem:[#allocation10 + $0x16c] ss:$16 sps:$4 sm:$0xff]  }
 0x20b   :  { %2143 = vmatpush1.bf16.msra.mxu0 %v4557_v42  ;;  %2307 = vmatpush1.bf16.msra.mxu1 %v4560_v2  ;;  %v4641_v42 = vld [vmem:[#allocation10 + $0x160] ss:$16 sps:$4 sm:$0xff]   ;;  %v4644_v2 = vld [vmem:[#allocation10 + $0x168] ss:$16 sps:$4 sm:$0xff]  }
 0x20c   :  { %2144 = vmatprep.subr.bf16.mxu0 %v4565_v44  ;;  %2308 = vmatprep.subr.bf16.mxu1 %v4568_v45  ;;  %v4652_v44 = vld [vmem:[#allocation10 + $0x18c] ss:$16 sps:$4 sm:$0xff]   ;;  %v4647_v45 = vld [vmem:[#allocation10 + $0x180] ss:$16 sps:$4 sm:$0xff]  }
 0x20f   :  { %2145 = vmatpush1.bf16.msra.mxu0 %v4563_v46  ;;  %2309 = vmatpush1.bf16.msra.mxu1 %v4566_v47  ;;  %v4650_v46 = vld [vmem:[#allocation10 + $0x188] ss:$16 sps:$4 sm:$0xff]   ;;  %v4655_v47 = vld [vmem:[#allocation10 + $0x1a4] ss:$16 sps:$4 sm:$0xff]  }
 0x210   :  { %2146 = vmatprep.subr.bf16.mxu0 %v4571_v37  ;;  %2310 = vmatprep.subr.bf16.mxu1 %v4574_v48  ;;  %v4653_v37 = vld [vmem:[#allocation10 + $0x1a0] ss:$16 sps:$4 sm:$0xff]   ;;  %v4656_v48 = vld [vmem:[#allocation10 + $0x1a8] ss:$16 sps:$4 sm:$0xff]  }
 0x213   :  { %2147 = vmatpush1.bf16.msra.mxu0 %v4569_v49  ;;  %2311 = vmatpush1.bf16.msra.mxu1 %v4572_v51  ;;  %v4661_v49 = vld [vmem:[#allocation10 + $0x1c4] ss:$16 sps:$4 sm:$0xff]   ;;  %v4664_v51 = vld [vmem:[#allocation10 + $0x1cc] ss:$16 sps:$4 sm:$0xff]  }
 0x214   :  { %3119 = vmatprep.subr.bf16.mxu0 %v4577_v39  ;;  %3201 = vmatprep.subr.bf16.mxu1 %v4580_v53  ;;  %v4662_v39 = vld [vmem:[#allocation10 + $0x1c8] ss:$16 sps:$4 sm:$0xff]   ;;  %v4667_v53 = vld [vmem:[#allocation10 + $0x1e4] ss:$16 sps:$4 sm:$0xff]  }
 0x216   :  { %2149 = vmatmul.mubr.bf16.vlgmr.msra.gmra.mrb[8].mxu0 %v433_v57  ;;  %2313 = vmatmul.mubr.bf16.vlgmr.msra.gmra.mrb[8].mxu1 %v433_v57  ;;  %v4668_v57 = vld [vmem:[#allocation10 + $0x1e8] ss:$16 sps:$4 sm:$0xff]  }
 0x217   :  { %3120 = vmatpush1.bf16.msra.mxu0 %v4575_v54  ;;  %3202 = vmatpush1.bf16.msra.mxu1 %v4578_v55  ;;  %v4670_v54 = vld [vmem:[#allocation10 + $0x1ec] ss:$16 sps:$4 sm:$0xff]   ;;  %v4665_v55 = vld [vmem:[#allocation10 + $0x1e0] ss:$16 sps:$4 sm:$0xff]  }
 0x218   :  { %3121 = vmatprep.subr.bf16.mxu0 %v4583_v1  ;;  %3203 = vmatprep.subr.bf16.mxu1 %v4586_v58  ;;  %v4673_v1 = vld [vmem:[#allocation10 + $0x204] ss:$16 sps:$4 sm:$0xff]   ;;  %v4676_v58 = vld [vmem:[#allocation10 + $0x20c] ss:$16 sps:$4 sm:$0xff]  }
 0x21b   :  { %3122 = vmatpush1.bf16.msra.mxu0 %v4581_v59  ;;  %3204 = vmatpush1.bf16.msra.mxu1 %v4584_v60  ;;  %v5168_v59 = vld [vmem:[%s5207_s4] sm:$0xf] }
 0x21c   :  { %3123 = vmatprep.subr.bf16.mxu0 %v4589_v61  ;;  %3205 = vmatprep.subr.bf16.mxu1 %v4592_v62  ;;  %v696_v60 = vrot.slane %v5168_v59, %v5121_v38  ;;  %v700_v61 = vrot.slane %v5168_v59, %v5126_v40  ;;  %v708_v62 = vrot.slane %v5168_v59, %v5129_v41 }
 0x21f   :  { %3124 = vmatpush1.bf16.msra.mxu0 %v4587_v63  ;;  %3206 = vmatpush1.bf16.msra.mxu1 %v4590_v0 }
 0x220   :  { %3125 = vmatprep.subr.bf16.mxu0 %v4595_v4  ;;  %3207 = vmatprep.subr.bf16.mxu1 %v4598_v5 }
 0x223   :  { %3126 = vmatpush1.bf16.msra.mxu0 %v4593_v7  ;;  %3208 = vmatpush1.bf16.msra.mxu1 %v4596_v8 }
 0x224   :  { %3127 = vmatprep.subr.bf16.mxu0 %v4601_v9  ;;  %3209 = vmatprep.subr.bf16.mxu1 %v4604_v10 }
 0x227   :  { %3128 = vmatpush1.bf16.msra.mxu0 %v4599_v11  ;;  %3210 = vmatpush1.bf16.msra.mxu1 %v4602_v12 }
 0x228   :  { %3129 = vmatprep.subr.bf16.mxu0 %v4607_v13  ;;  %3211 = vmatprep.subr.bf16.mxu1 %v4610_v14 }
 0x22b   :  { %3130 = vmatpush1.bf16.msra.mxu0 %v4605_v15  ;;  %3212 = vmatpush1.bf16.msra.mxu1 %v4608_v16 }
 0x22c   :  { %3131 = vmatprep.subr.bf16.mxu0 %v4613_v17  ;;  %3213 = vmatprep.subr.bf16.mxu1 %v4616_v18  ;;  %v4671_v18 = vld [vmem:[#allocation10 + $0x200] ss:$16 sps:$4 sm:$0xff]  }
 0x22f   :  { %3132 = vmatpush1.bf16.msra.mxu0 %v4611_v19  ;;  %3214 = vmatpush1.bf16.msra.mxu1 %v4614_v50  ;;  %v4674_v19 = vld [vmem:[#allocation10 + $0x208] ss:$16 sps:$4 sm:$0xff]  }
 0x230   :  { %3133 = vmatprep.subr.bf16.mxu0 %v4619_v20  ;;  %3215 = vmatprep.subr.bf16.mxu1 %v4622_v21  ;;  %v4679_v20 = vld [vmem:[#allocation10 + $0x224] ss:$16 sps:$4 sm:$0xff]   ;;  %v4682_v21 = vld [vmem:[#allocation10 + $0x22c] ss:$16 sps:$4 sm:$0xff]  }
 0x233   :  { %3134 = vmatpush1.bf16.msra.mxu0 %v4617_v22  ;;  %3216 = vmatpush1.bf16.msra.mxu1 %v4620_v23  ;;  %v4677_v23 = vld [vmem:[#allocation10 + $0x220] ss:$16 sps:$4 sm:$0xff]  }
 0x234   :  { %3135 = vmatprep.subr.bf16.mxu0 %v4625_v24  ;;  %3217 = vmatprep.subr.bf16.mxu1 %v4628_v25  ;;  %v4680_v24 = vld [vmem:[#allocation10 + $0x228] ss:$16 sps:$4 sm:$0xff]   ;;  %v4685_v25 = vld [vmem:[#allocation10 + $0x244] ss:$16 sps:$4 sm:$0xff]  }
 0x237   :  { %3136 = vmatpush1.bf16.msra.mxu0 %v4623_v3  ;;  %3218 = vmatpush1.bf16.msra.mxu1 %v4626_v26  ;;  %v4688_v3 = vld [vmem:[#allocation10 + $0x24c] ss:$16 sps:$4 sm:$0xff]   ;;  %v4683_v26 = vld [vmem:[#allocation10 + $0x240] ss:$16 sps:$4 sm:$0xff]  }
 0x238   :  { %3137 = vmatprep.subr.bf16.mxu0 %v4631_v27  ;;  %3219 = vmatprep.subr.bf16.mxu1 %v4634_v28  ;;  %v4686_v27 = vld [vmem:[#allocation10 + $0x248] ss:$16 sps:$4 sm:$0xff]   ;;  %v4691_v28 = vld [vmem:[#allocation10 + $0x264] ss:$16 sps:$4 sm:$0xff]  }
 0x23b   :  { %3138 = vmatpush1.bf16.msra.mxu0 %v4629_v29  ;;  %3220 = vmatpush1.bf16.msra.mxu1 %v4632_v30  ;;  %v4694_v29 = vld [vmem:[#allocation10 + $0x26c] ss:$16 sps:$4 sm:$0xff]   ;;  %v4689_v30 = vld [vmem:[#allocation10 + $0x260] ss:$16 sps:$4 sm:$0xff]  }
 0x23c   :  { %3139 = vmatprep.subr.bf16.mxu0 %v4637_v31  ;;  %3221 = vmatprep.subr.bf16.mxu1 %v4640_v32  ;;  %v4692_v31 = vld [vmem:[#allocation10 + $0x268] ss:$16 sps:$4 sm:$0xff]   ;;  %v4697_v32 = vld [vmem:[#allocation10 + $0x284] ss:$16 sps:$4 sm:$0xff]  }
 0x23f   :  { %3140 = vmatpush1.bf16.msra.mxu0 %v4635_v33  ;;  %3222 = vmatpush1.bf16.msra.mxu1 %v4638_v34  ;;  %v4700_v33 = vld [vmem:[#allocation10 + $0x28c] ss:$16 sps:$4 sm:$0xff]   ;;  %v4695_v34 = vld [vmem:[#allocation10 + $0x280] ss:$16 sps:$4 sm:$0xff]  }
 0x240   :  { %3141 = vmatprep.subr.bf16.mxu0 %v4643_v35  ;;  %3223 = vmatprep.subr.bf16.mxu1 %v4646_v36  ;;  %v4698_v35 = vld [vmem:[#allocation10 + $0x288] ss:$16 sps:$4 sm:$0xff]   ;;  %v4703_v36 = vld [vmem:[#allocation10 + $0x2a4] ss:$16 sps:$4 sm:$0xff]  }
 0x243   :  { %3142 = vmatpush1.bf16.msra.mxu0 %v4641_v42  ;;  %3224 = vmatpush1.bf16.msra.mxu1 %v4644_v2  ;;  %v4706_v42 = vld [vmem:[#allocation10 + $0x2ac] ss:$16 sps:$4 sm:$0xff]   ;;  %v4701_v2 = vld [vmem:[#allocation10 + $0x2a0] ss:$16 sps:$4 sm:$0xff]  }
 0x244   :  { %3143 = vmatprep.subr.bf16.mxu0 %v4649_v43  ;;  %3225 = vmatprep.subr.bf16.mxu1 %v4652_v44  ;;  %v4704_v43 = vld [vmem:[#allocation10 + $0x2a8] ss:$16 sps:$4 sm:$0xff]   ;;  %v4709_v44 = vld [vmem:[#allocation10 + $0x2c4] ss:$16 sps:$4 sm:$0xff]  }
 0x247   :  { %3144 = vmatpush1.bf16.msra.mxu0 %v4647_v45  ;;  %3226 = vmatpush1.bf16.msra.mxu1 %v4650_v46  ;;  %v4712_v45 = vld [vmem:[#allocation10 + $0x2cc] ss:$16 sps:$4 sm:$0xff]   ;;  %v4707_v46 = vld [vmem:[#allocation10 + $0x2c0] ss:$16 sps:$4 sm:$0xff]  }
 0x248   :  { %3145 = vmatprep.subr.bf16.mxu0 %v4655_v47  ;;  %3227 = vmatprep.subr.bf16.mxu1 %v4658_v6  ;;  %v4710_v47 = vld [vmem:[#allocation10 + $0x2c8] ss:$16 sps:$4 sm:$0xff]   ;;  %v4715_v6 = vld [vmem:[#allocation10 + $0x2e4] ss:$16 sps:$4 sm:$0xff]  }
 0x24b   :  { %3146 = vmatpush1.bf16.msra.mxu0 %v4653_v37  ;;  %3228 = vmatpush1.bf16.msra.mxu1 %v4656_v48  ;;  %v4718_v37 = vld [vmem:[#allocation10 + $0x2ec] ss:$16 sps:$4 sm:$0xff]   ;;  %v4713_v48 = vld [vmem:[#allocation10 + $0x2e0] ss:$16 sps:$4 sm:$0xff]  }
 0x24c   :  { %3147 = vmatprep.subr.bf16.mxu0 %v4661_v49  ;;  %3229 = vmatprep.subr.bf16.mxu1 %v4664_v51  ;;  %v4716_v49 = vld [vmem:[#allocation10 + $0x2e8] ss:$16 sps:$4 sm:$0xff]   ;;  %v4721_v51 = vld [vmem:[#allocation10 + $0x304] ss:$16 sps:$4 sm:$0xff]  }
 0x24f   :  { %3148 = vmatpush1.bf16.msra.mxu0 %v4659_v52  ;;  %3230 = vmatpush1.bf16.msra.mxu1 %v4662_v39  ;;  %v4724_v52 = vld [vmem:[#allocation10 + $0x30c] ss:$16 sps:$4 sm:$0xff]   ;;  %v4719_v39 = vld [vmem:[#allocation10 + $0x300] ss:$16 sps:$4 sm:$0xff]  }
 0x250   :  { %3149 = vmatprep.subr.bf16.mxu0 %v4667_v53  ;;  %3231 = vmatprep.subr.bf16.mxu1 %v4670_v54  ;;  %v4722_v53 = vld [vmem:[#allocation10 + $0x308] ss:$16 sps:$4 sm:$0xff]   ;;  %v4727_v54 = vld [vmem:[#allocation10 + $0x324] ss:$16 sps:$4 sm:$0xff]  }
 0x253   :  { %3150 = vmatpush1.bf16.msra.mxu0 %v4665_v55  ;;  %3232 = vmatpush1.bf16.msra.mxu1 %v4668_v57  ;;  %v4730_v55 = vld [vmem:[#allocation10 + $0x32c] ss:$16 sps:$4 sm:$0xff]   ;;  %v4725_v57 = vld [vmem:[#allocation10 + $0x320] ss:$16 sps:$4 sm:$0xff]  }
 0x254   :  { %3160 = vmatprep.subr.bf16.mxu0 %v4673_v1  ;;  %3242 = vmatprep.subr.bf16.mxu1 %v4676_v58  ;;  %v4728_v1 = vld [vmem:[#allocation10 + $0x328] ss:$16 sps:$4 sm:$0xff]   ;;  %v4733_v58 = vld [vmem:[#allocation10 + $0x344] ss:$16 sps:$4 sm:$0xff]  }
 0x2e9   :  { %v2150_v63 = vpop.f32.mrb[8].mxu0  ;;  %v5176_v0 = vpop.f32.mrb[8].mxu1 }
 0x2ea   :  { %v4137_v4 = vadd.f32 %v2150_v63, %v696_v60  ;;  %v2152_v5 = vpop.f32.mrb[9].mxu0  ;;  %v2316_v7 = vpop.f32.mrb[9].mxu1  ;;  %v4736_v60 = vld [vmem:[#allocation10 + $0x34c] ss:$16 sps:$4 sm:$0xff]   ;;  %v4739_v63 = vld [vmem:[#allocation10 + $0x364] ss:$16 sps:$4 sm:$0xff]  }
 0x2eb   :  { %v4138_v8 = vadd.f32 %v2152_v5, %v700_v61  ;;  %v4140_v9 = vadd.f32 %v2316_v7, %v708_v62  ;;  %v2154_v10 = vpop.f32.mrb[10].mxu0  ;;  %v2318_v11 = vpop.f32.mrb[10].mxu1  ;;  %v4731_v61 = vld [vmem:[#allocation10 + $0x340] ss:$16 sps:$4 sm:$0xff]   ;;  %v4734_v62 = vld [vmem:[#allocation10 + $0x348] ss:$16 sps:$4 sm:$0xff]  }
 0x2ec   :  { %v2321_v12 = vmax.f32 %v4137_v4, 0.0  ;;  %v2155_v13 = vpop.f32.mrb[11].mxu0  ;;  %v2319_v14 = vpop.f32.mrb[11].mxu1  ;;  %v4742_v4 = vld [vmem:[#allocation10 + $0x36c] ss:$16 sps:$4 sm:$0xff]  }
 0x2ed   :  { %v2322_v15 = vmax.f32 %v4138_v8, 0.0  ;;  %v2324_v16 = vmax.f32 %v4140_v9, 0.0  ;;  %v4737_v5 = vld [vmem:[#allocation10 + $0x360] ss:$16 sps:$4 sm:$0xff]   ;;  %v4740_v7 = vld [vmem:[#allocation10 + $0x368] ss:$16 sps:$4 sm:$0xff]  }
 0x2ee   :  { %v2325_v50 = vpack.c.bf16 %v2321_v12, %v2321_v12  ;;  %v4745_v8 = vld [vmem:[#allocation10 + $0x384] ss:$16 sps:$4 sm:$0xff]   ;;  %v4748_v9 = vld [vmem:[#allocation10 + $0x38c] ss:$16 sps:$4 sm:$0xff]   ;;  %v4743_v10 = vld [vmem:[#allocation10 + $0x380] ss:$16 sps:$4 sm:$0xff]  }
 0x2ef   :  { %v2326_v17 = vpack.c.bf16 %v2322_v15, %v2322_v15  ;;  %v2328_v22 = vpack.c.bf16 %v2324_v16, %v2324_v16  ;;  %v4746_v11 = vld [vmem:[#allocation10 + $0x388] ss:$16 sps:$4 sm:$0xff]   ;;  %v4751_v12 = vld [vmem:[#allocation10 + $0x3a4] ss:$16 sps:$4 sm:$0xff]   ;;  %v4754_v13 = vld [vmem:[#allocation10 + $0x3ac] ss:$16 sps:$4 sm:$0xff]   ;;  %v704_v16 = vrot.slane %v5168_v59, %v5144_v56 }
 0x2f0   :  { %v4749_v14 = vld [vmem:[#allocation10 + $0x3a0] ss:$16 sps:$4 sm:$0xff]   ;;  %v4752_v15 = vld [vmem:[#allocation10 + $0x3a8] ss:$16 sps:$4 sm:$0xff]  }
 0x2f1   :  { %3151 = vmatprep.mubr.bf16.mxu0 %v2326_v17  ;;  %3233 = vmatprep.mubr.bf16.mxu1 %v2326_v17  ;;  %v4757_v17 = vld [vmem:[#allocation10 + $0x3c4] ss:$16 sps:$4 sm:$0xff]  }
 0x2f2   :  { %3152 = vmatmul.mubr.bf16.vlgmr.msra.gmra.mrb[12].mxu0 %v2325_v50  ;;  %3234 = vmatmul.mubr.bf16.vlgmr.msra.gmra.mrb[12].mxu1 %v2325_v50  ;;  %v4758_v50 = vld [vmem:[#allocation10 + $0x3c8] ss:$16 sps:$4 sm:$0xff]   ;;  %v4767_v59 = vld [vmem:[#allocation11 + $0x40] sm:$0xff]  }
 0x2f3   :  { %3161 = vmatpush1.bf16.msra.mxu0 %v4671_v18  ;;  %3243 = vmatpush1.bf16.msra.mxu1 %v4674_v19  ;;  %v4760_v18 = vld [vmem:[#allocation10 + $0x3cc] ss:$16 sps:$4 sm:$0xff]   ;;  %v4755_v19 = vld [vmem:[#allocation10 + $0x3c0] ss:$16 sps:$4 sm:$0xff]  }
 0x2f4   :  { %3192 = vmatprep.mubr.bf16.mxu0 %v2328_v22  ;;  %3274 = vmatprep.mubr.bf16.mxu1 %v2328_v22  ;;  %v4766_v22 = vld [vmem:[#allocation10 + $0x3ec] ss:$16 sps:$4 sm:$0xff]  }
 0x2f5   :  { %3162 = vmatprep.subr.bf16.mxu0 %v4679_v20  ;;  %3244 = vmatprep.subr.bf16.mxu1 %v4682_v21  ;;  %v4139_v20 = vadd.f32 %v5176_v0, %v704_v16  ;;  %v4763_v21 = vld [vmem:[#allocation10 + $0x3e4] ss:$16 sps:$4 sm:$0xff]   ;;  %v4771_v0 = vld [vmem:[#allocation11 + $0x48] sm:$0xff]  }
 0x2f7   :  { %3163 = vmatpush1.bf16.msra.mxu0 %v4677_v23  ;;  %3245 = vmatpush1.bf16.msra.mxu1 %v4680_v24  ;;  %v4761_v23 = vld [vmem:[#allocation10 + $0x3e0] ss:$16 sps:$4 sm:$0xff]   ;;  %v4764_v24 = vld [vmem:[#allocation10 + $0x3e8] ss:$16 sps:$4 sm:$0xff]  }
 0x2f8   :  { %3164 = vmatprep.subr.bf16.mxu0 %v4685_v25  ;;  %3246 = vmatprep.subr.bf16.mxu1 %v4688_v3  ;;  %v2323_v25 = vmax.f32 %v4139_v20, 0.0  ;;  %v4768_v3 = vld [vmem:[#allocation11 + $0xc0] sm:$0xff]  }
 0x2fb   :  { %3165 = vmatpush1.bf16.msra.mxu0 %v4683_v26  ;;  %3247 = vmatpush1.bf16.msra.mxu1 %v4686_v27  ;;  %v4769_v26 = vld [vmem:[#allocation11] sm:$0xff]  }
 0x2fc   :  { %3166 = vmatprep.subr.bf16.mxu0 %v4691_v28  ;;  %3248 = vmatprep.subr.bf16.mxu1 %v4694_v29  ;;  %v4770_v27 = vld [vmem:[#allocation11 + $0x80] sm:$0xff]   ;;  %v2327_v28 = vpack.c.bf16 %v2323_v25, %v2323_v25  ;;  %v4772_v29 = vld [vmem:[#allocation11 + $0xc8] sm:$0xff]  }
 0x2ff   :  { %3167 = vmatpush1.bf16.msra.mxu0 %v4689_v30  ;;  %3249 = vmatpush1.bf16.msra.mxu1 %v4692_v31  ;;  %v4773_v30 = vld [vmem:[#allocation11 + $0x8] sm:$0xff]  }
 0x300   :  { %3168 = vmatprep.subr.bf16.mxu0 %v4697_v32  ;;  %3250 = vmatprep.subr.bf16.mxu1 %v4700_v33  ;;  %v4774_v31 = vld [vmem:[#allocation11 + $0x88] sm:$0xff]   ;;  %v4775_v32 = vld [vmem:[#allocation11 + $0x50] sm:$0xff]  }
 0x301   :  { %v4776_v33 = vld [vmem:[#allocation11 + $0xd0] sm:$0xff]  }
 0x303   :  { %3169 = vmatpush1.bf16.msra.mxu0 %v4695_v34  ;;  %3251 = vmatpush1.bf16.msra.mxu1 %v4698_v35  ;;  %v4777_v34 = vld [vmem:[#allocation11 + $0x10] sm:$0xff]  }
 0x304   :  { %3170 = vmatprep.subr.bf16.mxu0 %v4703_v36  ;;  %3252 = vmatprep.subr.bf16.mxu1 %v4706_v42  ;;  %v4778_v35 = vld [vmem:[#allocation11 + $0x90] sm:$0xff]   ;;  %v4779_v36 = vld [vmem:[#allocation11 + $0x58] sm:$0xff]  }
 0x305   :  { %v4780_v42 = vld [vmem:[#allocation11 + $0xd8] sm:$0xff]  }
 0x307   :  { %3171 = vmatpush1.bf16.msra.mxu0 %v4701_v2  ;;  %3253 = vmatpush1.bf16.msra.mxu1 %v4704_v43  ;;  %v4781_v2 = vld [vmem:[#allocation11 + $0x18] sm:$0xff]  }
 0x308   :  { %3172 = vmatprep.subr.bf16.mxu0 %v4709_v44  ;;  %3254 = vmatprep.subr.bf16.mxu1 %v4712_v45  ;;  %v4782_v43 = vld [vmem:[#allocation11 + $0x98] sm:$0xff]   ;;  %v4783_v44 = vld [vmem:[#allocation11 + $0x60] sm:$0xff]  }
 0x309   :  { %v4784_v45 = vld [vmem:[#allocation11 + $0xe0] sm:$0xff]  }
 0x30b   :  { %3173 = vmatpush1.bf16.msra.mxu0 %v4707_v46  ;;  %3255 = vmatpush1.bf16.msra.mxu1 %v4710_v47  ;;  %v4785_v46 = vld [vmem:[#allocation11 + $0x20] sm:$0xff]  }
 0x30c   :  { %3174 = vmatprep.subr.bf16.mxu0 %v4715_v6  ;;  %3256 = vmatprep.subr.bf16.mxu1 %v4718_v37  ;;  %v4786_v47 = vld [vmem:[#allocation11 + $0xa0] sm:$0xff]   ;;  %v4787_v6 = vld [vmem:[#allocation11 + $0x68] sm:$0xff]  }
 0x30d   :  { %v4788_v37 = vld [vmem:[#allocation11 + $0xe8] sm:$0xff]  }
 0x30f   :  { %3175 = vmatpush1.bf16.msra.mxu0 %v4713_v48  ;;  %3257 = vmatpush1.bf16.msra.mxu1 %v4716_v49  ;;  %v4789_v48 = vld [vmem:[#allocation11 + $0x28] sm:$0xff]  }
 0x310   :  { %3176 = vmatprep.subr.bf16.mxu0 %v4721_v51  ;;  %3258 = vmatprep.subr.bf16.mxu1 %v4724_v52  ;;  %v4790_v49 = vld [vmem:[#allocation11 + $0xa8] sm:$0xff]   ;;  %v4791_v51 = vld [vmem:[#allocation11 + $0x70] sm:$0xff]  }
 0x311   :  { %v4792_v52 = vld [vmem:[#allocation11 + $0xf0] sm:$0xff]  }
 0x313   :  { %3177 = vmatpush1.bf16.msra.mxu0 %v4719_v39  ;;  %3259 = vmatpush1.bf16.msra.mxu1 %v4722_v53  ;;  %v4793_v39 = vld [vmem:[#allocation11 + $0x30] sm:$0xff]  }
 0x314   :  { %3178 = vmatprep.subr.bf16.mxu0 %v4727_v54  ;;  %3260 = vmatprep.subr.bf16.mxu1 %v4730_v55  ;;  %v4794_v53 = vld [vmem:[#allocation11 + $0xb0] sm:$0xff]   ;;  %v4795_v54 = vld [vmem:[#allocation11 + $0x78] sm:$0xff]  }
 0x315   :  { %v4796_v55 = vld [vmem:[#allocation11 + $0xf8] sm:$0xff]  }
 0x317   :  { %3179 = vmatpush1.bf16.msra.mxu0 %v4725_v57  ;;  %3261 = vmatpush1.bf16.msra.mxu1 %v4728_v1  ;;  %v4797_v57 = vld [vmem:[#allocation11 + $0x38] sm:$0xff]  }
 0x318   :  { %3180 = vmatprep.subr.bf16.mxu0 %v4733_v58  ;;  %3262 = vmatprep.subr.bf16.mxu1 %v4736_v60  ;;  %v4798_v1 = vld [vmem:[#allocation11 + $0xb8] sm:$0xff]   ;;  %v2457_v58 = vld [vmem:[%s5209_s6] sm:$0xf] }
 0x319   :  { %v2462_v60 = vrot.slane %v2457_v58, %v5121_v38 }
 0x31b   :  { %3181 = vmatpush1.bf16.msra.mxu0 %v4731_v61  ;;  %3263 = vmatpush1.bf16.msra.mxu1 %v4734_v62  ;;  %v2470_v61 = vrot.slane %v2457_v58, %v5144_v56  ;;  %v2466_v62 = vrot.slane %v2457_v58, %v5126_v40 }
 0x31c   :  { %3182 = vmatprep.subr.bf16.mxu0 %v4739_v63  ;;  %3264 = vmatprep.subr.bf16.mxu1 %v4742_v4  ;;  %v2474_v63 = vrot.slane %v2457_v58, %v5129_v41 }
 0x31f   :  { %3183 = vmatpush1.bf16.msra.mxu0 %v4737_v5  ;;  %3265 = vmatpush1.bf16.msra.mxu1 %v4740_v7 }
 0x320   :  { %3184 = vmatprep.subr.bf16.mxu0 %v4745_v8  ;;  %3266 = vmatprep.subr.bf16.mxu1 %v4748_v9 }
 0x323   :  { %3185 = vmatpush1.bf16.msra.mxu0 %v4743_v10  ;;  %3267 = vmatpush1.bf16.msra.mxu1 %v4746_v11 }
 0x324   :  { %3186 = vmatprep.subr.bf16.mxu0 %v4751_v12  ;;  %3268 = vmatprep.subr.bf16.mxu1 %v4754_v13 }
 0x327   :  { %3187 = vmatpush1.bf16.msra.mxu0 %v4749_v14  ;;  %3269 = vmatpush1.bf16.msra.mxu1 %v4752_v15 }
 0x328   :  { %3188 = vmatprep.subr.bf16.mxu0 %v4757_v17  ;;  %3270 = vmatprep.subr.bf16.mxu1 %v4760_v18 }
 0x32b   :  { %3189 = vmatpush1.bf16.msra.mxu0 %v4755_v19  ;;  %3271 = vmatpush1.bf16.msra.mxu1 %v4758_v50 }
 0x32c   :  { %3190 = vmatprep.subr.bf16.mxu0 %v4763_v21  ;;  %3272 = vmatprep.subr.bf16.mxu1 %v4766_v22  ;;  %v4060_v22 = vld [vmem:[%s5211_s8] ss:$0 sm:$0xff] }
 0x32f   :  { %3191 = vmatpush1.bf16.msra.mxu0 %v4761_v23  ;;  %3273 = vmatpush1.bf16.msra.mxu1 %v4764_v24 }
 0x330   :  { %4093 = vmatprep.subr.bf16.mxu0 %v4767_v59  ;;  %4115 = vmatprep.subr.bf16.mxu1 %v4768_v3 }
 0x332   :  { %3193 = vmatmul.mubr.bf16.vlgmr.msra.gmra.mrb[12].mxu0 %v2327_v28  ;;  %3275 = vmatmul.mubr.bf16.vlgmr.msra.gmra.mrb[12].mxu1 %v2327_v28 }
 0x333   :  { %4094 = vmatpush3.bf16.msra.mxu0 %v4769_v26  ;;  %4116 = vmatpush3.bf16.msra.mxu1 %v4770_v27 }
 0x334   :  { %4095 = vmatprep.subr.bf16.mxu0 %v4771_v0  ;;  %4117 = vmatprep.subr.bf16.mxu1 %v4772_v29 }
 0x337   :  { %4096 = vmatpush3.bf16.msra.mxu0 %v4773_v30  ;;  %4118 = vmatpush3.bf16.msra.mxu1 %v4774_v31 }
 0x338   :  { %4097 = vmatprep.subr.bf16.mxu0 %v4775_v32  ;;  %4119 = vmatprep.subr.bf16.mxu1 %v4776_v33 }
 0x33b   :  { %4098 = vmatpush3.bf16.msra.mxu0 %v4777_v34  ;;  %4120 = vmatpush3.bf16.msra.mxu1 %v4778_v35 }
 0x33c   :  { %4099 = vmatprep.subr.bf16.mxu0 %v4779_v36  ;;  %4121 = vmatprep.subr.bf16.mxu1 %v4780_v42 }
 0x33f   :  { %4100 = vmatpush3.bf16.msra.mxu0 %v4781_v2  ;;  %4122 = vmatpush3.bf16.msra.mxu1 %v4782_v43 }
 0x340   :  { %4101 = vmatprep.subr.bf16.mxu0 %v4783_v44  ;;  %4123 = vmatprep.subr.bf16.mxu1 %v4784_v45 }
 0x343   :  { %4102 = vmatpush3.bf16.msra.mxu0 %v4785_v46  ;;  %4124 = vmatpush3.bf16.msra.mxu1 %v4786_v47 }
 0x344   :  { %4103 = vmatprep.subr.bf16.mxu0 %v4787_v6  ;;  %4125 = vmatprep.subr.bf16.mxu1 %v4788_v37 }
 0x347   :  { %4104 = vmatpush3.bf16.msra.mxu0 %v4789_v48  ;;  %4126 = vmatpush3.bf16.msra.mxu1 %v4790_v49 }
 0x348   :  { %4105 = vmatprep.subr.bf16.mxu0 %v4791_v51  ;;  %4127 = vmatprep.subr.bf16.mxu1 %v4792_v52 }
 0x34b   :  { %4106 = vmatpush3.bf16.msra.mxu0 %v4793_v39  ;;  %4128 = vmatpush3.bf16.msra.mxu1 %v4794_v53 }
 0x34c   :  { %4107 = vmatprep.subr.bf16.mxu0 %v4795_v54  ;;  %4129 = vmatprep.subr.bf16.mxu1 %v4796_v55 }
 0x34f   :  { %4108 = vmatpush3.bf16.msra.mxu0 %v4797_v57  ;;  %4130 = vmatpush3.bf16.msra.mxu1 %v4798_v1 }
 0x405   :  { %v3194_v4 = vpop.f32.mrb[12].mxu0  ;;  %v3276_v5 = vpop.f32.mrb[12].mxu1 }
 0x406   :  { %v4141_v7 = vadd.f32 %v3194_v4, %v2462_v60  ;;  %v4143_v8 = vadd.f32 %v3276_v5, %v2470_v61  ;;  %v3196_v9 = vpop.f32.mrb[13].mxu0  ;;  %v3278_v10 = vpop.f32.mrb[13].mxu1 }
 0x407   :  { %v4142_v11 = vadd.f32 %v3196_v9, %v2466_v62  ;;  %v4144_v12 = vadd.f32 %v3278_v10, %v2474_v63  ;;  %v3198_v13 = vpop.f32.mrb[14].mxu0  ;;  %v3280_v14 = vpop.f32.mrb[14].mxu1 }
 0x408   :  { %v3283_v15 = vmax.f32 %v4141_v7, 0.0  ;;  %v3285_v16 = vmax.f32 %v4143_v8, 0.0  ;;  %v3199_v17 = vpop.f32.mrb[15].mxu0  ;;  %v3281_v38 = vpop.f32.mrb[15].mxu1 }
 0x409   :  { %v3284_v18 = vmax.f32 %v4142_v11, 0.0  ;;  %v3286_v56 = vmax.f32 %v4144_v12, 0.0 }
 0x40a   :  { %v3287_v50 = vpack.c.bf16 %v3283_v15, %v3283_v15  ;;  %v3289_v41 = vpack.c.bf16 %v3285_v16, %v3285_v16 }
 0x40b   :  { %v3288_v19 = vpack.c.bf16 %v3284_v18, %v3284_v18  ;;  %v3290_v40 = vpack.c.bf16 %v3286_v56, %v3286_v56 }
 0x40d   :  { %3586 = vmatprep.mubr.bf16.mxu0 %v3288_v19  ;;  %3626 = vmatprep.mubr.bf16.mxu1 %v3290_v40 }
 0x40e   :  { %3587 = vmatmul.mubr.bf16.vlgmr.msra.gmra.mrb[16].mxu0 %v3287_v50  ;;  %3627 = vmatmul.mubr.bf16.vlgmr.msra.gmra.mrb[16].mxu1 %v3289_v41 }
 0x4e1   :  { %v4109_v20 = vpop.f32.mrb[16].mxu0  ;;  %v4131_v21 = vpop.f32.mrb[16].mxu1 }
 0x4e2   :  { %v4110_v23 = vpop.f32.mrb[17].mxu0  ;;  %v4132_v24 = vpop.f32.mrb[17].mxu1 }
 0x4e3   :  { %v4111_v25 = vadd.f32 %v4110_v23, %v4109_v20  ;;  %v4133_v59 = vadd.f32 %v4132_v24, %v4131_v21  ;;  %v4112_v3 = vpop.f32.mrb[18].mxu0  ;;  %v4134_v26 = vpop.f32.mrb[18].mxu1 }
 0x4e4   :  { %v4113_v27 = vpop.f32.mrb[19].mxu0  ;;  %v4135_v28 = vpop.f32.mrb[19].mxu1 }
 0x4e5   :  { %v3589_v0 = vadd.f32 %v4111_v25, %v4060_v22 }
 0x4e7   :  { %v3629_v29 = vadd.f32 %v4133_v59, %v3589_v0 }
 0x4e9   :  { %4799 = vtanh.f32 %v3629_v29 }
 0x4f3   :  { %v4800_v30 = vpop.eup %4799 }
 0x4f4   :  { %v3635_v31 = vmul.f32 0.56, %v4800_v30 }
 0x4f6   :  { %v3636_v32 = vpack.c.bf16 %v3635_v31, %v3635_v31 }
 0x4f8   :  { %3637 = vst [vmem:[#allocation13] sm:$0xf] %v3636_v32 }
 0x4f9   :  { %4944 = shalt.err (!%p4941_p10)
}
 0x4fa   :  { %s4945_s26 = scalar_lea.hbm %s5212_s9, 64 }
 0x4fb   :  { %p4946_p11 = scmp.ne.s32.totalorder %s5212_s9, %s4945_s26  ;;  %p4949_p12 = scmp.lt.u32.totalorder %s4945_s26, %s5212_s9 }
 0x4fd   :  { %p4951_p13 = pnand %p4949_p12, %p4946_p11 }
 0x4ff   :  { %4954 = shalt.err (!%p4951_p13)
}
 0x500   :  { %3647 = dma.vmem_to_hbm [thread:$0]  %s3645_s22, 64, %s5212_s9, [#allocation4]  }
 0x501   :  { %4963 = dma.done.wait [#allocation4], 64  }
 0x502   :  { %4964 = vsyncadd [#allocation4], 4294967232 }
 0x503   :  { %3651 = vsyncpa [#allocation3], 1 }
 0x504   :  { %3652 = vsyncpa [#allocation6], 1 }
 0x505   :  { %3653 = vsyncpa [#allocation9], 1 }
 0x506   :  { %3654 = vsyncpa [#allocation12], 1 }
 0x507   :  { %3655 = vsyncpa [#allocation4], 1 }

// kernel: tpu_custom_call.1
= control target key start
LH: loop header
LB: loop body
LE: loop exit
PB: predicated region body
PF: predicated region fallthrough
CT: control target
= control target key end

     0   :  { %14 = vsyncpa [#allocation3], 0  ;;  %s5203_s0 = inlined_call_operand.hbm [shape: bf16[8,32], index: 0, kind: input, shape index: {}]   ;;  %s5204_s1 = inlined_call_operand.hbm [shape: bf16[32,1024], index: 1, kind: input, shape index: {}]   ;;  %s5205_s2 = inlined_call_operand.hbm [shape: f32[1,1024], index: 2, kind: input, shape index: {}]   ;;  %s5206_s3 = inlined_call_operand.hbm [shape: bf16[1024,512], index: 3, kind: input, shape index: {}]   ;;  %s5207_s4 = inlined_call_operand.vmem [shape: f32[1,512], index: 4, kind: input, shape index: {}]   ;;  %s5208_s5 = inlined_call_operand.hbm [shape: bf16[512,512], index: 5, kind: input, shape index: {}]   ;;  %s5209_s6 = inlined_call_operand.vmem [shape: f32[1,512], index: 6, kind: input, shape index: {}]   ;;  %s5210_s7 = inlined_call_operand.hbm [shape: bf16[512,128], index: 7, kind: input, shape index: {}]   ;;  %s5211_s8 = inlined_call_operand.vmem [shape: f32[1,128], index: 8, kind: input, shape index: {}]   ;;  %s5212_s9 = inlined_call_operand.hbm [shape: bf16[8,128], index: 9, kind: output, shape index: {}]  }
   0x1   :  { %15 = vsyncpa [#allocation6], 0 }
   0x2   :  { %16 = vsyncpa [#allocation9], 0 }
   0x3   :  { %17 = vsyncpa [#allocation12], 0 }
   0x4   :  { %18 = vsyncpa [#allocation4], 0  ;;  %s4965_s30 = smov [#allocation5]   ;;  %s4801_s13 = scalar_lea.hbm %s5204_s1, 2048 }
   0x5   :  { %s34_s10 = sshll.u32 %s4965_s30, 4  ;;  %p4802_p0 = scmp.ne.s32.totalorder %s5204_s1, %s4801_s13  ;;  %s35_s10 = int_to_ptr.vmem [resolvable:$true] %s34_s10 }
   0x6   :  { %p4805_p1 = scmp.lt.u32.totalorder %s4801_s13, %s5204_s1 }
   0x8   :  { %p4807_p2 = pnand %p4805_p1, %p4802_p0 }
   0xa   :  { %4810 = shalt.err (!%p4807_p2)
}
   0xb   :  { %s4811_s18 = scalar_lea.vmem %s35_s10, 2048  ;;  %p4816_p4 = scmp.lt.s32.totalorder %s35_s10, %s35_s10 }
   0xc   :  { %p4812_p3 = scmp.ne.s32.totalorder %s35_s10, %s4811_s18  ;;  %p4817_p5 = scmp.lt.s32.totalorder %s4811_s18, %s4811_s18 }
   0xe   :  { %p4818_p6 = por %p4817_p5, %p4816_p4 }
  0x10   :  { %p4819_p7 = pnand %p4818_p6, %p4812_p3 }
  0x12   :  { %4822 = shalt.err (!%p4819_p7)
}
  0x13   :  { %s4966_s19 = smov 512   ;;  %s4967_s20 = smov 32  }
  0x14   :  { %40 = dma.hbm_to_vmem [thread:$0]  %s5204_s1, 2048, %s35_s10, [#allocation6], %s4966_s19, %s4966_s19, %s4967_s20  }
  0x15   :  { %s4968_s23 = smov [#allocation8]   ;;  %s4823_s27 = scalar_lea.hbm %s5206_s3, 32768 }
  0x16   :  { %s56_s24 = sshll.u32 %s4968_s23, 4  ;;  %p4824_p8 = scmp.ne.s32.totalorder %s5206_s3, %s4823_s27  ;;  %s57_s24 = int_to_ptr.vmem [resolvable:$true] %s56_s24 }
  0x17   :  { %p4827_p9 = scmp.lt.u32.totalorder %s4823_s27, %s5206_s3 }
  0x19   :  { %p4829_p10 = pnand %p4827_p9, %p4824_p8 }
  0x1b   :  { %4832 = shalt.err (!%p4829_p10)
}
  0x1c   :  { %s4833_s12 = scalar_lea.vmem %s57_s24, 32768  ;;  %p4838_p12 = scmp.lt.s32.totalorder %s57_s24, %s57_s24 }
  0x1d   :  { %p4834_p11 = scmp.ne.s32.totalorder %s57_s24, %s4833_s12  ;;  %p4839_p13 = scmp.lt.s32.totalorder %s4833_s12, %s4833_s12 }
  0x1f   :  { %p4840_p0 = por %p4839_p13, %p4838_p12 }
  0x21   :  { %p4841_p1 = pnand %p4840_p0, %p4834_p11 }
  0x23   :  { %4844 = shalt.err (!%p4841_p1)
}
  0x24   :  { %s4969_s1 = smov 256   ;;  %s4970_s10 = smov 16  }
  0x25   :  { %62 = dma.hbm_to_vmem [thread:$0]  %s5206_s3, 32768, %s57_s24, [#allocation9], %s4969_s1, %s4969_s1, %s4970_s10  }
  0x26   :  { %s4971_s15 = smov [#allocation2]   ;;  %s4972_s17 = smov [#allocation7]  }
  0x27   :  { %s25_s16 = sshll.u32 %s4971_s15, 4  ;;  %s47_s18 = sshll.u32 %s4972_s17, 4  ;;  %s26_s16 = int_to_ptr.vmem [resolvable:$true] %s25_s16  ;;  %s48_s18 = int_to_ptr.vmem [resolvable:$true] %s47_s18 }
  0x28   :  { %s4845_s21 = scalar_lea.hbm %s5203_s0, 64 }
  0x29   :  { %p4846_p2 = scmp.ne.s32.totalorder %s5203_s0, %s4845_s21  ;;  %p4849_p3 = scmp.lt.u32.totalorder %s4845_s21, %s5203_s0 }
  0x2b   :  { %p4851_p4 = pnand %p4849_p3, %p4846_p2 }
  0x2d   :  { %4854 = shalt.err (!%p4851_p4)
}
  0x2e   :  { %s4855_s3 = scalar_lea.vmem %s26_s16, 64  ;;  %p4860_p6 = scmp.lt.s32.totalorder %s26_s16, %s26_s16 }
  0x2f   :  { %p4856_p5 = scmp.ne.s32.totalorder %s26_s16, %s4855_s3  ;;  %p4861_p7 = scmp.lt.s32.totalorder %s4855_s3, %s4855_s3 }
  0x31   :  { %p4862_p8 = por %p4861_p7, %p4860_p6 }
  0x33   :  { %p4863_p9 = pnand %p4862_p8, %p4856_p5 }
  0x35   :  { %4866 = shalt.err (!%p4863_p9)
}
  0x36   :  { %28 = dma.hbm_to_vmem [thread:$0]  %s5203_s0, 64, %s26_s16, [#allocation3]  }
  0x37   :  { %s4867_s30 = scalar_lea.hbm %s5205_s2, 128 }
  0x38   :  { %p4868_p10 = scmp.ne.s32.totalorder %s5205_s2, %s4867_s30  ;;  %p4871_p11 = scmp.lt.u32.totalorder %s4867_s30, %s5205_s2 }
  0x3a   :  { %p4873_p12 = pnand %p4871_p11, %p4868_p10 }
  0x3c   :  { %4876 = shalt.err (!%p4873_p12)
}
  0x3d   :  { %s4877_s15 = scalar_lea.vmem %s48_s18, 128  ;;  %p4882_p0 = scmp.lt.s32.totalorder %s48_s18, %s48_s18 }
  0x3e   :  { %p4878_p13 = scmp.ne.s32.totalorder %s48_s18, %s4877_s15  ;;  %p4883_p1 = scmp.lt.s32.totalorder %s4877_s15, %s4877_s15 }
  0x40   :  { %p4884_p2 = por %p4883_p1, %p4882_p0 }
  0x42   :  { %p4885_p3 = pnand %p4884_p2, %p4878_p13 }
  0x44   :  { %4888 = shalt.err (!%p4885_p3)
}
  0x45   :  { %50 = dma.hbm_to_vmem [thread:$0]  %s5205_s2, 128, %s48_s18, [#allocation6]  }
  0x46   :  { %s4973_s17 = smov [#allocation10]   ;;  %s4974_s20 = smov [#allocation11]  }
  0x47   :  { %s70_s19 = sshll.u32 %s4973_s17, 4  ;;  %s84_s21 = sshll.u32 %s4974_s20, 4  ;;  %s71_s19 = int_to_ptr.vmem [resolvable:$true] %s70_s19  ;;  %s5080_s21 = int_to_ptr.vmem [resolvable:$true] %s84_s21 }
  0x48   :  { %s4889_s25 = scalar_lea.hbm %s5208_s5, 16384 }
  0x49   :  { %p4890_p4 = scmp.ne.s32.totalorder %s5208_s5, %s4889_s25  ;;  %p4893_p5 = scmp.lt.u32.totalorder %s4889_s25, %s5208_s5 }
  0x4b   :  { %p4895_p6 = pnand %p4893_p5, %p4890_p4 }
  0x4d   :  { %4898 = shalt.err (!%p4895_p6)
}
  0x4e   :  { %s4899_s2 = scalar_lea.vmem %s71_s19, 16384  ;;  %p4904_p8 = scmp.lt.s32.totalorder %s71_s19, %s71_s19 }
  0x4f   :  { %p4900_p7 = scmp.ne.s32.totalorder %s71_s19, %s4899_s2  ;;  %p4905_p9 = scmp.lt.s32.totalorder %s4899_s2, %s4899_s2 }
  0x51   :  { %p4906_p10 = por %p4905_p9, %p4904_p8 }
  0x53   :  { %p4907_p11 = pnand %p4906_p10, %p4900_p7 }
  0x55   :  { %4910 = shalt.err (!%p4907_p11)
}
  0x56   :  { %76 = dma.hbm_to_vmem [thread:$0]  %s5208_s5, 16384, %s71_s19, [#allocation9], %s4969_s1, %s4969_s1, %s4970_s10  }
  0x57   :  { %s4911_s11 = scalar_lea.hbm %s5210_s7, 4096 }
  0x58   :  { %p4912_p12 = scmp.ne.s32.totalorder %s5210_s7, %s4911_s11  ;;  %p4915_p13 = scmp.lt.u32.totalorder %s4911_s11, %s5210_s7 }
  0x5a   :  { %p4917_p0 = pnand %p4915_p13, %p4912_p12 }
  0x5c   :  { %4920 = shalt.err (!%p4917_p0)
}
  0x5d   :  { %s4921_s0 = scalar_lea.vmem %s5080_s21, 4096  ;;  %p4926_p2 = scmp.lt.s32.totalorder %s5080_s21, %s5080_s21 }
  0x5e   :  { %p4922_p1 = scmp.ne.s32.totalorder %s5080_s21, %s4921_s0  ;;  %p4927_p3 = scmp.lt.s32.totalorder %s4921_s0, %s4921_s0 }
  0x60   :  { %p4928_p4 = por %p4927_p3, %p4926_p2 }
  0x62   :  { %p4929_p5 = pnand %p4928_p4, %p4922_p1 }
  0x64   :  { %4932 = shalt.err (!%p4929_p5)
}
  0x65   :  { %s4975_s5 = smov 64   ;;  %s4976_s1 = smov 4  }
  0x66   :  { %90 = dma.hbm_to_vmem [thread:$0]  %s5210_s7, 4096, %s5080_s21, [#allocation12], %s4975_s5, %s4975_s5, %s4976_s1  }
  0x67   :  { %4955 = dma.done.wait [#allocation3], 64  }
  0x68   :  { %4956 = vsyncadd [#allocation3], 4294967232 }
  0x69   :  { %4957 = dma.done.wait [#allocation6], 2176  }
  0x6a   :  { %4958 = vsyncadd [#allocation6], 4294965120 }
  0x6b   :  { %4959 = dma.done.wait [#allocation9], 49152  }
  0x6c   :  { %4960 = vsyncadd [#allocation9], 4294918144 }
  0x6d   :  { %4961 = dma.done.wait [#allocation12], 4096  }
  0x6e   :  { %4962 = vsyncadd [#allocation12], 4294963200  ;;  %v4977_v0 = vmov 0   ;;  %v113_v1 = vld [vmem:[#allocation5] sm:$0xff]  ;;  %v114_v7 = vld [vmem:[#allocation5 + $0x8] sm:$0xff]  ;;  %vm251_vm0 = vcmask 261120  }
  0x6f   :  { %287 = vmatprep.mubr.bf16.mxu0 %v4977_v0  ;;  %328 = vmatprep.mubr.bf16.mxu1 %v4977_v0  ;;  %v117_v2 = vld [vmem:[#allocation5 + $0x20] sm:$0xff]  ;;  %v118_v9 = vld [vmem:[#allocation5 + $0x28] sm:$0xff]  ;;  %v115_v15 = vld [vmem:[#allocation5 + $0x10] sm:$0xff]  ;;  %s4978_s21 = smov [#allocation13]  }
  0x70   :  { %v121_v3 = vld [vmem:[#allocation5 + $0x40] sm:$0xff]  ;;  %v3657_v4 = vcombine.high %v113_v1, %v117_v2  ;;  %v3656_v5 = vcombine.low %v113_v1, %v117_v2  ;;  %v122_v10 = vld [vmem:[#allocation5 + $0x48] sm:$0xff]  ;;  %v3659_v12 = vcombine.high %v114_v7, %v118_v9  ;;  %v3658_v13 = vcombine.low %v114_v7, %v118_v9  ;;  %v119_v16 = vld [vmem:[#allocation5 + $0x30] sm:$0xff]  ;;  %s3644_s22 = sshll.u32 %s4978_s21, 4  ;;  %s3645_s22 = int_to_ptr.vmem [resolvable:$true] %s3644_s22 }
  0x71   :  { %v125_v6 = vld [vmem:[#allocation5 + $0x60] sm:$0xff]  ;;  %v126_v11 = vld [vmem:[#allocation5 + $0x68] sm:$0xff]  ;;  %v116_v18 = vld [vmem:[#allocation5 + $0x18] sm:$0xff]  ;;  %v3661_v20 = vcombine.high %v115_v15, %v119_v16  ;;  %v3660_v27 = vcombine.low %v115_v15, %v119_v16  ;;  %s4933_s23 = scalar_lea.vmem %s3645_s22, 64  ;;  %p4938_p7 = scmp.lt.s32.totalorder %s3645_s22, %s3645_s22 }
  0x72   :  { %v3665_v8 = vcombine.high %v121_v3, %v125_v6  ;;  %255 = vmatprep.subr.bf16.mxu0 %v3657_v4  ;;  %v3667_v14 = vcombine.high %v122_v10, %v126_v11  ;;  %v3664_v17 = vcombine.low %v121_v3, %v125_v6  ;;  %v120_v19 = vld [vmem:[#allocation5 + $0x38] sm:$0xff]  ;;  %296 = vmatprep.subr.bf16.mxu1 %v3659_v12  ;;  %v123_v23 = vld [vmem:[#allocation5 + $0x50] sm:$0xff]  ;;  %p4934_p6 = scmp.ne.s32.totalorder %s3645_s22, %s4933_s23  ;;  %p4939_p8 = scmp.lt.s32.totalorder %s4933_s23, %s4933_s23 }
  0x73   :  { %256 = vmatpush1.bf16.msra.mxu0 %v3656_v5  ;;  %v112_v21 = vld [vmem:[#allocation2] sm:$0xf]  ;;  %297 = vmatpush1.bf16.msra.mxu1 %v3658_v13  ;;  %v3666_v22 = vcombine.low %v122_v10, %v126_v11  ;;  %v127_v24 = vld [vmem:[#allocation5 + $0x70] sm:$0xff]  ;;  %v3663_v25 = vcombine.high %v116_v18, %v120_v19  ;;  %v3662_v30 = vcombine.low %v116_v18, %v120_v19  ;;  %v4191_v36 = vld [vmem:[#allocation8] ss:$16 sps:$4 sm:$0xff]  }
  0x74   :  { %257 = vmatprep.subr.bf16.mxu0 %v3665_v8  ;;  %298 = vmatprep.subr.bf16.mxu1 %v3667_v14  ;;  %v124_v26 = vld [vmem:[#allocation5 + $0x58] sm:$0xff]  ;;  %v3669_v29 = vcombine.high %v123_v23, %v127_v24  ;;  %v3668_v32 = vcombine.low %v123_v23, %v127_v24  ;;  %v4196_v35 = vld [vmem:[#allocation8 + $0xc] ss:$16 sps:$4 sm:$0xff]   ;;  %v4194_v38 = vld [vmem:[#allocation8 + $0x8] ss:$16 sps:$4 sm:$0xff]   ;;  %p4940_p9 = por %p4939_p8, %p4938_p7 }
  0x75   :  { %v128_v28 = vld [vmem:[#allocation5 + $0x78] sm:$0xff]  ;;  %v4202_v39 = vld [vmem:[#allocation8 + $0x2c] ss:$16 sps:$4 sm:$0xff]   ;;  %v4200_v42 = vld [vmem:[#allocation8 + $0x28] ss:$16 sps:$4 sm:$0xff]  }
  0x76   :  { %v3671_v31 = vcombine.high %v124_v26, %v128_v28  ;;  %v4193_v33 = vld [vmem:[#allocation8 + $0x4] ss:$16 sps:$4 sm:$0xff]   ;;  %v3670_v34 = vcombine.low %v124_v26, %v128_v28  ;;  %v4197_v40 = vld [vmem:[#allocation8 + $0x20] ss:$16 sps:$4 sm:$0xff]   ;;  %v4208_v43 = vld [vmem:[#allocation8 + $0x4c] ss:$16 sps:$4 sm:$0xff]   ;;  %p4941_p10 = pnand %p4940_p9, %p4934_p6 }
  0x77   :  { %258 = vmatpush1.bf16.msra.mxu0 %v3664_v17  ;;  %299 = vmatpush1.bf16.msra.mxu1 %v3666_v22  ;;  %v4199_v37 = vld [vmem:[#allocation8 + $0x24] ss:$16 sps:$4 sm:$0xff]   ;;  %v4203_v44 = vld [vmem:[#allocation8 + $0x40] ss:$16 sps:$4 sm:$0xff]   ;;  %v4206_v46 = vld [vmem:[#allocation8 + $0x48] ss:$16 sps:$4 sm:$0xff]  }
  0x78   :  { %337 = vmatprep.subr.bf16.mxu0 %v3661_v20  ;;  %378 = vmatprep.subr.bf16.mxu1 %v3663_v25  ;;  %v4205_v41 = vld [vmem:[#allocation8 + $0x44] ss:$16 sps:$4 sm:$0xff]   ;;  %v4214_v47 = vld [vmem:[#allocation8 + $0x6c] ss:$16 sps:$4 sm:$0xff]   ;;  %v4209_v48 = vld [vmem:[#allocation8 + $0x60] ss:$16 sps:$4 sm:$0xff]  }
  0x79   :  { %v4211_v45 = vld [vmem:[#allocation8 + $0x64] ss:$16 sps:$4 sm:$0xff]   ;;  %v4212_v50 = vld [vmem:[#allocation8 + $0x68] ss:$16 sps:$4 sm:$0xff]   ;;  %v4220_v51 = vld [vmem:[#allocation8 + $0x8c] ss:$16 sps:$4 sm:$0xff]  }
  0x7a   :  { %3672 = vmatmul.mubr.msk.bf16.vlgmr.msra.gmra.mrb[0].mxu0 %vm251_vm0, %v112_v21  ;;  %3673 = vmatmul.mubr.msk.bf16.vlgmr.msra.gmra.mrb[0].mxu1 %vm251_vm0, %v112_v21  ;;  %v4217_v49 = vld [vmem:[#allocation8 + $0x84] ss:$16 sps:$4 sm:$0xff]   ;;  %v4215_v52 = vld [vmem:[#allocation8 + $0x80] ss:$16 sps:$4 sm:$0xff]   ;;  %v4218_v54 = vld [vmem:[#allocation8 + $0x88] ss:$16 sps:$4 sm:$0xff]  }
  0x7b   :  { %338 = vmatpush1.bf16.msra.mxu0 %v3660_v27  ;;  %369 = vmatprep.mubr.bf16.mxu0 %v4977_v0  ;;  %v4223_v53 = vld [vmem:[#allocation8 + $0xa4] ss:$16 sps:$4 sm:$0xff]   ;;  %v4226_v55 = vld [vmem:[#allocation8 + $0xac] ss:$16 sps:$4 sm:$0xff]   ;;  %v4221_v56 = vld [vmem:[#allocation8 + $0xa0] ss:$16 sps:$4 sm:$0xff]  }
  0x7c   :  { %339 = vmatprep.subr.bf16.mxu0 %v3669_v29  ;;  %379 = vmatpush1.bf16.msra.mxu1 %v3662_v30  ;;  %v4229_v57 = vld [vmem:[#allocation8 + $0xc4] ss:$16 sps:$4 sm:$0xff]   ;;  %v4224_v58 = vld [vmem:[#allocation8 + $0xa8] ss:$16 sps:$4 sm:$0xff]   ;;  %v4232_v59 = vld [vmem:[#allocation8 + $0xcc] ss:$16 sps:$4 sm:$0xff]  }
  0x7d   :  { %410 = vmatprep.mubr.bf16.mxu1 %v4977_v0  ;;  %380 = vmatprep.subr.bf16.mxu1 %v3671_v31  ;;  %v4227_v60 = vld [vmem:[#allocation8 + $0xc0] ss:$16 sps:$4 sm:$0xff]   ;;  %v4230_v61 = vld [vmem:[#allocation8 + $0xc8] ss:$16 sps:$4 sm:$0xff]   ;;  %v4235_v62 = vld [vmem:[#allocation8 + $0xe4] ss:$16 sps:$4 sm:$0xff]  }
  0x7e   :  { %v4233_v63 = vld [vmem:[#allocation8 + $0xe0] ss:$16 sps:$4 sm:$0xff]   ;;  %v4238_v0 = vld [vmem:[#allocation8 + $0xec] ss:$16 sps:$4 sm:$0xff]   ;;  %v4241_v1 = vld [vmem:[#allocation8 + $0x104] ss:$16 sps:$4 sm:$0xff]  }
  0x7f   :  { %340 = vmatpush1.bf16.msra.mxu0 %v3668_v32  ;;  %v4236_v2 = vld [vmem:[#allocation8 + $0xe8] ss:$16 sps:$4 sm:$0xff]   ;;  %v4244_v3 = vld [vmem:[#allocation8 + $0x10c] ss:$16 sps:$4 sm:$0xff]   ;;  %v4239_v4 = vld [vmem:[#allocation8 + $0x100] ss:$16 sps:$4 sm:$0xff]  }
  0x80   :  { %1993 = vmatprep.subr.bf16.mxu0 %v4193_v33  ;;  %381 = vmatpush1.bf16.msra.mxu1 %v3670_v34  ;;  %v4247_v5 = vld [vmem:[#allocation8 + $0x124] ss:$16 sps:$4 sm:$0xff]   ;;  %v4242_v6 = vld [vmem:[#allocation8 + $0x108] ss:$16 sps:$4 sm:$0xff]   ;;  %v4250_v7 = vld [vmem:[#allocation8 + $0x12c] ss:$16 sps:$4 sm:$0xff]  }
  0x81   :  { %2157 = vmatprep.subr.bf16.mxu1 %v4196_v35  ;;  %v4245_v8 = vld [vmem:[#allocation8 + $0x120] ss:$16 sps:$4 sm:$0xff]   ;;  %v4253_v9 = vld [vmem:[#allocation8 + $0x144] ss:$16 sps:$4 sm:$0xff]   ;;  %v4248_v10 = vld [vmem:[#allocation8 + $0x128] ss:$16 sps:$4 sm:$0xff]  }
  0x82   :  { %3674 = vmatmul.mubr.msk.bf16.vlgmr.msra.gmra.mrb[4].mxu0 %vm251_vm0, %v112_v21  ;;  %v4256_v11 = vld [vmem:[#allocation8 + $0x14c] ss:$16 sps:$4 sm:$0xff]   ;;  %v4251_v12 = vld [vmem:[#allocation8 + $0x140] ss:$16 sps:$4 sm:$0xff]   ;;  %v4259_v13 = vld [vmem:[#allocation8 + $0x164] ss:$16 sps:$4 sm:$0xff]  }
  0x83   :  { %1994 = vmatpush1.bf16.msra.mxu0 %v4191_v36  ;;  %3675 = vmatmul.mubr.msk.bf16.vlgmr.msra.gmra.mrb[4].mxu1 %vm251_vm0, %v112_v21  ;;  %v4254_v14 = vld [vmem:[#allocation8 + $0x148] ss:$16 sps:$4 sm:$0xff]   ;;  %v4262_v15 = vld [vmem:[#allocation8 + $0x16c] ss:$16 sps:$4 sm:$0xff]   ;;  %v4257_v16 = vld [vmem:[#allocation8 + $0x160] ss:$16 sps:$4 sm:$0xff]   ;;  %v131_v36 = vlaneseq }
  0x84   :  { %1995 = vmatprep.subr.bf16.mxu0 %v4199_v37  ;;  %2158 = vmatpush1.bf16.msra.mxu1 %v4194_v38  ;;  %v4265_v17 = vld [vmem:[#allocation8 + $0x184] ss:$16 sps:$4 sm:$0xff]   ;;  %v4260_v18 = vld [vmem:[#allocation8 + $0x168] ss:$16 sps:$4 sm:$0xff]   ;;  %v4268_v19 = vld [vmem:[#allocation8 + $0x18c] ss:$16 sps:$4 sm:$0xff]  }
  0x85   :  { %2159 = vmatprep.subr.bf16.mxu1 %v4202_v39  ;;  %v4263_v20 = vld [vmem:[#allocation8 + $0x180] ss:$16 sps:$4 sm:$0xff]   ;;  %v4271_v21 = vld [vmem:[#allocation8 + $0x1a4] ss:$16 sps:$4 sm:$0xff]   ;;  %v4266_v22 = vld [vmem:[#allocation8 + $0x188] ss:$16 sps:$4 sm:$0xff]  }
  0x86   :  { %v4274_v23 = vld [vmem:[#allocation8 + $0x1ac] ss:$16 sps:$4 sm:$0xff]   ;;  %v4269_v24 = vld [vmem:[#allocation8 + $0x1a0] ss:$16 sps:$4 sm:$0xff]   ;;  %v4272_v25 = vld [vmem:[#allocation8 + $0x1a8] ss:$16 sps:$4 sm:$0xff]  }
  0x87   :  { %1996 = vmatpush1.bf16.msra.mxu0 %v4197_v40  ;;  %v4277_v26 = vld [vmem:[#allocation8 + $0x1c4] ss:$16 sps:$4 sm:$0xff]   ;;  %v4280_v27 = vld [vmem:[#allocation8 + $0x1cc] ss:$16 sps:$4 sm:$0xff]   ;;  %v4275_v28 = vld [vmem:[#allocation8 + $0x1c0] ss:$16 sps:$4 sm:$0xff]  }
  0x88   :  { %1997 = vmatprep.subr.bf16.mxu0 %v4205_v41  ;;  %2160 = vmatpush1.bf16.msra.mxu1 %v4200_v42  ;;  %v4278_v29 = vld [vmem:[#allocation8 + $0x1c8] ss:$16 sps:$4 sm:$0xff]   ;;  %v4283_v30 = vld [vmem:[#allocation8 + $0x1e4] ss:$16 sps:$4 sm:$0xff]   ;;  %v4286_v31 = vld [vmem:[#allocation8 + $0x1ec] ss:$16 sps:$4 sm:$0xff]  }
  0x89   :  { %2161 = vmatprep.subr.bf16.mxu1 %v4208_v43  ;;  %v4281_v32 = vld [vmem:[#allocation8 + $0x1e0] ss:$16 sps:$4 sm:$0xff]   ;;  %v4284_v33 = vld [vmem:[#allocation8 + $0x1e8] ss:$16 sps:$4 sm:$0xff]   ;;  %v4289_v34 = vld [vmem:[#allocation8 + $0x204] ss:$16 sps:$4 sm:$0xff]  }
  0x8a   :  { %v4292_v35 = vld [vmem:[#allocation8 + $0x20c] ss:$16 sps:$4 sm:$0xff]   ;;  %v5118_v37 = vshrl.u32 %v131_v36, 7  ;;  %v4343_v36 = vld [vmem:[#allocation8 + $0x324] ss:$16 sps:$4 sm:$0xff]  }
  0x8b   :  { %1998 = vmatpush1.bf16.msra.mxu0 %v4203_v44  ;;  %v5123_v39 = vld [vmem:[#allocation7] sm:$0xff] }
  0x8c   :  { %1999 = vmatprep.subr.bf16.mxu0 %v4211_v45  ;;  %2162 = vmatpush1.bf16.msra.mxu1 %v4206_v46  ;;  %v5121_v38 = vsub.s32 0, %v5118_v37  ;;  %v5126_v40 = vsub.s32 1, %v5118_v37  ;;  %v5129_v41 = vsub.s32 3, %v5118_v37 }
  0x8d   :  { %2163 = vmatprep.subr.bf16.mxu1 %v4214_v47 }
  0x8e   :  { %v134_v42 = vrot.slane %v5123_v39, %v5121_v38  ;;  %v138_v43 = vrot.slane %v5123_v39, %v5126_v40  ;;  %v146_v45 = vrot.slane %v5123_v39, %v5129_v41 }
  0x8f   :  { %2000 = vmatpush1.bf16.msra.mxu0 %v4209_v48 }
  0x90   :  { %2001 = vmatprep.subr.bf16.mxu0 %v4217_v49  ;;  %2164 = vmatpush1.bf16.msra.mxu1 %v4212_v50 }
  0x91   :  { %2165 = vmatprep.subr.bf16.mxu1 %v4220_v51 }
  0x93   :  { %2002 = vmatpush1.bf16.msra.mxu0 %v4215_v52 }
  0x94   :  { %2003 = vmatprep.subr.bf16.mxu0 %v4223_v53  ;;  %2166 = vmatpush1.bf16.msra.mxu1 %v4218_v54 }
  0x95   :  { %2167 = vmatprep.subr.bf16.mxu1 %v4226_v55 }
  0x97   :  { %2004 = vmatpush1.bf16.msra.mxu0 %v4221_v56 }
  0x98   :  { %2005 = vmatprep.subr.bf16.mxu0 %v4229_v57  ;;  %2168 = vmatpush1.bf16.msra.mxu1 %v4224_v58 }
  0x99   :  { %2169 = vmatprep.subr.bf16.mxu1 %v4232_v59  ;;  %v4287_v59 = vld [vmem:[#allocation8 + $0x200] ss:$16 sps:$4 sm:$0xff]  }
  0x9b   :  { %2006 = vmatpush1.bf16.msra.mxu0 %v4227_v60  ;;  %v4290_v60 = vld [vmem:[#allocation8 + $0x208] ss:$16 sps:$4 sm:$0xff]  }
  0x9c   :  { %2007 = vmatprep.subr.bf16.mxu0 %v4235_v62  ;;  %2170 = vmatpush1.bf16.msra.mxu1 %v4230_v61 }
  0x9d   :  { %2171 = vmatprep.subr.bf16.mxu1 %v4238_v0  ;;  %v4298_v0 = vld [vmem:[#allocation8 + $0x22c] ss:$16 sps:$4 sm:$0xff]  }
  0x9f   :  { %2008 = vmatpush1.bf16.msra.mxu0 %v4233_v63  ;;  %v4295_v63 = vld [vmem:[#allocation8 + $0x224] ss:$16 sps:$4 sm:$0xff]  }
  0xa0   :  { %2009 = vmatprep.subr.bf16.mxu0 %v4241_v1  ;;  %2172 = vmatpush1.bf16.msra.mxu1 %v4236_v2 }
  0xa1   :  { %2173 = vmatprep.subr.bf16.mxu1 %v4244_v3 }
  0xa3   :  { %2010 = vmatpush1.bf16.msra.mxu0 %v4239_v4  ;;  %v4293_v4 = vld [vmem:[#allocation8 + $0x220] ss:$16 sps:$4 sm:$0xff]  }
  0xa4   :  { %2011 = vmatprep.subr.bf16.mxu0 %v4247_v5  ;;  %2174 = vmatpush1.bf16.msra.mxu1 %v4242_v6  ;;  %v4296_v5 = vld [vmem:[#allocation8 + $0x228] ss:$16 sps:$4 sm:$0xff]  }
  0xa5   :  { %2175 = vmatprep.subr.bf16.mxu1 %v4250_v7  ;;  %v4301_v7 = vld [vmem:[#allocation8 + $0x244] ss:$16 sps:$4 sm:$0xff]  }
  0xa7   :  { %2012 = vmatpush1.bf16.msra.mxu0 %v4245_v8  ;;  %v4304_v8 = vld [vmem:[#allocation8 + $0x24c] ss:$16 sps:$4 sm:$0xff]  }
  0xa8   :  { %2013 = vmatprep.subr.bf16.mxu0 %v4253_v9  ;;  %2176 = vmatpush1.bf16.msra.mxu1 %v4248_v10  ;;  %v4299_v10 = vld [vmem:[#allocation8 + $0x240] ss:$16 sps:$4 sm:$0xff]  }
  0xa9   :  { %2177 = vmatprep.subr.bf16.mxu1 %v4256_v11  ;;  %v4302_v11 = vld [vmem:[#allocation8 + $0x248] ss:$16 sps:$4 sm:$0xff]  }
  0xab   :  { %2014 = vmatpush1.bf16.msra.mxu0 %v4251_v12  ;;  %v4307_v12 = vld [vmem:[#allocation8 + $0x264] ss:$16 sps:$4 sm:$0xff]  }
  0xac   :  { %2015 = vmatprep.subr.bf16.mxu0 %v4259_v13  ;;  %2178 = vmatpush1.bf16.msra.mxu1 %v4254_v14  ;;  %v4310_v13 = vld [vmem:[#allocation8 + $0x26c] ss:$16 sps:$4 sm:$0xff]   ;;  %v4305_v14 = vld [vmem:[#allocation8 + $0x260] ss:$16 sps:$4 sm:$0xff]  }
  0xad   :  { %2179 = vmatprep.subr.bf16.mxu1 %v4262_v15  ;;  %v4308_v15 = vld [vmem:[#allocation8 + $0x268] ss:$16 sps:$4 sm:$0xff]  }
  0xaf   :  { %2016 = vmatpush1.bf16.msra.mxu0 %v4257_v16  ;;  %v4313_v16 = vld [vmem:[#allocation8 + $0x284] ss:$16 sps:$4 sm:$0xff]  }
  0xb0   :  { %2017 = vmatprep.subr.bf16.mxu0 %v4265_v17  ;;  %2180 = vmatpush1.bf16.msra.mxu1 %v4260_v18  ;;  %v4316_v17 = vld [vmem:[#allocation8 + $0x28c] ss:$16 sps:$4 sm:$0xff]   ;;  %v4311_v18 = vld [vmem:[#allocation8 + $0x280] ss:$16 sps:$4 sm:$0xff]  }
  0xb1   :  { %2181 = vmatprep.subr.bf16.mxu1 %v4268_v19  ;;  %v4314_v19 = vld [vmem:[#allocation8 + $0x288] ss:$16 sps:$4 sm:$0xff]  }
  0xb3   :  { %2018 = vmatpush1.bf16.msra.mxu0 %v4263_v20  ;;  %v4319_v20 = vld [vmem:[#allocation8 + $0x2a4] ss:$16 sps:$4 sm:$0xff]  }
  0xb4   :  { %2019 = vmatprep.subr.bf16.mxu0 %v4271_v21  ;;  %2182 = vmatpush1.bf16.msra.mxu1 %v4266_v22  ;;  %v4322_v21 = vld [vmem:[#allocation8 + $0x2ac] ss:$16 sps:$4 sm:$0xff]   ;;  %v4317_v22 = vld [vmem:[#allocation8 + $0x2a0] ss:$16 sps:$4 sm:$0xff]  }
  0xb5   :  { %2183 = vmatprep.subr.bf16.mxu1 %v4274_v23  ;;  %v4320_v23 = vld [vmem:[#allocation8 + $0x2a8] ss:$16 sps:$4 sm:$0xff]  }
  0xb7   :  { %2020 = vmatpush1.bf16.msra.mxu0 %v4269_v24  ;;  %v4325_v24 = vld [vmem:[#allocation8 + $0x2c4] ss:$16 sps:$4 sm:$0xff]  }
  0xb8   :  { %2184 = vmatpush1.bf16.msra.mxu1 %v4272_v25  ;;  %2021 = vmatprep.subr.bf16.mxu0 %v4277_v26  ;;  %v4328_v25 = vld [vmem:[#allocation8 + $0x2cc] ss:$16 sps:$4 sm:$0xff]   ;;  %v4323_v26 = vld [vmem:[#allocation8 + $0x2c0] ss:$16 sps:$4 sm:$0xff]  }
  0xb9   :  { %2185 = vmatprep.subr.bf16.mxu1 %v4280_v27  ;;  %v4326_v27 = vld [vmem:[#allocation8 + $0x2c8] ss:$16 sps:$4 sm:$0xff]  }
  0xbb   :  { %2022 = vmatpush1.bf16.msra.mxu0 %v4275_v28  ;;  %v4331_v28 = vld [vmem:[#allocation8 + $0x2e4] ss:$16 sps:$4 sm:$0xff]  }
  0xbc   :  { %2186 = vmatpush1.bf16.msra.mxu1 %v4278_v29  ;;  %2023 = vmatprep.subr.bf16.mxu0 %v4283_v30  ;;  %v4334_v29 = vld [vmem:[#allocation8 + $0x2ec] ss:$16 sps:$4 sm:$0xff]   ;;  %v4329_v30 = vld [vmem:[#allocation8 + $0x2e0] ss:$16 sps:$4 sm:$0xff]  }
  0xbd   :  { %2187 = vmatprep.subr.bf16.mxu1 %v4286_v31  ;;  %v4332_v31 = vld [vmem:[#allocation8 + $0x2e8] ss:$16 sps:$4 sm:$0xff]  }
  0xbf   :  { %2024 = vmatpush1.bf16.msra.mxu0 %v4281_v32  ;;  %v4337_v32 = vld [vmem:[#allocation8 + $0x304] ss:$16 sps:$4 sm:$0xff]  }
  0xc0   :  { %2188 = vmatpush1.bf16.msra.mxu1 %v4284_v33  ;;  %2034 = vmatprep.subr.bf16.mxu0 %v4289_v34  ;;  %v4340_v33 = vld [vmem:[#allocation8 + $0x30c] ss:$16 sps:$4 sm:$0xff]   ;;  %v4335_v34 = vld [vmem:[#allocation8 + $0x300] ss:$16 sps:$4 sm:$0xff]  }
  0xc1   :  { %2198 = vmatprep.subr.bf16.mxu1 %v4292_v35  ;;  %v4338_v35 = vld [vmem:[#allocation8 + $0x308] ss:$16 sps:$4 sm:$0xff]  }
 0x14d   :  { %v289_v44 = vpop.f32.mrb[0].mxu0  ;;  %v5137_v50 = vpop.f32.mrb[0].mxu1 }
 0x14e   :  { %v290_v46 = vadd.f32 %v289_v44, %v134_v42  ;;  %v291_v47 = vpop.f32.mrb[1].mxu0  ;;  %v332_v53 = vpop.f32.mrb[1].mxu1  ;;  %v4346_v42 = vld [vmem:[#allocation8 + $0x32c] ss:$16 sps:$4 sm:$0xff]   ;;  %v4344_v44 = vld [vmem:[#allocation8 + $0x328] ss:$16 sps:$4 sm:$0xff]  }
 0x14f   :  { %v292_v48 = vadd.f32 %v291_v47, %v138_v43  ;;  %v293_v49 = vpop.f32.mrb[2].mxu0  ;;  %v333_v55 = vadd.f32 %v332_v53, %v146_v45  ;;  %v334_v56 = vpop.f32.mrb[2].mxu1  ;;  %v4341_v43 = vld [vmem:[#allocation8 + $0x320] ss:$16 sps:$4 sm:$0xff]   ;;  %v4349_v45 = vld [vmem:[#allocation8 + $0x344] ss:$16 sps:$4 sm:$0xff]  }
 0x150   :  { %v419_v51 = vmax.f32 %v290_v46, 0.0  ;;  %v294_v52 = vpop.f32.mrb[3].mxu0  ;;  %v335_v57 = vpop.f32.mrb[3].mxu1  ;;  %v4352_v46 = vld [vmem:[#allocation8 + $0x34c] ss:$16 sps:$4 sm:$0xff]   ;;  %v5144_v56 = vsub.s32 2, %v5118_v37 }
 0x151   :  { %v420_v54 = vmax.f32 %v292_v48, 0.0  ;;  %v422_v61 = vmax.f32 %v333_v55, 0.0  ;;  %v4347_v47 = vld [vmem:[#allocation8 + $0x340] ss:$16 sps:$4 sm:$0xff]   ;;  %v4350_v48 = vld [vmem:[#allocation8 + $0x348] ss:$16 sps:$4 sm:$0xff]  }
 0x152   :  { %v427_v62 = vpack.c.bf16 %v419_v51, %v419_v51  ;;  %v4355_v49 = vld [vmem:[#allocation8 + $0x364] ss:$16 sps:$4 sm:$0xff]   ;;  %v4358_v51 = vld [vmem:[#allocation8 + $0x36c] ss:$16 sps:$4 sm:$0xff]   ;;  %v4353_v52 = vld [vmem:[#allocation8 + $0x360] ss:$16 sps:$4 sm:$0xff]  }
 0x153   :  { %v428_v58 = vpack.c.bf16 %v420_v54, %v420_v54  ;;  %v430_v1 = vpack.c.bf16 %v422_v61, %v422_v61  ;;  %v4356_v53 = vld [vmem:[#allocation8 + $0x368] ss:$16 sps:$4 sm:$0xff]   ;;  %v4361_v54 = vld [vmem:[#allocation8 + $0x384] ss:$16 sps:$4 sm:$0xff]   ;;  %v4364_v55 = vld [vmem:[#allocation8 + $0x38c] ss:$16 sps:$4 sm:$0xff]  }
 0x154   :  { %v4359_v57 = vld [vmem:[#allocation8 + $0x380] ss:$16 sps:$4 sm:$0xff]   ;;  %v153_v61 = vsub.s32 5, %v5118_v37 }
 0x155   :  { %2025 = vmatprep.mubr.bf16.mxu0 %v428_v58  ;;  %2189 = vmatprep.mubr.bf16.mxu1 %v428_v58  ;;  %v5139_v2 = vpop.f32.mrb[4].mxu0  ;;  %v4362_v58 = vld [vmem:[#allocation8 + $0x388] ss:$16 sps:$4 sm:$0xff]  }
 0x156   :  { %2026 = vmatmul.mubr.bf16.vlgmr.msra.gmra.mrb[8].mxu0 %v427_v62  ;;  %2190 = vmatmul.mubr.bf16.vlgmr.msra.gmra.mrb[8].mxu1 %v427_v62  ;;  %v5141_v3 = vpop.f32.mrb[5].mxu0  ;;  %v142_v62 = vrot.slane %v5123_v39, %v5144_v56 }
 0x157   :  { %2035 = vmatpush1.bf16.msra.mxu0 %v4287_v59  ;;  %2199 = vmatpush1.bf16.msra.mxu1 %v4290_v60  ;;  %v375_v6 = vpop.f32.mrb[6].mxu0  ;;  %v4367_v59 = vld [vmem:[#allocation8 + $0x3a4] ss:$16 sps:$4 sm:$0xff]   ;;  %v4370_v60 = vld [vmem:[#allocation8 + $0x3ac] ss:$16 sps:$4 sm:$0xff]  }
 0x158   :  { %2036 = vmatprep.subr.bf16.mxu0 %v4295_v63  ;;  %2200 = vmatprep.subr.bf16.mxu1 %v4298_v0  ;;  %v376_v9 = vpop.f32.mrb[7].mxu0  ;;  %v4365_v63 = vld [vmem:[#allocation8 + $0x3a0] ss:$16 sps:$4 sm:$0xff]   ;;  %v4368_v0 = vld [vmem:[#allocation8 + $0x3a8] ss:$16 sps:$4 sm:$0xff]  }
 0x159   :  { %2066 = vmatprep.mubr.bf16.mxu0 %v430_v1  ;;  %2230 = vmatprep.mubr.bf16.mxu1 %v430_v1  ;;  %v5149_v1 = vpop.f32.mrb[4].mxu1  ;;  %v331_v9 = vadd.f32 %v5137_v50, %v142_v62  ;;  %v4388_v50 = vld [vmem:[#allocation8 + $0x40c] ss:$16 sps:$4 sm:$0xff]   ;;  %v4434_v62 = vld [vmem:[#allocation8 + $0x508] ss:$16 sps:$4 sm:$0xff]  }
 0x15a   :  { %v5151_v6 = vpop.f32.mrb[5].mxu1 }
 0x15b   :  { %2037 = vmatpush1.bf16.msra.mxu0 %v4293_v4  ;;  %2201 = vmatpush1.bf16.msra.mxu1 %v4296_v5  ;;  %v4373_v4 = vld [vmem:[#allocation8 + $0x3c4] ss:$16 sps:$4 sm:$0xff]   ;;  %v4376_v5 = vld [vmem:[#allocation8 + $0x3cc] ss:$16 sps:$4 sm:$0xff]  }
 0x15c   :  { %2038 = vmatprep.subr.bf16.mxu0 %v4301_v7  ;;  %2202 = vmatprep.subr.bf16.mxu1 %v4304_v8  ;;  %v154_v7 = vrot.slane %v5123_v39, %v153_v61  ;;  %v416_v8 = vpop.f32.mrb[6].mxu1  ;;  %v4431_v61 = vld [vmem:[#allocation8 + $0x500] ss:$16 sps:$4 sm:$0xff]  }
 0x15d   :  { %v4448_v8 = vld [vmem:[#allocation8 + $0x54c] ss:$16 sps:$4 sm:$0xff]  }
 0x15f   :  { %2039 = vmatpush1.bf16.msra.mxu0 %v4299_v10  ;;  %2203 = vmatpush1.bf16.msra.mxu1 %v4302_v11  ;;  %v417_v10 = vpop.f32.mrb[7].mxu1  ;;  %v4371_v11 = vld [vmem:[#allocation8 + $0x3c0] ss:$16 sps:$4 sm:$0xff]  }
 0x160   :  { %2040 = vmatprep.subr.bf16.mxu0 %v4307_v12  ;;  %2204 = vmatprep.subr.bf16.mxu1 %v4310_v13  ;;  %v4374_v12 = vld [vmem:[#allocation8 + $0x3c8] ss:$16 sps:$4 sm:$0xff]   ;;  %v4379_v13 = vld [vmem:[#allocation8 + $0x3e4] ss:$16 sps:$4 sm:$0xff]  }
 0x161   :  { %v4446_v10 = vld [vmem:[#allocation8 + $0x548] ss:$16 sps:$4 sm:$0xff]  }
 0x163   :  { %2041 = vmatpush1.bf16.msra.mxu0 %v4305_v14  ;;  %2205 = vmatpush1.bf16.msra.mxu1 %v4308_v15  ;;  %v4382_v14 = vld [vmem:[#allocation8 + $0x3ec] ss:$16 sps:$4 sm:$0xff]   ;;  %v374_v15 = vadd.f32 %v5141_v3, %v154_v7  ;;  %v4445_v7 = vld [vmem:[#allocation8 + $0x544] ss:$16 sps:$4 sm:$0xff]  }
 0x164   :  { %2042 = vmatprep.subr.bf16.mxu0 %v4313_v16  ;;  %2206 = vmatprep.subr.bf16.mxu1 %v4316_v17  ;;  %v421_v16 = vmax.f32 %v331_v9, 0.0  ;;  %v4377_v17 = vld [vmem:[#allocation8 + $0x3e0] ss:$16 sps:$4 sm:$0xff]  }
 0x165   :  { %v4443_v9 = vld [vmem:[#allocation8 + $0x540] ss:$16 sps:$4 sm:$0xff]  }
 0x167   :  { %2043 = vmatpush1.bf16.msra.mxu0 %v4311_v18  ;;  %2207 = vmatpush1.bf16.msra.mxu1 %v4314_v19  ;;  %v4380_v18 = vld [vmem:[#allocation8 + $0x3e8] ss:$16 sps:$4 sm:$0xff]   ;;  %v4385_v19 = vld [vmem:[#allocation8 + $0x404] ss:$16 sps:$4 sm:$0xff]  }
 0x168   :  { %2044 = vmatprep.subr.bf16.mxu0 %v4319_v20  ;;  %2208 = vmatprep.subr.bf16.mxu1 %v4322_v21  ;;  %v424_v20 = vmax.f32 %v374_v15, 0.0  ;;  %v429_v21 = vpack.c.bf16 %v421_v16, %v421_v16  ;;  %v4457_v15 = vld [vmem:[#allocation8 + $0x584] ss:$16 sps:$4 sm:$0xff]   ;;  %v4460_v16 = vld [vmem:[#allocation8 + $0x58c] ss:$16 sps:$4 sm:$0xff]  }
 0x16a   :  { %v432_v3 = vpack.c.bf16 %v424_v20, %v424_v20  ;;  %v4466_v20 = vld [vmem:[#allocation8 + $0x5ac] ss:$16 sps:$4 sm:$0xff]  }
 0x16b   :  { %2045 = vmatpush1.bf16.msra.mxu0 %v4317_v22  ;;  %2209 = vmatpush1.bf16.msra.mxu1 %v4320_v23  ;;  %v4383_v22 = vld [vmem:[#allocation8 + $0x400] ss:$16 sps:$4 sm:$0xff]   ;;  %v4386_v23 = vld [vmem:[#allocation8 + $0x408] ss:$16 sps:$4 sm:$0xff]  }
 0x16c   :  { %2046 = vmatprep.subr.bf16.mxu0 %v4325_v24  ;;  %2210 = vmatprep.subr.bf16.mxu1 %v4328_v25  ;;  %v4391_v24 = vld [vmem:[#allocation8 + $0x424] ss:$16 sps:$4 sm:$0xff]   ;;  %v4394_v25 = vld [vmem:[#allocation8 + $0x42c] ss:$16 sps:$4 sm:$0xff]  }
 0x16f   :  { %2047 = vmatpush1.bf16.msra.mxu0 %v4323_v26  ;;  %2211 = vmatpush1.bf16.msra.mxu1 %v4326_v27  ;;  %v4389_v26 = vld [vmem:[#allocation8 + $0x420] ss:$16 sps:$4 sm:$0xff]   ;;  %v4392_v27 = vld [vmem:[#allocation8 + $0x428] ss:$16 sps:$4 sm:$0xff]  }
 0x170   :  { %2048 = vmatprep.subr.bf16.mxu0 %v4331_v28  ;;  %2212 = vmatprep.subr.bf16.mxu1 %v4334_v29  ;;  %v4397_v28 = vld [vmem:[#allocation8 + $0x444] ss:$16 sps:$4 sm:$0xff]   ;;  %v4400_v29 = vld [vmem:[#allocation8 + $0x44c] ss:$16 sps:$4 sm:$0xff]  }
 0x173   :  { %2049 = vmatpush1.bf16.msra.mxu0 %v4329_v30  ;;  %2213 = vmatpush1.bf16.msra.mxu1 %v4332_v31  ;;  %v4395_v30 = vld [vmem:[#allocation8 + $0x440] ss:$16 sps:$4 sm:$0xff]   ;;  %v4398_v31 = vld [vmem:[#allocation8 + $0x448] ss:$16 sps:$4 sm:$0xff]  }
 0x174   :  { %2050 = vmatprep.subr.bf16.mxu0 %v4337_v32  ;;  %2214 = vmatprep.subr.bf16.mxu1 %v4340_v33  ;;  %v4403_v32 = vld [vmem:[#allocation8 + $0x464] ss:$16 sps:$4 sm:$0xff]   ;;  %v4406_v33 = vld [vmem:[#allocation8 + $0x46c] ss:$16 sps:$4 sm:$0xff]  }
 0x177   :  { %2051 = vmatpush1.bf16.msra.mxu0 %v4335_v34  ;;  %2215 = vmatpush1.bf16.msra.mxu1 %v4338_v35  ;;  %v4401_v34 = vld [vmem:[#allocation8 + $0x460] ss:$16 sps:$4 sm:$0xff]   ;;  %v4404_v35 = vld [vmem:[#allocation8 + $0x468] ss:$16 sps:$4 sm:$0xff]  }
 0x178   :  { %2052 = vmatprep.subr.bf16.mxu0 %v4343_v36  ;;  %2216 = vmatprep.subr.bf16.mxu1 %v4346_v42  ;;  %v4409_v36 = vld [vmem:[#allocation8 + $0x484] ss:$16 sps:$4 sm:$0xff]   ;;  %v4412_v42 = vld [vmem:[#allocation8 + $0x48c] ss:$16 sps:$4 sm:$0xff]  }
 0x17b   :  { %2053 = vmatpush1.bf16.msra.mxu0 %v4341_v43  ;;  %2217 = vmatpush1.bf16.msra.mxu1 %v4344_v44  ;;  %v4407_v43 = vld [vmem:[#allocation8 + $0x480] ss:$16 sps:$4 sm:$0xff]   ;;  %v4410_v44 = vld [vmem:[#allocation8 + $0x488] ss:$16 sps:$4 sm:$0xff]  }
 0x17c   :  { %2054 = vmatprep.subr.bf16.mxu0 %v4349_v45  ;;  %2218 = vmatprep.subr.bf16.mxu1 %v4352_v46  ;;  %v4415_v45 = vld [vmem:[#allocation8 + $0x4a4] ss:$16 sps:$4 sm:$0xff]   ;;  %v4418_v46 = vld [vmem:[#allocation8 + $0x4ac] ss:$16 sps:$4 sm:$0xff]  }
 0x17f   :  { %2055 = vmatpush1.bf16.msra.mxu0 %v4347_v47  ;;  %2219 = vmatpush1.bf16.msra.mxu1 %v4350_v48  ;;  %v4413_v47 = vld [vmem:[#allocation8 + $0x4a0] ss:$16 sps:$4 sm:$0xff]   ;;  %v4416_v48 = vld [vmem:[#allocation8 + $0x4a8] ss:$16 sps:$4 sm:$0xff]  }
 0x180   :  { %2056 = vmatprep.subr.bf16.mxu0 %v4355_v49  ;;  %2220 = vmatprep.subr.bf16.mxu1 %v4358_v51  ;;  %v4421_v49 = vld [vmem:[#allocation8 + $0x4c4] ss:$16 sps:$4 sm:$0xff]   ;;  %v4424_v51 = vld [vmem:[#allocation8 + $0x4cc] ss:$16 sps:$4 sm:$0xff]  }
 0x183   :  { %2057 = vmatpush1.bf16.msra.mxu0 %v4353_v52  ;;  %2221 = vmatpush1.bf16.msra.mxu1 %v4356_v53  ;;  %v4419_v52 = vld [vmem:[#allocation8 + $0x4c0] ss:$16 sps:$4 sm:$0xff]   ;;  %v4422_v53 = vld [vmem:[#allocation8 + $0x4c8] ss:$16 sps:$4 sm:$0xff]  }
 0x184   :  { %2058 = vmatprep.subr.bf16.mxu0 %v4361_v54  ;;  %2222 = vmatprep.subr.bf16.mxu1 %v4364_v55  ;;  %v4427_v54 = vld [vmem:[#allocation8 + $0x4e4] ss:$16 sps:$4 sm:$0xff]   ;;  %v4430_v55 = vld [vmem:[#allocation8 + $0x4ec] ss:$16 sps:$4 sm:$0xff]  }
 0x187   :  { %2059 = vmatpush1.bf16.msra.mxu0 %v4359_v57  ;;  %2223 = vmatpush1.bf16.msra.mxu1 %v4362_v58  ;;  %v4425_v57 = vld [vmem:[#allocation8 + $0x4e0] ss:$16 sps:$4 sm:$0xff]   ;;  %v4428_v58 = vld [vmem:[#allocation8 + $0x4e8] ss:$16 sps:$4 sm:$0xff]  }
 0x188   :  { %2060 = vmatprep.subr.bf16.mxu0 %v4367_v59  ;;  %2224 = vmatprep.subr.bf16.mxu1 %v4370_v60  ;;  %v4433_v59 = vld [vmem:[#allocation8 + $0x504] ss:$16 sps:$4 sm:$0xff]   ;;  %v4436_v60 = vld [vmem:[#allocation8 + $0x50c] ss:$16 sps:$4 sm:$0xff]  }
 0x18b   :  { %2061 = vmatpush1.bf16.msra.mxu0 %v4365_v63  ;;  %2225 = vmatpush1.bf16.msra.mxu1 %v4368_v0  ;;  %v4439_v63 = vld [vmem:[#allocation8 + $0x524] ss:$16 sps:$4 sm:$0xff]   ;;  %v4442_v0 = vld [vmem:[#allocation8 + $0x52c] ss:$16 sps:$4 sm:$0xff]  }
 0x18c   :  { %2062 = vmatprep.subr.bf16.mxu0 %v4373_v4  ;;  %2226 = vmatprep.subr.bf16.mxu1 %v4376_v5  ;;  %v4437_v4 = vld [vmem:[#allocation8 + $0x520] ss:$16 sps:$4 sm:$0xff]   ;;  %v4440_v5 = vld [vmem:[#allocation8 + $0x528] ss:$16 sps:$4 sm:$0xff]  }
 0x18f   :  { %2063 = vmatpush1.bf16.msra.mxu0 %v4371_v11  ;;  %2227 = vmatpush1.bf16.msra.mxu1 %v4374_v12  ;;  %v4451_v11 = vld [vmem:[#allocation8 + $0x564] ss:$16 sps:$4 sm:$0xff]   ;;  %v4454_v12 = vld [vmem:[#allocation8 + $0x56c] ss:$16 sps:$4 sm:$0xff]  }
 0x190   :  { %2064 = vmatprep.subr.bf16.mxu0 %v4379_v13  ;;  %2228 = vmatprep.subr.bf16.mxu1 %v4382_v14  ;;  %v4449_v13 = vld [vmem:[#allocation8 + $0x560] ss:$16 sps:$4 sm:$0xff]   ;;  %v4452_v14 = vld [vmem:[#allocation8 + $0x568] ss:$16 sps:$4 sm:$0xff]  }
 0x193   :  { %2065 = vmatpush1.bf16.msra.mxu0 %v4377_v17  ;;  %2229 = vmatpush1.bf16.msra.mxu1 %v4380_v18  ;;  %v149_v17 = vsub.s32 4, %v5118_v37  ;;  %v4455_v18 = vld [vmem:[#allocation8 + $0x580] ss:$16 sps:$4 sm:$0xff]  }
 0x194   :  { %2075 = vmatprep.subr.bf16.mxu0 %v4385_v19  ;;  %2239 = vmatprep.subr.bf16.mxu1 %v4388_v50  ;;  %v4458_v19 = vld [vmem:[#allocation8 + $0x588] ss:$16 sps:$4 sm:$0xff]   ;;  %v4463_v50 = vld [vmem:[#allocation8 + $0x5a4] ss:$16 sps:$4 sm:$0xff]  }
 0x196   :  { %2067 = vmatmul.mubr.bf16.vlgmr.msra.gmra.mrb[8].mxu0 %v429_v21  ;;  %2231 = vmatmul.mubr.bf16.vlgmr.msra.gmra.mrb[8].mxu1 %v429_v21  ;;  %v161_v21 = vsub.s32 7, %v5118_v37 }
 0x197   :  { %2076 = vmatpush1.bf16.msra.mxu0 %v4383_v22  ;;  %2240 = vmatpush1.bf16.msra.mxu1 %v4386_v23  ;;  %v150_v22 = vrot.slane %v5123_v39, %v149_v17  ;;  %v4461_v23 = vld [vmem:[#allocation8 + $0x5a0] ss:$16 sps:$4 sm:$0xff]   ;;  %v4532_v17 = vld [vmem:[#allocation8 + $0x70c] ss:$16 sps:$4 sm:$0xff]  }
 0x198   :  { %2077 = vmatprep.subr.bf16.mxu0 %v4391_v24  ;;  %2241 = vmatprep.subr.bf16.mxu1 %v4394_v25  ;;  %v4464_v24 = vld [vmem:[#allocation8 + $0x5a8] ss:$16 sps:$4 sm:$0xff]   ;;  %v4469_v25 = vld [vmem:[#allocation8 + $0x5c4] ss:$16 sps:$4 sm:$0xff]  }
 0x199   :  { %2107 = vmatprep.mubr.bf16.mxu0 %v432_v3  ;;  %2271 = vmatprep.mubr.bf16.mxu1 %v432_v3  ;;  %v4472_v3 = vld [vmem:[#allocation8 + $0x5cc] ss:$16 sps:$4 sm:$0xff]  }
 0x19b   :  { %2078 = vmatpush1.bf16.msra.mxu0 %v4389_v26  ;;  %2242 = vmatpush1.bf16.msra.mxu1 %v4392_v27  ;;  %v162_v26 = vrot.slane %v5123_v39, %v161_v21  ;;  %v372_v27 = vadd.f32 %v5139_v2, %v150_v22  ;;  %v4533_v21 = vld [vmem:[#allocation8 + $0x720] ss:$16 sps:$4 sm:$0xff]   ;;  %v4536_v22 = vld [vmem:[#allocation8 + $0x728] ss:$16 sps:$4 sm:$0xff]  }
 0x19c   :  { %2079 = vmatprep.subr.bf16.mxu0 %v4397_v28  ;;  %2243 = vmatprep.subr.bf16.mxu1 %v4400_v29  ;;  %v4467_v28 = vld [vmem:[#allocation8 + $0x5c0] ss:$16 sps:$4 sm:$0xff]   ;;  %v4470_v29 = vld [vmem:[#allocation8 + $0x5c8] ss:$16 sps:$4 sm:$0xff]  }
 0x19f   :  { %2080 = vmatpush1.bf16.msra.mxu0 %v4395_v30  ;;  %2244 = vmatpush1.bf16.msra.mxu1 %v4398_v31  ;;  %v4475_v30 = vld [vmem:[#allocation8 + $0x5e4] ss:$16 sps:$4 sm:$0xff]   ;;  %v4478_v31 = vld [vmem:[#allocation8 + $0x5ec] ss:$16 sps:$4 sm:$0xff]  }
 0x1a0   :  { %2081 = vmatprep.subr.bf16.mxu0 %v4403_v32  ;;  %2245 = vmatprep.subr.bf16.mxu1 %v4406_v33  ;;  %v415_v32 = vadd.f32 %v5151_v6, %v162_v26  ;;  %v423_v33 = vmax.f32 %v372_v27, 0.0  ;;  %v4547_v26 = vld [vmem:[#allocation8 + $0x764] ss:$16 sps:$4 sm:$0xff]   ;;  %v4550_v27 = vld [vmem:[#allocation8 + $0x76c] ss:$16 sps:$4 sm:$0xff]  }
 0x1a2   :  { %v426_v2 = vmax.f32 %v415_v32, 0.0  ;;  %v4551_v32 = vld [vmem:[#allocation8 + $0x780] ss:$16 sps:$4 sm:$0xff]  }
 0x1a3   :  { %2082 = vmatpush1.bf16.msra.mxu0 %v4401_v34  ;;  %2246 = vmatpush1.bf16.msra.mxu1 %v4404_v35  ;;  %v4473_v34 = vld [vmem:[#allocation8 + $0x5e0] ss:$16 sps:$4 sm:$0xff]   ;;  %v4476_v35 = vld [vmem:[#allocation8 + $0x5e8] ss:$16 sps:$4 sm:$0xff]  }
 0x1a4   :  { %2083 = vmatprep.subr.bf16.mxu0 %v4409_v36  ;;  %2247 = vmatprep.subr.bf16.mxu1 %v4412_v42  ;;  %v4481_v36 = vld [vmem:[#allocation8 + $0x604] ss:$16 sps:$4 sm:$0xff]   ;;  %v4484_v42 = vld [vmem:[#allocation8 + $0x60c] ss:$16 sps:$4 sm:$0xff]   ;;  %v434_v6 = vpack.c.bf16 %v426_v2, %v426_v2  ;;  %v4560_v2 = vld [vmem:[#allocation8 + $0x7a8] ss:$16 sps:$4 sm:$0xff]  }
 0x1a7   :  { %2084 = vmatpush1.bf16.msra.mxu0 %v4407_v43  ;;  %2248 = vmatpush1.bf16.msra.mxu1 %v4410_v44  ;;  %v431_v43 = vpack.c.bf16 %v423_v33, %v423_v33  ;;  %v4479_v44 = vld [vmem:[#allocation8 + $0x600] ss:$16 sps:$4 sm:$0xff]   ;;  %v4554_v33 = vld [vmem:[#allocation8 + $0x788] ss:$16 sps:$4 sm:$0xff]  }
 0x1a8   :  { %2085 = vmatprep.subr.bf16.mxu0 %v4415_v45  ;;  %2249 = vmatprep.subr.bf16.mxu1 %v4418_v46  ;;  %v4482_v45 = vld [vmem:[#allocation8 + $0x608] ss:$16 sps:$4 sm:$0xff]   ;;  %v4487_v46 = vld [vmem:[#allocation8 + $0x624] ss:$16 sps:$4 sm:$0xff]  }
 0x1ab   :  { %2086 = vmatpush1.bf16.msra.mxu0 %v4413_v47  ;;  %2250 = vmatpush1.bf16.msra.mxu1 %v4416_v48  ;;  %v4490_v47 = vld [vmem:[#allocation8 + $0x62c] ss:$16 sps:$4 sm:$0xff]   ;;  %v4485_v48 = vld [vmem:[#allocation8 + $0x620] ss:$16 sps:$4 sm:$0xff]  }
 0x1ac   :  { %2087 = vmatprep.subr.bf16.mxu0 %v4421_v49  ;;  %2251 = vmatprep.subr.bf16.mxu1 %v4424_v51  ;;  %v4488_v49 = vld [vmem:[#allocation8 + $0x628] ss:$16 sps:$4 sm:$0xff]   ;;  %v4493_v51 = vld [vmem:[#allocation8 + $0x644] ss:$16 sps:$4 sm:$0xff]  }
 0x1af   :  { %2088 = vmatpush1.bf16.msra.mxu0 %v4419_v52  ;;  %2252 = vmatpush1.bf16.msra.mxu1 %v4422_v53  ;;  %v4496_v52 = vld [vmem:[#allocation8 + $0x64c] ss:$16 sps:$4 sm:$0xff]   ;;  %v4491_v53 = vld [vmem:[#allocation8 + $0x640] ss:$16 sps:$4 sm:$0xff]  }
 0x1b0   :  { %2089 = vmatprep.subr.bf16.mxu0 %v4427_v54  ;;  %2253 = vmatprep.subr.bf16.mxu1 %v4430_v55  ;;  %v4494_v54 = vld [vmem:[#allocation8 + $0x648] ss:$16 sps:$4 sm:$0xff]   ;;  %v4499_v55 = vld [vmem:[#allocation8 + $0x664] ss:$16 sps:$4 sm:$0xff]  }
 0x1b3   :  { %2090 = vmatpush1.bf16.msra.mxu0 %v4425_v57  ;;  %2254 = vmatpush1.bf16.msra.mxu1 %v4428_v58  ;;  %v4502_v57 = vld [vmem:[#allocation8 + $0x66c] ss:$16 sps:$4 sm:$0xff]   ;;  %v4497_v58 = vld [vmem:[#allocation8 + $0x660] ss:$16 sps:$4 sm:$0xff]  }
 0x1b4   :  { %2091 = vmatprep.subr.bf16.mxu0 %v4433_v59  ;;  %2255 = vmatprep.subr.bf16.mxu1 %v4436_v60  ;;  %v4500_v59 = vld [vmem:[#allocation8 + $0x668] ss:$16 sps:$4 sm:$0xff]   ;;  %v4505_v60 = vld [vmem:[#allocation8 + $0x684] ss:$16 sps:$4 sm:$0xff]  }
 0x1b7   :  { %2092 = vmatpush1.bf16.msra.mxu0 %v4431_v61  ;;  %2256 = vmatpush1.bf16.msra.mxu1 %v4434_v62  ;;  %v4508_v61 = vld [vmem:[#allocation8 + $0x68c] ss:$16 sps:$4 sm:$0xff]   ;;  %v4503_v62 = vld [vmem:[#allocation8 + $0x680] ss:$16 sps:$4 sm:$0xff]  }
 0x1b8   :  { %2093 = vmatprep.subr.bf16.mxu0 %v4439_v63  ;;  %2257 = vmatprep.subr.bf16.mxu1 %v4442_v0  ;;  %v4506_v63 = vld [vmem:[#allocation8 + $0x688] ss:$16 sps:$4 sm:$0xff]   ;;  %v4511_v0 = vld [vmem:[#allocation8 + $0x6a4] ss:$16 sps:$4 sm:$0xff]  }
 0x1bb   :  { %2094 = vmatpush1.bf16.msra.mxu0 %v4437_v4  ;;  %2258 = vmatpush1.bf16.msra.mxu1 %v4440_v5  ;;  %v4514_v4 = vld [vmem:[#allocation8 + $0x6ac] ss:$16 sps:$4 sm:$0xff]   ;;  %v4509_v5 = vld [vmem:[#allocation8 + $0x6a0] ss:$16 sps:$4 sm:$0xff]  }
 0x1bc   :  { %2095 = vmatprep.subr.bf16.mxu0 %v4445_v7  ;;  %2259 = vmatprep.subr.bf16.mxu1 %v4448_v8  ;;  %v4512_v7 = vld [vmem:[#allocation8 + $0x6a8] ss:$16 sps:$4 sm:$0xff]   ;;  %v4517_v8 = vld [vmem:[#allocation8 + $0x6c4] ss:$16 sps:$4 sm:$0xff]  }
 0x1bf   :  { %2096 = vmatpush1.bf16.msra.mxu0 %v4443_v9  ;;  %2260 = vmatpush1.bf16.msra.mxu1 %v4446_v10  ;;  %v4520_v9 = vld [vmem:[#allocation8 + $0x6cc] ss:$16 sps:$4 sm:$0xff]   ;;  %v4515_v10 = vld [vmem:[#allocation8 + $0x6c0] ss:$16 sps:$4 sm:$0xff]  }
 0x1c0   :  { %2097 = vmatprep.subr.bf16.mxu0 %v4451_v11  ;;  %2261 = vmatprep.subr.bf16.mxu1 %v4454_v12  ;;  %v4518_v11 = vld [vmem:[#allocation8 + $0x6c8] ss:$16 sps:$4 sm:$0xff]   ;;  %v4523_v12 = vld [vmem:[#allocation8 + $0x6e4] ss:$16 sps:$4 sm:$0xff]  }
 0x1c3   :  { %2098 = vmatpush1.bf16.msra.mxu0 %v4449_v13  ;;  %2262 = vmatpush1.bf16.msra.mxu1 %v4452_v14  ;;  %v4526_v13 = vld [vmem:[#allocation8 + $0x6ec] ss:$16 sps:$4 sm:$0xff]   ;;  %v4521_v14 = vld [vmem:[#allocation8 + $0x6e0] ss:$16 sps:$4 sm:$0xff]  }
 0x1c4   :  { %2099 = vmatprep.subr.bf16.mxu0 %v4457_v15  ;;  %2263 = vmatprep.subr.bf16.mxu1 %v4460_v16  ;;  %v4524_v15 = vld [vmem:[#allocation8 + $0x6e8] ss:$16 sps:$4 sm:$0xff]   ;;  %v4529_v16 = vld [vmem:[#allocation8 + $0x704] ss:$16 sps:$4 sm:$0xff]  }
 0x1c7   :  { %2100 = vmatpush1.bf16.msra.mxu0 %v4455_v18  ;;  %2264 = vmatpush1.bf16.msra.mxu1 %v4458_v19  ;;  %v4527_v18 = vld [vmem:[#allocation8 + $0x700] ss:$16 sps:$4 sm:$0xff]   ;;  %v4530_v19 = vld [vmem:[#allocation8 + $0x708] ss:$16 sps:$4 sm:$0xff]  }
 0x1c8   :  { %2101 = vmatprep.subr.bf16.mxu0 %v4463_v50  ;;  %2265 = vmatprep.subr.bf16.mxu1 %v4466_v20  ;;  %v4535_v50 = vld [vmem:[#allocation8 + $0x724] ss:$16 sps:$4 sm:$0xff]   ;;  %v4538_v20 = vld [vmem:[#allocation8 + $0x72c] ss:$16 sps:$4 sm:$0xff]  }
 0x1cb   :  { %2102 = vmatpush1.bf16.msra.mxu0 %v4461_v23  ;;  %2266 = vmatpush1.bf16.msra.mxu1 %v4464_v24  ;;  %v4541_v23 = vld [vmem:[#allocation8 + $0x744] ss:$16 sps:$4 sm:$0xff]   ;;  %v4544_v24 = vld [vmem:[#allocation8 + $0x74c] ss:$16 sps:$4 sm:$0xff]  }
 0x1cc   :  { %2103 = vmatprep.subr.bf16.mxu0 %v4469_v25  ;;  %2267 = vmatprep.subr.bf16.mxu1 %v4472_v3  ;;  %v4539_v25 = vld [vmem:[#allocation8 + $0x740] ss:$16 sps:$4 sm:$0xff]   ;;  %v4542_v3 = vld [vmem:[#allocation8 + $0x748] ss:$16 sps:$4 sm:$0xff]  }
 0x1cf   :  { %2104 = vmatpush1.bf16.msra.mxu0 %v4467_v28  ;;  %2268 = vmatpush1.bf16.msra.mxu1 %v4470_v29  ;;  %v4545_v28 = vld [vmem:[#allocation8 + $0x760] ss:$16 sps:$4 sm:$0xff]   ;;  %v4548_v29 = vld [vmem:[#allocation8 + $0x768] ss:$16 sps:$4 sm:$0xff]  }
 0x1d0   :  { %2105 = vmatprep.subr.bf16.mxu0 %v4475_v30  ;;  %2269 = vmatprep.subr.bf16.mxu1 %v4478_v31  ;;  %v4553_v30 = vld [vmem:[#allocation8 + $0x784] ss:$16 sps:$4 sm:$0xff]   ;;  %v4556_v31 = vld [vmem:[#allocation8 + $0x78c] ss:$16 sps:$4 sm:$0xff]  }
 0x1d3   :  { %2106 = vmatpush1.bf16.msra.mxu0 %v4473_v34  ;;  %2270 = vmatpush1.bf16.msra.mxu1 %v4476_v35  ;;  %v157_v34 = vsub.s32 6, %v5118_v37  ;;  %v4559_v35 = vld [vmem:[#allocation8 + $0x7a4] ss:$16 sps:$4 sm:$0xff]  }
 0x1d4   :  { %2116 = vmatprep.subr.bf16.mxu0 %v4481_v36  ;;  %2280 = vmatprep.subr.bf16.mxu1 %v4484_v42  ;;  %v4562_v36 = vld [vmem:[#allocation8 + $0x7ac] ss:$16 sps:$4 sm:$0xff]   ;;  %v4557_v42 = vld [vmem:[#allocation8 + $0x7a0] ss:$16 sps:$4 sm:$0xff]   ;;  %v4571_v37 = vld [vmem:[#allocation8 + $0x7e4] ss:$16 sps:$4 sm:$0xff]  }
 0x1d6   :  { %2108 = vmatmul.mubr.bf16.vlgmr.msra.gmra.mrb[8].mxu0 %v431_v43  ;;  %2272 = vmatmul.mubr.bf16.vlgmr.msra.gmra.mrb[8].mxu1 %v431_v43  ;;  %v158_v43 = vrot.slane %v5123_v39, %v157_v34  ;;  %v4577_v39 = vld [vmem:[#allocation10 + $0x4] ss:$16 sps:$4 sm:$0xff]   ;;  %v4638_v34 = vld [vmem:[#allocation10 + $0x148] ss:$16 sps:$4 sm:$0xff]  }
 0x1d7   :  { %2117 = vmatpush1.bf16.msra.mxu0 %v4479_v44  ;;  %2281 = vmatpush1.bf16.msra.mxu1 %v4482_v45  ;;  %v4565_v44 = vld [vmem:[#allocation8 + $0x7c4] ss:$16 sps:$4 sm:$0xff]   ;;  %v4568_v45 = vld [vmem:[#allocation8 + $0x7cc] ss:$16 sps:$4 sm:$0xff]  }
 0x1d8   :  { %2118 = vmatprep.subr.bf16.mxu0 %v4487_v46  ;;  %2282 = vmatprep.subr.bf16.mxu1 %v4490_v47  ;;  %v4563_v46 = vld [vmem:[#allocation8 + $0x7c0] ss:$16 sps:$4 sm:$0xff]   ;;  %v4566_v47 = vld [vmem:[#allocation8 + $0x7c8] ss:$16 sps:$4 sm:$0xff]  }
 0x1d9   :  { %2148 = vmatprep.mubr.bf16.mxu0 %v434_v6  ;;  %2312 = vmatprep.mubr.bf16.mxu1 %v434_v6  ;;  %v413_v6 = vadd.f32 %v5149_v1, %v158_v43  ;;  %v4583_v1 = vld [vmem:[#allocation10 + $0x24] ss:$16 sps:$4 sm:$0xff]  }
 0x1da   :  { %v4649_v43 = vld [vmem:[#allocation10 + $0x184] ss:$16 sps:$4 sm:$0xff]  }
 0x1db   :  { %2119 = vmatpush1.bf16.msra.mxu0 %v4485_v48  ;;  %2283 = vmatpush1.bf16.msra.mxu1 %v4488_v49  ;;  %v4574_v48 = vld [vmem:[#allocation8 + $0x7ec] ss:$16 sps:$4 sm:$0xff]   ;;  %v4569_v49 = vld [vmem:[#allocation8 + $0x7e0] ss:$16 sps:$4 sm:$0xff]  }
 0x1dc   :  { %2120 = vmatprep.subr.bf16.mxu0 %v4493_v51  ;;  %2284 = vmatprep.subr.bf16.mxu1 %v4496_v52  ;;  %v4572_v51 = vld [vmem:[#allocation8 + $0x7e8] ss:$16 sps:$4 sm:$0xff]   ;;  %v425_v52 = vmax.f32 %v413_v6, 0.0  ;;  %v4658_v6 = vld [vmem:[#allocation10 + $0x1ac] ss:$16 sps:$4 sm:$0xff]  }
 0x1df   :  { %2121 = vmatpush1.bf16.msra.mxu0 %v4491_v53  ;;  %2285 = vmatpush1.bf16.msra.mxu1 %v4494_v54  ;;  %v4580_v53 = vld [vmem:[#allocation10 + $0xc] ss:$16 sps:$4 sm:$0xff]   ;;  %v4575_v54 = vld [vmem:[#allocation10] ss:$16 sps:$4 sm:$0xff]  }
 0x1e0   :  { %2122 = vmatprep.subr.bf16.mxu0 %v4499_v55  ;;  %2286 = vmatprep.subr.bf16.mxu1 %v4502_v57  ;;  %v4578_v55 = vld [vmem:[#allocation10 + $0x8] ss:$16 sps:$4 sm:$0xff]   ;;  %v433_v57 = vpack.c.bf16 %v425_v52, %v425_v52  ;;  %v4659_v52 = vld [vmem:[#allocation10 + $0x1c0] ss:$16 sps:$4 sm:$0xff]  }
 0x1e3   :  { %2123 = vmatpush1.bf16.msra.mxu0 %v4497_v58  ;;  %2287 = vmatpush1.bf16.msra.mxu1 %v4500_v59  ;;  %v4586_v58 = vld [vmem:[#allocation10 + $0x2c] ss:$16 sps:$4 sm:$0xff]   ;;  %v4581_v59 = vld [vmem:[#allocation10 + $0x20] ss:$16 sps:$4 sm:$0xff]  }
 0x1e4   :  { %2124 = vmatprep.subr.bf16.mxu0 %v4505_v60  ;;  %2288 = vmatprep.subr.bf16.mxu1 %v4508_v61  ;;  %v4584_v60 = vld [vmem:[#allocation10 + $0x28] ss:$16 sps:$4 sm:$0xff]   ;;  %v4589_v61 = vld [vmem:[#allocation10 + $0x44] ss:$16 sps:$4 sm:$0xff]  }
 0x1e7   :  { %2125 = vmatpush1.bf16.msra.mxu0 %v4503_v62  ;;  %2289 = vmatpush1.bf16.msra.mxu1 %v4506_v63  ;;  %v4592_v62 = vld [vmem:[#allocation10 + $0x4c] ss:$16 sps:$4 sm:$0xff]   ;;  %v4587_v63 = vld [vmem:[#allocation10 + $0x40] ss:$16 sps:$4 sm:$0xff]  }
 0x1e8   :  { %2126 = vmatprep.subr.bf16.mxu0 %v4511_v0  ;;  %2290 = vmatprep.subr.bf16.mxu1 %v4514_v4  ;;  %v4590_v0 = vld [vmem:[#allocation10 + $0x48] ss:$16 sps:$4 sm:$0xff]   ;;  %v4595_v4 = vld [vmem:[#allocation10 + $0x64] ss:$16 sps:$4 sm:$0xff]  }
 0x1eb   :  { %2127 = vmatpush1.bf16.msra.mxu0 %v4509_v5  ;;  %2291 = vmatpush1.bf16.msra.mxu1 %v4512_v7  ;;  %v4598_v5 = vld [vmem:[#allocation10 + $0x6c] ss:$16 sps:$4 sm:$0xff]   ;;  %v4593_v7 = vld [vmem:[#allocation10 + $0x60] ss:$16 sps:$4 sm:$0xff]  }
 0x1ec   :  { %2128 = vmatprep.subr.bf16.mxu0 %v4517_v8  ;;  %2292 = vmatprep.subr.bf16.mxu1 %v4520_v9  ;;  %v4596_v8 = vld [vmem:[#allocation10 + $0x68] ss:$16 sps:$4 sm:$0xff]   ;;  %v4601_v9 = vld [vmem:[#allocation10 + $0x84] ss:$16 sps:$4 sm:$0xff]  }
 0x1ef   :  { %2129 = vmatpush1.bf16.msra.mxu0 %v4515_v10  ;;  %2293 = vmatpush1.bf16.msra.mxu1 %v4518_v11  ;;  %v4604_v10 = vld [vmem:[#allocation10 + $0x8c] ss:$16 sps:$4 sm:$0xff]   ;;  %v4599_v11 = vld [vmem:[#allocation10 + $0x80] ss:$16 sps:$4 sm:$0xff]  }
 0x1f0   :  { %2130 = vmatprep.subr.bf16.mxu0 %v4523_v12  ;;  %2294 = vmatprep.subr.bf16.mxu1 %v4526_v13  ;;  %v4602_v12 = vld [vmem:[#allocation10 + $0x88] ss:$16 sps:$4 sm:$0xff]   ;;  %v4607_v13 = vld [vmem:[#allocation10 + $0xa4] ss:$16 sps:$4 sm:$0xff]  }
 0x1f3   :  { %2131 = vmatpush1.bf16.msra.mxu0 %v4521_v14  ;;  %2295 = vmatpush1.bf16.msra.mxu1 %v4524_v15  ;;  %v4610_v14 = vld [vmem:[#allocation10 + $0xac] ss:$16 sps:$4 sm:$0xff]   ;;  %v4605_v15 = vld [vmem:[#allocation10 + $0xa0] ss:$16 sps:$4 sm:$0xff]  }
 0x1f4   :  { %2132 = vmatprep.subr.bf16.mxu0 %v4529_v16  ;;  %2296 = vmatprep.subr.bf16.mxu1 %v4532_v17  ;;  %v4608_v16 = vld [vmem:[#allocation10 + $0xa8] ss:$16 sps:$4 sm:$0xff]   ;;  %v4613_v17 = vld [vmem:[#allocation10 + $0xc4] ss:$16 sps:$4 sm:$0xff]  }
 0x1f7   :  { %2133 = vmatpush1.bf16.msra.mxu0 %v4527_v18  ;;  %2297 = vmatpush1.bf16.msra.mxu1 %v4530_v19  ;;  %v4616_v18 = vld [vmem:[#allocation10 + $0xcc] ss:$16 sps:$4 sm:$0xff]   ;;  %v4611_v19 = vld [vmem:[#allocation10 + $0xc0] ss:$16 sps:$4 sm:$0xff]  }
 0x1f8   :  { %2134 = vmatprep.subr.bf16.mxu0 %v4535_v50  ;;  %2298 = vmatprep.subr.bf16.mxu1 %v4538_v20  ;;  %v4614_v50 = vld [vmem:[#allocation10 + $0xc8] ss:$16 sps:$4 sm:$0xff]   ;;  %v4619_v20 = vld [vmem:[#allocation10 + $0xe4] ss:$16 sps:$4 sm:$0xff]  }
 0x1fb   :  { %2135 = vmatpush1.bf16.msra.mxu0 %v4533_v21  ;;  %2299 = vmatpush1.bf16.msra.mxu1 %v4536_v22  ;;  %v4622_v21 = vld [vmem:[#allocation10 + $0xec] ss:$16 sps:$4 sm:$0xff]   ;;  %v4617_v22 = vld [vmem:[#allocation10 + $0xe0] ss:$16 sps:$4 sm:$0xff]  }
 0x1fc   :  { %2136 = vmatprep.subr.bf16.mxu0 %v4541_v23  ;;  %2300 = vmatprep.subr.bf16.mxu1 %v4544_v24  ;;  %v4620_v23 = vld [vmem:[#allocation10 + $0xe8] ss:$16 sps:$4 sm:$0xff]   ;;  %v4625_v24 = vld [vmem:[#allocation10 + $0x104] ss:$16 sps:$4 sm:$0xff]  }
 0x1ff   :  { %2137 = vmatpush1.bf16.msra.mxu0 %v4539_v25  ;;  %2301 = vmatpush1.bf16.msra.mxu1 %v4542_v3  ;;  %v4628_v25 = vld [vmem:[#allocation10 + $0x10c] ss:$16 sps:$4 sm:$0xff]   ;;  %v4623_v3 = vld [vmem:[#allocation10 + $0x100] ss:$16 sps:$4 sm:$0xff]  }
 0x200   :  { %2138 = vmatprep.subr.bf16.mxu0 %v4547_v26  ;;  %2302 = vmatprep.subr.bf16.mxu1 %v4550_v27  ;;  %v4626_v26 = vld [vmem:[#allocation10 + $0x108] ss:$16 sps:$4 sm:$0xff]   ;;  %v4631_v27 = vld [vmem:[#allocation10 + $0x124] ss:$16 sps:$4 sm:$0xff]  }
 0x203   :  { %2139 = vmatpush1.bf16.msra.mxu0 %v4545_v28  ;;  %2303 = vmatpush1.bf16.msra.mxu1 %v4548_v29  ;;  %v4634_v28 = vld [vmem:[#allocation10 + $0x12c] ss:$16 sps:$4 sm:$0xff]   ;;  %v4629_v29 = vld [vmem:[#allocation10 + $0x120] ss:$16 sps:$4 sm:$0xff]  }
 0x204   :  { %2140 = vmatprep.subr.bf16.mxu0 %v4553_v30  ;;  %2304 = vmatprep.subr.bf16.mxu1 %v4556_v31  ;;  %v4632_v30 = vld [vmem:[#allocation10 + $0x128] ss:$16 sps:$4 sm:$0xff]   ;;  %v4637_v31 = vld [vmem:[#allocation10 + $0x144] ss:$16 sps:$4 sm:$0xff]  }
 0x207   :  { %2141 = vmatpush1.bf16.msra.mxu0 %v4551_v32  ;;  %2305 = vmatpush1.bf16.msra.mxu1 %v4554_v33  ;;  %v4640_v32 = vld [vmem:[#allocation10 + $0x14c] ss:$16 sps:$4 sm:$0xff]   ;;  %v4635_v33 = vld [vmem:[#allocation10 + $0x140] ss:$16 sps:$4 sm:$0xff]  }
 0x208   :  { %2142 = vmatprep.subr.bf16.mxu0 %v4559_v35  ;;  %2306 = vmatprep.subr.bf16.mxu1 %v4562_v36  ;;  %v4643_v35 = vld [vmem:[#allocation10 + $0x164] ss:$16 sps:$4 sm:$0xff]   ;;  %v4646_v36 = vld [vmem:[#allocation10 + $0x16c] ss:$16 sps:$4 sm:$0xff]  }
 0x20b   :  { %2143 = vmatpush1.bf16.msra.mxu0 %v4557_v42  ;;  %2307 = vmatpush1.bf16.msra.mxu1 %v4560_v2  ;;  %v4641_v42 = vld [vmem:[#allocation10 + $0x160] ss:$16 sps:$4 sm:$0xff]   ;;  %v4644_v2 = vld [vmem:[#allocation10 + $0x168] ss:$16 sps:$4 sm:$0xff]  }
 0x20c   :  { %2144 = vmatprep.subr.bf16.mxu0 %v4565_v44  ;;  %2308 = vmatprep.subr.bf16.mxu1 %v4568_v45  ;;  %v4652_v44 = vld [vmem:[#allocation10 + $0x18c] ss:$16 sps:$4 sm:$0xff]   ;;  %v4647_v45 = vld [vmem:[#allocation10 + $0x180] ss:$16 sps:$4 sm:$0xff]  }
 0x20f   :  { %2145 = vmatpush1.bf16.msra.mxu0 %v4563_v46  ;;  %2309 = vmatpush1.bf16.msra.mxu1 %v4566_v47  ;;  %v4650_v46 = vld [vmem:[#allocation10 + $0x188] ss:$16 sps:$4 sm:$0xff]   ;;  %v4655_v47 = vld [vmem:[#allocation10 + $0x1a4] ss:$16 sps:$4 sm:$0xff]  }
 0x210   :  { %2146 = vmatprep.subr.bf16.mxu0 %v4571_v37  ;;  %2310 = vmatprep.subr.bf16.mxu1 %v4574_v48  ;;  %v4653_v37 = vld [vmem:[#allocation10 + $0x1a0] ss:$16 sps:$4 sm:$0xff]   ;;  %v4656_v48 = vld [vmem:[#allocation10 + $0x1a8] ss:$16 sps:$4 sm:$0xff]  }
 0x213   :  { %2147 = vmatpush1.bf16.msra.mxu0 %v4569_v49  ;;  %2311 = vmatpush1.bf16.msra.mxu1 %v4572_v51  ;;  %v4661_v49 = vld [vmem:[#allocation10 + $0x1c4] ss:$16 sps:$4 sm:$0xff]   ;;  %v4664_v51 = vld [vmem:[#allocation10 + $0x1cc] ss:$16 sps:$4 sm:$0xff]  }
 0x214   :  { %3119 = vmatprep.subr.bf16.mxu0 %v4577_v39  ;;  %3201 = vmatprep.subr.bf16.mxu1 %v4580_v53  ;;  %v4662_v39 = vld [vmem:[#allocation10 + $0x1c8] ss:$16 sps:$4 sm:$0xff]   ;;  %v4667_v53 = vld [vmem:[#allocation10 + $0x1e4] ss:$16 sps:$4 sm:$0xff]  }
 0x216   :  { %2149 = vmatmul.mubr.bf16.vlgmr.msra.gmra.mrb[8].mxu0 %v433_v57  ;;  %2313 = vmatmul.mubr.bf16.vlgmr.msra.gmra.mrb[8].mxu1 %v433_v57  ;;  %v4668_v57 = vld [vmem:[#allocation10 + $0x1e8] ss:$16 sps:$4 sm:$0xff]  }
 0x217   :  { %3120 = vmatpush1.bf16.msra.mxu0 %v4575_v54  ;;  %3202 = vmatpush1.bf16.msra.mxu1 %v4578_v55  ;;  %v4670_v54 = vld [vmem:[#allocation10 + $0x1ec] ss:$16 sps:$4 sm:$0xff]   ;;  %v4665_v55 = vld [vmem:[#allocation10 + $0x1e0] ss:$16 sps:$4 sm:$0xff]  }
 0x218   :  { %3121 = vmatprep.subr.bf16.mxu0 %v4583_v1  ;;  %3203 = vmatprep.subr.bf16.mxu1 %v4586_v58  ;;  %v4673_v1 = vld [vmem:[#allocation10 + $0x204] ss:$16 sps:$4 sm:$0xff]   ;;  %v4676_v58 = vld [vmem:[#allocation10 + $0x20c] ss:$16 sps:$4 sm:$0xff]  }
 0x21b   :  { %3122 = vmatpush1.bf16.msra.mxu0 %v4581_v59  ;;  %3204 = vmatpush1.bf16.msra.mxu1 %v4584_v60  ;;  %v5168_v59 = vld [vmem:[%s5207_s4] sm:$0xf] }
 0x21c   :  { %3123 = vmatprep.subr.bf16.mxu0 %v4589_v61  ;;  %3205 = vmatprep.subr.bf16.mxu1 %v4592_v62  ;;  %v696_v60 = vrot.slane %v5168_v59, %v5121_v38  ;;  %v700_v61 = vrot.slane %v5168_v59, %v5126_v40  ;;  %v708_v62 = vrot.slane %v5168_v59, %v5129_v41 }
 0x21f   :  { %3124 = vmatpush1.bf16.msra.mxu0 %v4587_v63  ;;  %3206 = vmatpush1.bf16.msra.mxu1 %v4590_v0 }
 0x220   :  { %3125 = vmatprep.subr.bf16.mxu0 %v4595_v4  ;;  %3207 = vmatprep.subr.bf16.mxu1 %v4598_v5 }
 0x223   :  { %3126 = vmatpush1.bf16.msra.mxu0 %v4593_v7  ;;  %3208 = vmatpush1.bf16.msra.mxu1 %v4596_v8 }
 0x224   :  { %3127 = vmatprep.subr.bf16.mxu0 %v4601_v9  ;;  %3209 = vmatprep.subr.bf16.mxu1 %v4604_v10 }
 0x227   :  { %3128 = vmatpush1.bf16.msra.mxu0 %v4599_v11  ;;  %3210 = vmatpush1.bf16.msra.mxu1 %v4602_v12 }
 0x228   :  { %3129 = vmatprep.subr.bf16.mxu0 %v4607_v13  ;;  %3211 = vmatprep.subr.bf16.mxu1 %v4610_v14 }
 0x22b   :  { %3130 = vmatpush1.bf16.msra.mxu0 %v4605_v15  ;;  %3212 = vmatpush1.bf16.msra.mxu1 %v4608_v16 }
 0x22c   :  { %3131 = vmatprep.subr.bf16.mxu0 %v4613_v17  ;;  %3213 = vmatprep.subr.bf16.mxu1 %v4616_v18  ;;  %v4671_v18 = vld [vmem:[#allocation10 + $0x200] ss:$16 sps:$4 sm:$0xff]  }
 0x22f   :  { %3132 = vmatpush1.bf16.msra.mxu0 %v4611_v19  ;;  %3214 = vmatpush1.bf16.msra.mxu1 %v4614_v50  ;;  %v4674_v19 = vld [vmem:[#allocation10 + $0x208] ss:$16 sps:$4 sm:$0xff]  }
 0x230   :  { %3133 = vmatprep.subr.bf16.mxu0 %v4619_v20  ;;  %3215 = vmatprep.subr.bf16.mxu1 %v4622_v21  ;;  %v4679_v20 = vld [vmem:[#allocation10 + $0x224] ss:$16 sps:$4 sm:$0xff]   ;;  %v4682_v21 = vld [vmem:[#allocation10 + $0x22c] ss:$16 sps:$4 sm:$0xff]  }
 0x233   :  { %3134 = vmatpush1.bf16.msra.mxu0 %v4617_v22  ;;  %3216 = vmatpush1.bf16.msra.mxu1 %v4620_v23  ;;  %v4677_v23 = vld [vmem:[#allocation10 + $0x220] ss:$16 sps:$4 sm:$0xff]  }
 0x234   :  { %3135 = vmatprep.subr.bf16.mxu0 %v4625_v24  ;;  %3217 = vmatprep.subr.bf16.mxu1 %v4628_v25  ;;  %v4680_v24 = vld [vmem:[#allocation10 + $0x228] ss:$16 sps:$4 sm:$0xff]   ;;  %v4685_v25 = vld [vmem:[#allocation10 + $0x244] ss:$16 sps:$4 sm:$0xff]  }
 0x237   :  { %3136 = vmatpush1.bf16.msra.mxu0 %v4623_v3  ;;  %3218 = vmatpush1.bf16.msra.mxu1 %v4626_v26  ;;  %v4688_v3 = vld [vmem:[#allocation10 + $0x24c] ss:$16 sps:$4 sm:$0xff]   ;;  %v4683_v26 = vld [vmem:[#allocation10 + $0x240] ss:$16 sps:$4 sm:$0xff]  }
 0x238   :  { %3137 = vmatprep.subr.bf16.mxu0 %v4631_v27  ;;  %3219 = vmatprep.subr.bf16.mxu1 %v4634_v28  ;;  %v4686_v27 = vld [vmem:[#allocation10 + $0x248] ss:$16 sps:$4 sm:$0xff]   ;;  %v4691_v28 = vld [vmem:[#allocation10 + $0x264] ss:$16 sps:$4 sm:$0xff]  }
 0x23b   :  { %3138 = vmatpush1.bf16.msra.mxu0 %v4629_v29  ;;  %3220 = vmatpush1.bf16.msra.mxu1 %v4632_v30  ;;  %v4694_v29 = vld [vmem:[#allocation10 + $0x26c] ss:$16 sps:$4 sm:$0xff]   ;;  %v4689_v30 = vld [vmem:[#allocation10 + $0x260] ss:$16 sps:$4 sm:$0xff]  }
 0x23c   :  { %3139 = vmatprep.subr.bf16.mxu0 %v4637_v31  ;;  %3221 = vmatprep.subr.bf16.mxu1 %v4640_v32  ;;  %v4692_v31 = vld [vmem:[#allocation10 + $0x268] ss:$16 sps:$4 sm:$0xff]   ;;  %v4697_v32 = vld [vmem:[#allocation10 + $0x284] ss:$16 sps:$4 sm:$0xff]  }
 0x23f   :  { %3140 = vmatpush1.bf16.msra.mxu0 %v4635_v33  ;;  %3222 = vmatpush1.bf16.msra.mxu1 %v4638_v34  ;;  %v4700_v33 = vld [vmem:[#allocation10 + $0x28c] ss:$16 sps:$4 sm:$0xff]   ;;  %v4695_v34 = vld [vmem:[#allocation10 + $0x280] ss:$16 sps:$4 sm:$0xff]  }
 0x240   :  { %3141 = vmatprep.subr.bf16.mxu0 %v4643_v35  ;;  %3223 = vmatprep.subr.bf16.mxu1 %v4646_v36  ;;  %v4698_v35 = vld [vmem:[#allocation10 + $0x288] ss:$16 sps:$4 sm:$0xff]   ;;  %v4703_v36 = vld [vmem:[#allocation10 + $0x2a4] ss:$16 sps:$4 sm:$0xff]  }
 0x243   :  { %3142 = vmatpush1.bf16.msra.mxu0 %v4641_v42  ;;  %3224 = vmatpush1.bf16.msra.mxu1 %v4644_v2  ;;  %v4706_v42 = vld [vmem:[#allocation10 + $0x2ac] ss:$16 sps:$4 sm:$0xff]   ;;  %v4701_v2 = vld [vmem:[#allocation10 + $0x2a0] ss:$16 sps:$4 sm:$0xff]  }
 0x244   :  { %3143 = vmatprep.subr.bf16.mxu0 %v4649_v43  ;;  %3225 = vmatprep.subr.bf16.mxu1 %v4652_v44  ;;  %v4704_v43 = vld [vmem:[#allocation10 + $0x2a8] ss:$16 sps:$4 sm:$0xff]   ;;  %v4709_v44 = vld [vmem:[#allocation10 + $0x2c4] ss:$16 sps:$4 sm:$0xff]  }
 0x247   :  { %3144 = vmatpush1.bf16.msra.mxu0 %v4647_v45  ;;  %3226 = vmatpush1.bf16.msra.mxu1 %v4650_v46  ;;  %v4712_v45 = vld [vmem:[#allocation10 + $0x2cc] ss:$16 sps:$4 sm:$0xff]   ;;  %v4707_v46 = vld [vmem:[#allocation10 + $0x2c0] ss:$16 sps:$4 sm:$0xff]  }
 0x248   :  { %3145 = vmatprep.subr.bf16.mxu0 %v4655_v47  ;;  %3227 = vmatprep.subr.bf16.mxu1 %v4658_v6  ;;  %v4710_v47 = vld [vmem:[#allocation10 + $0x2c8] ss:$16 sps:$4 sm:$0xff]   ;;  %v4715_v6 = vld [vmem:[#allocation10 + $0x2e4] ss:$16 sps:$4 sm:$0xff]  }
 0x24b   :  { %3146 = vmatpush1.bf16.msra.mxu0 %v4653_v37  ;;  %3228 = vmatpush1.bf16.msra.mxu1 %v4656_v48  ;;  %v4718_v37 = vld [vmem:[#allocation10 + $0x2ec] ss:$16 sps:$4 sm:$0xff]   ;;  %v4713_v48 = vld [vmem:[#allocation10 + $0x2e0] ss:$16 sps:$4 sm:$0xff]  }
 0x24c   :  { %3147 = vmatprep.subr.bf16.mxu0 %v4661_v49  ;;  %3229 = vmatprep.subr.bf16.mxu1 %v4664_v51  ;;  %v4716_v49 = vld [vmem:[#allocation10 + $0x2e8] ss:$16 sps:$4 sm:$0xff]   ;;  %v4721_v51 = vld [vmem:[#allocation10 + $0x304] ss:$16 sps:$4 sm:$0xff]  }
 0x24f   :  { %3148 = vmatpush1.bf16.msra.mxu0 %v4659_v52  ;;  %3230 = vmatpush1.bf16.msra.mxu1 %v4662_v39  ;;  %v4724_v52 = vld [vmem:[#allocation10 + $0x30c] ss:$16 sps:$4 sm:$0xff]   ;;  %v4719_v39 = vld [vmem:[#allocation10 + $0x300] ss:$16 sps:$4 sm:$0xff]  }
 0x250   :  { %3149 = vmatprep.subr.bf16.mxu0 %v4667_v53  ;;  %3231 = vmatprep.subr.bf16.mxu1 %v4670_v54  ;;  %v4722_v53 = vld [vmem:[#allocation10 + $0x308] ss:$16 sps:$4 sm:$0xff]   ;;  %v4727_v54 = vld [vmem:[#allocation10 + $0x324] ss:$16 sps:$4 sm:$0xff]  }
 0x253   :  { %3150 = vmatpush1.bf16.msra.mxu0 %v4665_v55  ;;  %3232 = vmatpush1.bf16.msra.mxu1 %v4668_v57  ;;  %v4730_v55 = vld [vmem:[#allocation10 + $0x32c] ss:$16 sps:$4 sm:$0xff]   ;;  %v4725_v57 = vld [vmem:[#allocation10 + $0x320] ss:$16 sps:$4 sm:$0xff]  }
 0x254   :  { %3160 = vmatprep.subr.bf16.mxu0 %v4673_v1  ;;  %3242 = vmatprep.subr.bf16.mxu1 %v4676_v58  ;;  %v4728_v1 = vld [vmem:[#allocation10 + $0x328] ss:$16 sps:$4 sm:$0xff]   ;;  %v4733_v58 = vld [vmem:[#allocation10 + $0x344] ss:$16 sps:$4 sm:$0xff]  }
 0x2e9   :  { %v2150_v63 = vpop.f32.mrb[8].mxu0  ;;  %v5176_v0 = vpop.f32.mrb[8].mxu1 }
 0x2ea   :  { %v4137_v4 = vadd.f32 %v2150_v63, %v696_v60  ;;  %v2152_v5 = vpop.f32.mrb[9].mxu0  ;;  %v2316_v7 = vpop.f32.mrb[9].mxu1  ;;  %v4736_v60 = vld [vmem:[#allocation10 + $0x34c] ss:$16 sps:$4 sm:$0xff]   ;;  %v4739_v63 = vld [vmem:[#allocation10 + $0x364] ss:$16 sps:$4 sm:$0xff]  }
 0x2eb   :  { %v4138_v8 = vadd.f32 %v2152_v5, %v700_v61  ;;  %v4140_v9 = vadd.f32 %v2316_v7, %v708_v62  ;;  %v2154_v10 = vpop.f32.mrb[10].mxu0  ;;  %v2318_v11 = vpop.f32.mrb[10].mxu1  ;;  %v4731_v61 = vld [vmem:[#allocation10 + $0x340] ss:$16 sps:$4 sm:$0xff]   ;;  %v4734_v62 = vld [vmem:[#allocation10 + $0x348] ss:$16 sps:$4 sm:$0xff]  }
 0x2ec   :  { %v2321_v12 = vmax.f32 %v4137_v4, 0.0  ;;  %v2155_v13 = vpop.f32.mrb[11].mxu0  ;;  %v2319_v14 = vpop.f32.mrb[11].mxu1  ;;  %v4742_v4 = vld [vmem:[#allocation10 + $0x36c] ss:$16 sps:$4 sm:$0xff]  }
 0x2ed   :  { %v2322_v15 = vmax.f32 %v4138_v8, 0.0  ;;  %v2324_v16 = vmax.f32 %v4140_v9, 0.0  ;;  %v4737_v5 = vld [vmem:[#allocation10 + $0x360] ss:$16 sps:$4 sm:$0xff]   ;;  %v4740_v7 = vld [vmem:[#allocation10 + $0x368] ss:$16 sps:$4 sm:$0xff]  }
 0x2ee   :  { %v2325_v50 = vpack.c.bf16 %v2321_v12, %v2321_v12  ;;  %v4745_v8 = vld [vmem:[#allocation10 + $0x384] ss:$16 sps:$4 sm:$0xff]   ;;  %v4748_v9 = vld [vmem:[#allocation10 + $0x38c] ss:$16 sps:$4 sm:$0xff]   ;;  %v4743_v10 = vld [vmem:[#allocation10 + $0x380] ss:$16 sps:$4 sm:$0xff]  }
 0x2ef   :  { %v2326_v17 = vpack.c.bf16 %v2322_v15, %v2322_v15  ;;  %v2328_v22 = vpack.c.bf16 %v2324_v16, %v2324_v16  ;;  %v4746_v11 = vld [vmem:[#allocation10 + $0x388] ss:$16 sps:$4 sm:$0xff]   ;;  %v4751_v12 = vld [vmem:[#allocation10 + $0x3a4] ss:$16 sps:$4 sm:$0xff]   ;;  %v4754_v13 = vld [vmem:[#allocation10 + $0x3ac] ss:$16 sps:$4 sm:$0xff]   ;;  %v704_v16 = vrot.slane %v5168_v59, %v5144_v56 }
 0x2f0   :  { %v4749_v14 = vld [vmem:[#allocation10 + $0x3a0] ss:$16 sps:$4 sm:$0xff]   ;;  %v4752_v15 = vld [vmem:[#allocation10 + $0x3a8] ss:$16 sps:$4 sm:$0xff]  }
 0x2f1   :  { %3151 = vmatprep.mubr.bf16.mxu0 %v2326_v17  ;;  %3233 = vmatprep.mubr.bf16.mxu1 %v2326_v17  ;;  %v4757_v17 = vld [vmem:[#allocation10 + $0x3c4] ss:$16 sps:$4 sm:$0xff]  }
 0x2f2   :  { %3152 = vmatmul.mubr.bf16.vlgmr.msra.gmra.mrb[12].mxu0 %v2325_v50  ;;  %3234 = vmatmul.mubr.bf16.vlgmr.msra.gmra.mrb[12].mxu1 %v2325_v50  ;;  %v4758_v50 = vld [vmem:[#allocation10 + $0x3c8] ss:$16 sps:$4 sm:$0xff]   ;;  %v4767_v59 = vld [vmem:[#allocation11 + $0x40] sm:$0xff]  }
 0x2f3   :  { %3161 = vmatpush1.bf16.msra.mxu0 %v4671_v18  ;;  %3243 = vmatpush1.bf16.msra.mxu1 %v4674_v19  ;;  %v4760_v18 = vld [vmem:[#allocation10 + $0x3cc] ss:$16 sps:$4 sm:$0xff]   ;;  %v4755_v19 = vld [vmem:[#allocation10 + $0x3c0] ss:$16 sps:$4 sm:$0xff]  }
 0x2f4   :  { %3192 = vmatprep.mubr.bf16.mxu0 %v2328_v22  ;;  %3274 = vmatprep.mubr.bf16.mxu1 %v2328_v22  ;;  %v4766_v22 = vld [vmem:[#allocation10 + $0x3ec] ss:$16 sps:$4 sm:$0xff]  }
 0x2f5   :  { %3162 = vmatprep.subr.bf16.mxu0 %v4679_v20  ;;  %3244 = vmatprep.subr.bf16.mxu1 %v4682_v21  ;;  %v4139_v20 = vadd.f32 %v5176_v0, %v704_v16  ;;  %v4763_v21 = vld [vmem:[#allocation10 + $0x3e4] ss:$16 sps:$4 sm:$0xff]   ;;  %v4771_v0 = vld [vmem:[#allocation11 + $0x48] sm:$0xff]  }
 0x2f7   :  { %3163 = vmatpush1.bf16.msra.mxu0 %v4677_v23  ;;  %3245 = vmatpush1.bf16.msra.mxu1 %v4680_v24  ;;  %v4761_v23 = vld [vmem:[#allocation10 + $0x3e0] ss:$16 sps:$4 sm:$0xff]   ;;  %v4764_v24 = vld [vmem:[#allocation10 + $0x3e8] ss:$16 sps:$4 sm:$0xff]  }
 0x2f8   :  { %3164 = vmatprep.subr.bf16.mxu0 %v4685_v25  ;;  %3246 = vmatprep.subr.bf16.mxu1 %v4688_v3  ;;  %v2323_v25 = vmax.f32 %v4139_v20, 0.0  ;;  %v4768_v3 = vld [vmem:[#allocation11 + $0xc0] sm:$0xff]  }
 0x2fb   :  { %3165 = vmatpush1.bf16.msra.mxu0 %v4683_v26  ;;  %3247 = vmatpush1.bf16.msra.mxu1 %v4686_v27  ;;  %v4769_v26 = vld [vmem:[#allocation11] sm:$0xff]  }
 0x2fc   :  { %3166 = vmatprep.subr.bf16.mxu0 %v4691_v28  ;;  %3248 = vmatprep.subr.bf16.mxu1 %v4694_v29  ;;  %v4770_v27 = vld [vmem:[#allocation11 + $0x80] sm:$0xff]   ;;  %v2327_v28 = vpack.c.bf16 %v2323_v25, %v2323_v25  ;;  %v4772_v29 = vld [vmem:[#allocation11 + $0xc8] sm:$0xff]  }
 0x2ff   :  { %3167 = vmatpush1.bf16.msra.mxu0 %v4689_v30  ;;  %3249 = vmatpush1.bf16.msra.mxu1 %v4692_v31  ;;  %v4773_v30 = vld [vmem:[#allocation11 + $0x8] sm:$0xff]  }
 0x300   :  { %3168 = vmatprep.subr.bf16.mxu0 %v4697_v32  ;;  %3250 = vmatprep.subr.bf16.mxu1 %v4700_v33  ;;  %v4774_v31 = vld [vmem:[#allocation11 + $0x88] sm:$0xff]   ;;  %v4775_v32 = vld [vmem:[#allocation11 + $0x50] sm:$0xff]  }
 0x301   :  { %v4776_v33 = vld [vmem:[#allocation11 + $0xd0] sm:$0xff]  }
 0x303   :  { %3169 = vmatpush1.bf16.msra.mxu0 %v4695_v34  ;;  %3251 = vmatpush1.bf16.msra.mxu1 %v4698_v35  ;;  %v4777_v34 = vld [vmem:[#allocation11 + $0x10] sm:$0xff]  }
 0x304   :  { %3170 = vmatprep.subr.bf16.mxu0 %v4703_v36  ;;  %3252 = vmatprep.subr.bf16.mxu1 %v4706_v42  ;;  %v4778_v35 = vld [vmem:[#allocation11 + $0x90] sm:$0xff]   ;;  %v4779_v36 = vld [vmem:[#allocation11 + $0x58] sm:$0xff]  }
 0x305   :  { %v4780_v42 = vld [vmem:[#allocation11 + $0xd8] sm:$0xff]  }
 0x307   :  { %3171 = vmatpush1.bf16.msra.mxu0 %v4701_v2  ;;  %3253 = vmatpush1.bf16.msra.mxu1 %v4704_v43  ;;  %v4781_v2 = vld [vmem:[#allocation11 + $0x18] sm:$0xff]  }
 0x308   :  { %3172 = vmatprep.subr.bf16.mxu0 %v4709_v44  ;;  %3254 = vmatprep.subr.bf16.mxu1 %v4712_v45  ;;  %v4782_v43 = vld [vmem:[#allocation11 + $0x98] sm:$0xff]   ;;  %v4783_v44 = vld [vmem:[#allocation11 + $0x60] sm:$0xff]  }
 0x309   :  { %v4784_v45 = vld [vmem:[#allocation11 + $0xe0] sm:$0xff]  }
 0x30b   :  { %3173 = vmatpush1.bf16.msra.mxu0 %v4707_v46  ;;  %3255 = vmatpush1.bf16.msra.mxu1 %v4710_v47  ;;  %v4785_v46 = vld [vmem:[#allocation11 + $0x20] sm:$0xff]  }
 0x30c   :  { %3174 = vmatprep.subr.bf16.mxu0 %v4715_v6  ;;  %3256 = vmatprep.subr.bf16.mxu1 %v4718_v37  ;;  %v4786_v47 = vld [vmem:[#allocation11 + $0xa0] sm:$0xff]   ;;  %v4787_v6 = vld [vmem:[#allocation11 + $0x68] sm:$0xff]  }
 0x30d   :  { %v4788_v37 = vld [vmem:[#allocation11 + $0xe8] sm:$0xff]  }
 0x30f   :  { %3175 = vmatpush1.bf16.msra.mxu0 %v4713_v48  ;;  %3257 = vmatpush1.bf16.msra.mxu1 %v4716_v49  ;;  %v4789_v48 = vld [vmem:[#allocation11 + $0x28] sm:$0xff]  }
 0x310   :  { %3176 = vmatprep.subr.bf16.mxu0 %v4721_v51  ;;  %3258 = vmatprep.subr.bf16.mxu1 %v4724_v52  ;;  %v4790_v49 = vld [vmem:[#allocation11 + $0xa8] sm:$0xff]   ;;  %v4791_v51 = vld [vmem:[#allocation11 + $0x70] sm:$0xff]  }
 0x311   :  { %v4792_v52 = vld [vmem:[#allocation11 + $0xf0] sm:$0xff]  }
 0x313   :  { %3177 = vmatpush1.bf16.msra.mxu0 %v4719_v39  ;;  %3259 = vmatpush1.bf16.msra.mxu1 %v4722_v53  ;;  %v4793_v39 = vld [vmem:[#allocation11 + $0x30] sm:$0xff]  }
 0x314   :  { %3178 = vmatprep.subr.bf16.mxu0 %v4727_v54  ;;  %3260 = vmatprep.subr.bf16.mxu1 %v4730_v55  ;;  %v4794_v53 = vld [vmem:[#allocation11 + $0xb0] sm:$0xff]   ;;  %v4795_v54 = vld [vmem:[#allocation11 + $0x78] sm:$0xff]  }
 0x315   :  { %v4796_v55 = vld [vmem:[#allocation11 + $0xf8] sm:$0xff]  }
 0x317   :  { %3179 = vmatpush1.bf16.msra.mxu0 %v4725_v57  ;;  %3261 = vmatpush1.bf16.msra.mxu1 %v4728_v1  ;;  %v4797_v57 = vld [vmem:[#allocation11 + $0x38] sm:$0xff]  }
 0x318   :  { %3180 = vmatprep.subr.bf16.mxu0 %v4733_v58  ;;  %3262 = vmatprep.subr.bf16.mxu1 %v4736_v60  ;;  %v4798_v1 = vld [vmem:[#allocation11 + $0xb8] sm:$0xff]   ;;  %v2457_v58 = vld [vmem:[%s5209_s6] sm:$0xf] }
 0x319   :  { %v2462_v60 = vrot.slane %v2457_v58, %v5121_v38 }
 0x31b   :  { %3181 = vmatpush1.bf16.msra.mxu0 %v4731_v61  ;;  %3263 = vmatpush1.bf16.msra.mxu1 %v4734_v62  ;;  %v2470_v61 = vrot.slane %v2457_v58, %v5144_v56  ;;  %v2466_v62 = vrot.slane %v2457_v58, %v5126_v40 }
 0x31c   :  { %3182 = vmatprep.subr.bf16.mxu0 %v4739_v63  ;;  %3264 = vmatprep.subr.bf16.mxu1 %v4742_v4  ;;  %v2474_v63 = vrot.slane %v2457_v58, %v5129_v41 }
 0x31f   :  { %3183 = vmatpush1.bf16.msra.mxu0 %v4737_v5  ;;  %3265 = vmatpush1.bf16.msra.mxu1 %v4740_v7 }
 0x320   :  { %3184 = vmatprep.subr.bf16.mxu0 %v4745_v8  ;;  %3266 = vmatprep.subr.bf16.mxu1 %v4748_v9 }
 0x323   :  { %3185 = vmatpush1.bf16.msra.mxu0 %v4743_v10  ;;  %3267 = vmatpush1.bf16.msra.mxu1 %v4746_v11 }
 0x324   :  { %3186 = vmatprep.subr.bf16.mxu0 %v4751_v12  ;;  %3268 = vmatprep.subr.bf16.mxu1 %v4754_v13 }
 0x327   :  { %3187 = vmatpush1.bf16.msra.mxu0 %v4749_v14  ;;  %3269 = vmatpush1.bf16.msra.mxu1 %v4752_v15 }
 0x328   :  { %3188 = vmatprep.subr.bf16.mxu0 %v4757_v17  ;;  %3270 = vmatprep.subr.bf16.mxu1 %v4760_v18 }
 0x32b   :  { %3189 = vmatpush1.bf16.msra.mxu0 %v4755_v19  ;;  %3271 = vmatpush1.bf16.msra.mxu1 %v4758_v50 }
 0x32c   :  { %3190 = vmatprep.subr.bf16.mxu0 %v4763_v21  ;;  %3272 = vmatprep.subr.bf16.mxu1 %v4766_v22  ;;  %v4060_v22 = vld [vmem:[%s5211_s8] ss:$0 sm:$0xff] }
 0x32f   :  { %3191 = vmatpush1.bf16.msra.mxu0 %v4761_v23  ;;  %3273 = vmatpush1.bf16.msra.mxu1 %v4764_v24 }
 0x330   :  { %4093 = vmatprep.subr.bf16.mxu0 %v4767_v59  ;;  %4115 = vmatprep.subr.bf16.mxu1 %v4768_v3 }
 0x332   :  { %3193 = vmatmul.mubr.bf16.vlgmr.msra.gmra.mrb[12].mxu0 %v2327_v28  ;;  %3275 = vmatmul.mubr.bf16.vlgmr.msra.gmra.mrb[12].mxu1 %v2327_v28 }
 0x333   :  { %4094 = vmatpush3.bf16.msra.mxu0 %v4769_v26  ;;  %4116 = vmatpush3.bf16.msra.mxu1 %v4770_v27 }
 0x334   :  { %4095 = vmatprep.subr.bf16.mxu0 %v4771_v0  ;;  %4117 = vmatprep.subr.bf16.mxu1 %v4772_v29 }
 0x337   :  { %4096 = vmatpush3.bf16.msra.mxu0 %v4773_v30  ;;  %4118 = vmatpush3.bf16.msra.mxu1 %v4774_v31 }
 0x338   :  { %4097 = vmatprep.subr.bf16.mxu0 %v4775_v32  ;;  %4119 = vmatprep.subr.bf16.mxu1 %v4776_v33 }
 0x33b   :  { %4098 = vmatpush3.bf16.msra.mxu0 %v4777_v34  ;;  %4120 = vmatpush3.bf16.msra.mxu1 %v4778_v35 }
 0x33c   :  { %4099 = vmatprep.subr.bf16.mxu0 %v4779_v36  ;;  %4121 = vmatprep.subr.bf16.mxu1 %v4780_v42 }
 0x33f   :  { %4100 = vmatpush3.bf16.msra.mxu0 %v4781_v2  ;;  %4122 = vmatpush3.bf16.msra.mxu1 %v4782_v43 }
 0x340   :  { %4101 = vmatprep.subr.bf16.mxu0 %v4783_v44  ;;  %4123 = vmatprep.subr.bf16.mxu1 %v4784_v45 }
 0x343   :  { %4102 = vmatpush3.bf16.msra.mxu0 %v4785_v46  ;;  %4124 = vmatpush3.bf16.msra.mxu1 %v4786_v47 }
 0x344   :  { %4103 = vmatprep.subr.bf16.mxu0 %v4787_v6  ;;  %4125 = vmatprep.subr.bf16.mxu1 %v4788_v37 }
 0x347   :  { %4104 = vmatpush3.bf16.msra.mxu0 %v4789_v48  ;;  %4126 = vmatpush3.bf16.msra.mxu1 %v4790_v49 }
 0x348   :  { %4105 = vmatprep.subr.bf16.mxu0 %v4791_v51  ;;  %4127 = vmatprep.subr.bf16.mxu1 %v4792_v52 }
 0x34b   :  { %4106 = vmatpush3.bf16.msra.mxu0 %v4793_v39  ;;  %4128 = vmatpush3.bf16.msra.mxu1 %v4794_v53 }
 0x34c   :  { %4107 = vmatprep.subr.bf16.mxu0 %v4795_v54  ;;  %4129 = vmatprep.subr.bf16.mxu1 %v4796_v55 }
 0x34f   :  { %4108 = vmatpush3.bf16.msra.mxu0 %v4797_v57  ;;  %4130 = vmatpush3.bf16.msra.mxu1 %v4798_v1 }
 0x405   :  { %v3194_v4 = vpop.f32.mrb[12].mxu0  ;;  %v3276_v5 = vpop.f32.mrb[12].mxu1 }
 0x406   :  { %v4141_v7 = vadd.f32 %v3194_v4, %v2462_v60  ;;  %v4143_v8 = vadd.f32 %v3276_v5, %v2470_v61  ;;  %v3196_v9 = vpop.f32.mrb[13].mxu0  ;;  %v3278_v10 = vpop.f32.mrb[13].mxu1 }
 0x407   :  { %v4142_v11 = vadd.f32 %v3196_v9, %v2466_v62  ;;  %v4144_v12 = vadd.f32 %v3278_v10, %v2474_v63  ;;  %v3198_v13 = vpop.f32.mrb[14].mxu0  ;;  %v3280_v14 = vpop.f32.mrb[14].mxu1 }
 0x408   :  { %v3283_v15 = vmax.f32 %v4141_v7, 0.0  ;;  %v3285_v16 = vmax.f32 %v4143_v8, 0.0  ;;  %v3199_v17 = vpop.f32.mrb[15].mxu0  ;;  %v3281_v38 = vpop.f32.mrb[15].mxu1 }
 0x409   :  { %v3284_v18 = vmax.f32 %v4142_v11, 0.0  ;;  %v3286_v56 = vmax.f32 %v4144_v12, 0.0 }
 0x40a   :  { %v3287_v50 = vpack.c.bf16 %v3283_v15, %v3283_v15  ;;  %v3289_v41 = vpack.c.bf16 %v3285_v16, %v3285_v16 }
 0x40b   :  { %v3288_v19 = vpack.c.bf16 %v3284_v18, %v3284_v18  ;;  %v3290_v40 = vpack.c.bf16 %v3286_v56, %v3286_v56 }
 0x40d   :  { %3586 = vmatprep.mubr.bf16.mxu0 %v3288_v19  ;;  %3626 = vmatprep.mubr.bf16.mxu1 %v3290_v40 }
 0x40e   :  { %3587 = vmatmul.mubr.bf16.vlgmr.msra.gmra.mrb[16].mxu0 %v3287_v50  ;;  %3627 = vmatmul.mubr.bf16.vlgmr.msra.gmra.mrb[16].mxu1 %v3289_v41 }
 0x4e1   :  { %v4109_v20 = vpop.f32.mrb[16].mxu0  ;;  %v4131_v21 = vpop.f32.mrb[16].mxu1 }
 0x4e2   :  { %v4110_v23 = vpop.f32.mrb[17].mxu0  ;;  %v4132_v24 = vpop.f32.mrb[17].mxu1 }
 0x4e3   :  { %v4111_v25 = vadd.f32 %v4110_v23, %v4109_v20  ;;  %v4133_v59 = vadd.f32 %v4132_v24, %v4131_v21  ;;  %v4112_v3 = vpop.f32.mrb[18].mxu0  ;;  %v4134_v26 = vpop.f32.mrb[18].mxu1 }
 0x4e4   :  { %v4113_v27 = vpop.f32.mrb[19].mxu0  ;;  %v4135_v28 = vpop.f32.mrb[19].mxu1 }
 0x4e5   :  { %v3589_v0 = vadd.f32 %v4111_v25, %v4060_v22 }
 0x4e7   :  { %v3629_v29 = vadd.f32 %v4133_v59, %v3589_v0 }
 0x4e9   :  { %4799 = vtanh.f32 %v3629_v29 }
 0x4f3   :  { %v4800_v30 = vpop.eup %4799 }
 0x4f4   :  { %v3635_v31 = vmul.f32 0.56, %v4800_v30 }
 0x4f6   :  { %v3636_v32 = vpack.c.bf16 %v3635_v31, %v3635_v31 }
 0x4f8   :  { %3637 = vst [vmem:[#allocation13] sm:$0xf] %v3636_v32 }
 0x4f9   :  { %4944 = shalt.err (!%p4941_p10)
}
 0x4fa   :  { %s4945_s26 = scalar_lea.hbm %s5212_s9, 64 }
 0x4fb   :  { %p4946_p11 = scmp.ne.s32.totalorder %s5212_s9, %s4945_s26  ;;  %p4949_p12 = scmp.lt.u32.totalorder %s4945_s26, %s5212_s9 }
 0x4fd   :  { %p4951_p13 = pnand %p4949_p12, %p4946_p11 }
 0x4ff   :  { %4954 = shalt.err (!%p4951_p13)
}
 0x500   :  { %3647 = dma.vmem_to_hbm [thread:$0]  %s3645_s22, 64, %s5212_s9, [#allocation4]  }
 0x501   :  { %4963 = dma.done.wait [#allocation4], 64  }
 0x502   :  { %4964 = vsyncadd [#allocation4], 4294967232 }
 0x503   :  { %3651 = vsyncpa [#allocation3], 1 }
 0x504   :  { %3652 = vsyncpa [#allocation6], 1 }
 0x505   :  { %3653 = vsyncpa [#allocation9], 1 }
 0x506   :  { %3654 = vsyncpa [#allocation12], 1 }
 0x507   :  { %3655 = vsyncpa [#allocation4], 1 }

</bundles_post_ra>
